<compile_context>
chip_gen: v6e
topology: v6e:2x2x1
jax: 0.10.0
libtpu: 0.0.40
codegen_flags: <defaults>
</compile_context>

<pallas_src>
import functools
import math

import jax
import jax.numpy as jnp
from jax.experimental import pallas as pl
from jax.experimental.pallas import tpu as pltpu


# ----------------------------------------------------------------------------
# Static network configuration (matches the PyTorch Critic module)
# ----------------------------------------------------------------------------
# (stride, (pad_lo, pad_hi), apply_leaky_relu)
_LAYER_CFG = [
    (2, (1, 1), True),
    (2, (1, 1), True),
    (2, (1, 1), True),
    (1, (1, 2), True),    # k=4, padding='same' in PyTorch -> left=1, right=2
    (1, (1, 2), False),
]

_WEIGHT_SHAPES = [        # OIHW
    (64, 4, 4, 4),
    (128, 64, 4, 4),
    (256, 128, 4, 4),
    (512, 256, 4, 4),
    (1, 512, 4, 4),
]

_K = 4          # conv kernel size
_ALPHA = 0.2    # LeakyReLU negative slope
_LANE = 128
_SUBLANE = 8


def _round_up(x, m):
    return (x + m - 1) // m * m


def _pad_axis(x, axis, target):
    pad = target - x.shape[axis]
    if pad <= 0:
        return x
    cfg = [(0, 0)] * x.ndim
    cfg[axis] = (0, pad)
    return jnp.pad(x, cfg)


# ----------------------------------------------------------------------------
# Pallas kernel: tiled (patches @ W) + bias + optional LeakyReLU(0.2)
# ----------------------------------------------------------------------------
def _mm_bias_lrelu_kernel(p_ref, w_ref, b_ref, o_ref, acc_ref, *, apply_lrelu):
    k = pl.program_id(2)

    @pl.when(k == 0)
    def _init():
        acc_ref[...] = jnp.zeros_like(acc_ref)

    # bf16 operands, f32 MXU accumulate
    acc_ref[...] += jnp.dot(p_ref[...], w_ref[...],
                            preferred_element_type=jnp.float32)

    @pl.when(k == pl.num_programs(2) - 1)
    def _epilogue():
        out = acc_ref[...] + b_ref[...]           # (tm,tn) + (1,tn), f32
        if apply_lrelu:
            out = jnp.where(out >= 0.0, out, _ALPHA * out)
        o_ref[...] = out.astype(o_ref.dtype)


def _fused_matmul_bias_lrelu(patches, w_mat, bias2d, apply_lrelu):
    """patches: (M, K) bf16, w_mat: (K, N) bf16, bias2d: (1, N) f32 -> (M, N) f32."""
    M, K = patches.shape
    N = w_mat.shape[1]

    # ---- tile selection: lane/sublane aligned, bounded VMEM per grid step ----
    tm = 512 if M > 512 else _round_up(M, _SUBLANE)
    tn = 256 if N > 256 else N                 # N already lane-friendly (prep)
    tk = 2048 if K > 2048 else K

    Mp = _round_up(M, tm)
    Np = _round_up(N, tn)
    Kp = _round_up(K, tk)

    patches = _pad_axis(_pad_axis(patches, 0, Mp), 1, Kp)
    w_mat = _pad_axis(_pad_axis(w_mat, 0, Kp), 1, Np)
    bias2d = _pad_axis(bias2d, 1, Np)

    grid = (Mp // tm, Np // tn, Kp // tk)
    kernel = functools.partial(_mm_bias_lrelu_kernel, apply_lrelu=apply_lrelu)

    out = pl.pallas_call(
        kernel,
        out_shape=jax.ShapeDtypeStruct((Mp, Np), jnp.float32),
        grid=grid,
        in_specs=[
            pl.BlockSpec((tm, tk), lambda i, j, k: (i, k)),
            pl.BlockSpec((tk, tn), lambda i, j, k: (k, j)),
            pl.BlockSpec((1, tn), lambda i, j, k: (0, j)),
        ],
        out_specs=pl.BlockSpec((tm, tn), lambda i, j, k: (i, j)),
        scratch_shapes=[pltpu.VMEM((tm, tn), jnp.float32)],
        compiler_params=pltpu.CompilerParams(
            dimension_semantics=("parallel", "parallel", "arbitrary"),
            vmem_limit_bytes=32 * 1024 * 1024,
        ),
    )(patches, w_mat, bias2d)
    return out[:M, :N]


# ----------------------------------------------------------------------------
# Glue: im2col patch extraction (data rearrangement only, no FLOPs), in bf16
# ----------------------------------------------------------------------------
def _im2col_bf16(x_nhwc, stride, pad):
    B, H, W, C = x_nhwc.shape
    x = x_nhwc.astype(jnp.bfloat16)
    xp = jnp.pad(x, ((0, 0), pad, pad, (0, 0)))
    Ho = (H + pad[0] + pad[1] - _K) // stride + 1
    Wo = (W + pad[0] + pad[1] - _K) // stride + 1
    taps = []
    for kh in range(_K):
        for kw in range(_K):
            taps.append(xp[:, kh:kh + stride * Ho:stride,
                           kw:kw + stride * Wo:stride, :])
    patches = jnp.concatenate(taps, axis=-1)          # (B, Ho, Wo, k*k*C)
    return patches.reshape(B * Ho * Wo, _K * _K * C), (B, Ho, Wo)


def _conv_layer(x_nhwc, w_mat, bias2d, cout, stride, pad, lrelu):
    patches, (B, Ho, Wo) = _im2col_bf16(x_nhwc, stride, pad)
    out = _fused_matmul_bias_lrelu(patches, w_mat, bias2d, lrelu)
    out = out.reshape(B, Ho, Wo, -1)
    return out[..., :cout]          # drop lane padding of the final layer


# ----------------------------------------------------------------------------
# Parameters
# ----------------------------------------------------------------------------
def init_params(key):
    """Kaiming-uniform-style init (matches PyTorch Conv2d default bounds)."""
    params = []
    for shp in _WEIGHT_SHAPES:
        key, kw_, kb_ = jax.random.split(key, 3)
        fan_in = shp[1] * shp[2] * shp[3]
        bound = 1.0 / math.sqrt(fan_in)
        w = jax.random.uniform(kw_, shp, jnp.float32, -bound, bound)
        b = jax.random.uniform(kb_, (shp[0],), jnp.float32, -bound, bound)
        params.append((w, b))
    return params


def prepare_params(params):
    """One-time layout prep: OIHW -> (K, N) bf16 matmul weights, (1, N) f32 bias.

    - layer 1: input channels zero-padded 4 -> 8  (K = 16*8 = 128, lane dense)
    - layer 5: output channel  zero-padded 1 -> 128 (lane-dense output stores)
    """
    prepped = []
    for idx, (w, b) in enumerate(params):
        cout, cin, kh, kw = w.shape
        if idx == 0:
            w = jnp.pad(w, ((0, 0), (0, _SUBLANE - cin), (0, 0), (0, 0)))
            cin = _SUBLANE
        # row index = (kh*4 + kw)*cin + ci  -- must match _im2col tap ordering
        w_mat = jnp.transpose(w, (2, 3, 1, 0)).reshape(kh * kw * cin, cout)
        bias2d = b.reshape(1, cout).astype(jnp.float32)
        if cout < _LANE // 2:          # final 1-channel layer
            w_mat = _pad_axis(w_mat, 1, _LANE)
            bias2d = _pad_axis(bias2d, 1, _LANE)
        prepped.append((w_mat.astype(jnp.bfloat16), bias2d))
    return prepped


# ----------------------------------------------------------------------------
# Critic forward
# ----------------------------------------------------------------------------
def critic_forward(prepped_params, image_bse, image_edx):
    """image_bse: (B, C1, H, W), image_edx: (B, C2, H, W), C1+C2 == 4 (NCHW)."""
    x = jnp.concatenate([image_bse, image_edx], axis=1)     # (B, 4, H, W)
    x = jnp.transpose(x, (0, 2, 3, 1))                      # -> NHWC
    if x.shape[-1] < _SUBLANE:                              # 4 -> 8 channels
        x = jnp.pad(x, ((0, 0), (0, 0), (0, 0), (0, _SUBLANE - x.shape[-1])))
    for (w_mat, bias2d), cfg, shp in zip(prepped_params, _LAYER_CFG,
                                         _WEIGHT_SHAPES):
        stride, pad, lrelu = cfg
        x = _conv_layer(x, w_mat, bias2d, shp[0], stride, pad, lrelu)
    return jnp.transpose(x, (0, 3, 1, 2))                   # back to NCHW


# ----------------------------------------------------------------------------
# Pure-JAX f32 reference (for correctness check)
# ----------------------------------------------------------------------------
def critic_forward_ref(params, image_bse, image_edx):
    x = jnp.concatenate([image_bse, image_edx], axis=1)
    for (w, b), (stride, pad, lrelu) in zip(params, _LAYER_CFG):
        x = jax.lax.conv_general_dilated(
            x, w, window_strides=(stride, stride), padding=(pad, pad),
            dimension_numbers=("NCHW", "OIHW", "NCHW"),
        ) + b.reshape(1, -1, 1, 1)
        if lrelu:
            x = jnp.where(x >= 0.0, x, _ALPHA * x)
    return x


if __name__ == "__main__":
    key = jax.random.PRNGKey(0)
    kp, kb, ke = jax.random.split(key, 3)

    params = init_params(kp)
    prepped = prepare_params(params)          # one-time weight layout / bf16 prep

    B, H, W = 2, 16, 16
    image_bse = jax.random.normal(kb, (B, 1, H, W), jnp.float32)   # 1 channel
    image_edx = jax.random.normal(ke, (B, 3, H, W), jnp.float32)   # 3 channels

    forward = jax.jit(critic_forward)
    out = jax.block_until_ready(forward(prepped, image_bse, image_edx))

    ref = jax.block_until_ready(critic_forward_ref(params, image_bse, image_edx))

    assert out.shape == (B, 1, 2, 2), out.shape
    max_err = float(jnp.max(jnp.abs(out - ref)))
    assert jnp.allclose(out, ref, rtol=2e-2, atol=2e-2), max_err

    print("KERNEL_OK")
</pallas_src>

<mosaic_0001>
module attributes {stable_mosaic.version = 11 : i64} {
  func.func @_mm_bias_lrelu_kernel(%arg0: i32, %arg1: i32, %arg2: i32, %arg3: memref<128x128xbf16, #tpu.memory_space<vmem>>, %arg4: memref<128x64xbf16, #tpu.memory_space<vmem>>, %arg5: memref<1x64xf32, #tpu.memory_space<vmem>>, %arg6: memref<128x64xf32, #tpu.memory_space<vmem>>, %arg7: memref<128x64xf32, #tpu.memory_space<vmem>>) attributes {dimension_semantics = [#tpu.dimension_semantics<parallel>, #tpu.dimension_semantics<parallel>, #tpu.dimension_semantics<arbitrary>], iteration_bounds = array<i64: 1, 1, 1>, scalar_prefetch = 0 : i64, scratch_operands = 1 : i64, tpu.core_type = #tpu.core_type<tc>, window_params = [{transform_indices = @transform_0, window_bounds = array<i64: 128, 128>}, {transform_indices = @transform_1, window_bounds = array<i64: 128, 64>}, {transform_indices = @transform_2, window_bounds = array<i64: 1, 64>}, {transform_indices = @transform_3, window_bounds = array<i64: 128, 64>}]} {
    %c0_i32 = arith.constant 0 : i32
    %0 = arith.cmpi eq, %arg2, %c0_i32 : i32
    %1 = arith.extui %0 : i1 to i32
    %c0_i32_0 = arith.constant 0 : i32
    %2 = arith.cmpi ne, %1, %c0_i32_0 : i32
    scf.if %2 {
      %cst_10 = arith.constant 0.000000e+00 : f32
      %12 = vector.broadcast %cst_10 : f32 to vector<128x64xf32>
      %c0_11 = arith.constant 0 : index
      %c0_12 = arith.constant 0 : index
      %13 = vector.load %arg7[%c0_11, %c0_12] : memref<128x64xf32, #tpu.memory_space<vmem>>, vector<128x64xf32>
      tpu.vector_store %arg7[%c0_11, %c0_12], %12 {strides = array<i32>} : memref<128x64xf32, #tpu.memory_space<vmem>>, vector<128x64xf32>,
    } else {
    }
    %c0 = arith.constant 0 : index
    %c0_1 = arith.constant 0 : index
    %3 = vector.load %arg7[%c0, %c0_1] : memref<128x64xf32, #tpu.memory_space<vmem>>, vector<128x64xf32>
    %c0_2 = arith.constant 0 : index
    %c0_3 = arith.constant 0 : index
    %4 = vector.load %arg3[%c0_2, %c0_3] : memref<128x128xbf16, #tpu.memory_space<vmem>>, vector<128x128xbf16>
    %c0_4 = arith.constant 0 : index
    %c0_5 = arith.constant 0 : index
    %5 = vector.load %arg4[%c0_4, %c0_5] : memref<128x64xbf16, #tpu.memory_space<vmem>>, vector<128x64xbf16>
    %cst = arith.constant dense<0.000000e+00> : vector<128x64xf32>
    %6 = tpu.matmul %4, %5, %cst {dimension_numbers = #tpu.dot_dimension_numbers<[1], [0], [0], [1], [0, 0, 1, 1], [], []>} : vector<128x128xbf16>, vector<128x64xbf16>, vector<128x64xf32> -> vector<128x64xf32>
    %7 = arith.addf %3, %6 : vector<128x64xf32>
    %c0_6 = arith.constant 0 : index
    %c0_7 = arith.constant 0 : index
    %8 = vector.load %arg7[%c0_6, %c0_7] : memref<128x64xf32, #tpu.memory_space<vmem>>, vector<128x64xf32>
    tpu.vector_store %arg7[%c0_6, %c0_7], %7 {strides = array<i32>} : memref<128x64xf32, #tpu.memory_space<vmem>>, vector<128x64xf32>,
    %c0_i32_8 = arith.constant 0 : i32
    %9 = arith.cmpi eq, %arg2, %c0_i32_8 : i32
    %10 = arith.extui %9 : i1 to i32
    %c0_i32_9 = arith.constant 0 : i32
    %11 = arith.cmpi ne, %10, %c0_i32_9 : i32
    scf.if %11 {
      %c0_10 = arith.constant 0 : index
      %c0_11 = arith.constant 0 : index
      %12 = vector.load %arg7[%c0_10, %c0_11] : memref<128x64xf32, #tpu.memory_space<vmem>>, vector<128x64xf32>
      %c0_12 = arith.constant 0 : index
      %c0_13 = arith.constant 0 : index
      %13 = vector.load %arg5[%c0_12, %c0_13] : memref<1x64xf32, #tpu.memory_space<vmem>>, vector<1x64xf32>
      %14 = vector.broadcast %13 : vector<1x64xf32> to vector<128x64xf32>
      %15 = arith.addf %12, %14 : vector<128x64xf32>
      %cst_14 = arith.constant 0.000000e+00 : f32
      %16 = vector.broadcast %cst_14 : f32 to vector<128x64xf32>
      %17 = arith.cmpf oge, %15, %16 : vector<128x64xf32>
      %cst_15 = arith.constant 2.000000e-01 : f32
      %18 = vector.broadcast %cst_15 : f32 to vector<128x64xf32>
      %19 = arith.mulf %18, %15 : vector<128x64xf32>
      %20 = arith.select %17, %15, %19 : vector<128x64xi1>, vector<128x64xf32>
      %c0_16 = arith.constant 0 : index
      %c0_17 = arith.constant 0 : index
      %21 = vector.load %arg6[%c0_16, %c0_17] : memref<128x64xf32, #tpu.memory_space<vmem>>, vector<128x64xf32>
      tpu.vector_store %arg6[%c0_16, %c0_17], %20 {strides = array<i32>} : memref<128x64xf32, #tpu.memory_space<vmem>>, vector<128x64xf32>,
    } else {
    }
    return
  }
  func.func @transform_0(%arg0: i32, %arg1: i32, %arg2: i32) -> (i32, i32) {
    %c0_i32 = arith.constant 0 : i32
    return %arg0, %arg2 : i32, i32
  }
  func.func @transform_1(%arg0: i32, %arg1: i32, %arg2: i32) -> (i32, i32) {
    %c0_i32 = arith.constant 0 : i32
    return %arg2, %arg1 : i32, i32
  }
  func.func @transform_2(%arg0: i32, %arg1: i32, %arg2: i32) -> (i32, i32) {
    %c0_i32 = arith.constant 0 : i32
    %c0_i32_0 = arith.constant 0 : i32
    return %c0_i32, %arg1 : i32, i32
  }
  func.func @transform_3(%arg0: i32, %arg1: i32, %arg2: i32) -> (i32, i32) {
    %c0_i32 = arith.constant 0 : i32
    return %arg0, %arg1 : i32, i32
  }
}

module attributes {stable_mosaic.version = 11 : i64} {
  func.func @_mm_bias_lrelu_kernel(%arg0: i32, %arg1: i32, %arg2: i32, %arg3: memref<32x1024xbf16, #tpu.memory_space<vmem>>, %arg4: memref<1024x128xbf16, #tpu.memory_space<vmem>>, %arg5: memref<1x128xf32, #tpu.memory_space<vmem>>, %arg6: memref<32x128xf32, #tpu.memory_space<vmem>>, %arg7: memref<32x128xf32, #tpu.memory_space<vmem>>) attributes {dimension_semantics = [#tpu.dimension_semantics<parallel>, #tpu.dimension_semantics<parallel>, #tpu.dimension_semantics<arbitrary>], iteration_bounds = array<i64: 1, 1, 1>, scalar_prefetch = 0 : i64, scratch_operands = 1 : i64, tpu.core_type = #tpu.core_type<tc>, window_params = [{transform_indices = @transform_0, window_bounds = array<i64: 32, 1024>}, {transform_indices = @transform_1, window_bounds = array<i64: 1024, 128>}, {transform_indices = @transform_2, window_bounds = array<i64: 1, 128>}, {transform_indices = @transform_3, window_bounds = array<i64: 32, 128>}]} {
    %c0_i32 = arith.constant 0 : i32
    %0 = arith.cmpi eq, %arg2, %c0_i32 : i32
    %1 = arith.extui %0 : i1 to i32
    %c0_i32_0 = arith.constant 0 : i32
    %2 = arith.cmpi ne, %1, %c0_i32_0 : i32
    scf.if %2 {
      %cst_10 = arith.constant 0.000000e+00 : f32
      %12 = vector.broadcast %cst_10 : f32 to vector<32x128xf32>
      %c0_11 = arith.constant 0 : index
      %c0_12 = arith.constant 0 : index
      %13 = vector.load %arg7[%c0_11, %c0_12] : memref<32x128xf32, #tpu.memory_space<vmem>>, vector<32x128xf32>
      tpu.vector_store %arg7[%c0_11, %c0_12], %12 {strides = array<i32>} : memref<32x128xf32, #tpu.memory_space<vmem>>, vector<32x128xf32>,
    } else {
    }
    %c0 = arith.constant 0 : index
    %c0_1 = arith.constant 0 : index
    %3 = vector.load %arg7[%c0, %c0_1] : memref<32x128xf32, #tpu.memory_space<vmem>>, vector<32x128xf32>
    %c0_2 = arith.constant 0 : index
    %c0_3 = arith.constant 0 : index
    %4 = vector.load %arg3[%c0_2, %c0_3] : memref<32x1024xbf16, #tpu.memory_space<vmem>>, vector<32x1024xbf16>
    %c0_4 = arith.constant 0 : index
    %c0_5 = arith.constant 0 : index
    %5 = vector.load %arg4[%c0_4, %c0_5] : memref<1024x128xbf16, #tpu.memory_space<vmem>>, vector<1024x128xbf16>
    %cst = arith.constant dense<0.000000e+00> : vector<32x128xf32>
    %6 = tpu.matmul %4, %5, %cst {dimension_numbers = #tpu.dot_dimension_numbers<[1], [0], [0], [1], [0, 0, 1, 1], [], []>} : vector<32x1024xbf16>, vector<1024x128xbf16>, vector<32x128xf32> -> vector<32x128xf32>
    %7 = arith.addf %3, %6 : vector<32x128xf32>
    %c0_6 = arith.constant 0 : index
    %c0_7 = arith.constant 0 : index
    %8 = vector.load %arg7[%c0_6, %c0_7] : memref<32x128xf32, #tpu.memory_space<vmem>>, vector<32x128xf32>
    tpu.vector_store %arg7[%c0_6, %c0_7], %7 {strides = array<i32>} : memref<32x128xf32, #tpu.memory_space<vmem>>, vector<32x128xf32>,
    %c0_i32_8 = arith.constant 0 : i32
    %9 = arith.cmpi eq, %arg2, %c0_i32_8 : i32
    %10 = arith.extui %9 : i1 to i32
    %c0_i32_9 = arith.constant 0 : i32
    %11 = arith.cmpi ne, %10, %c0_i32_9 : i32
    scf.if %11 {
      %c0_10 = arith.constant 0 : index
      %c0_11 = arith.constant 0 : index
      %12 = vector.load %arg7[%c0_10, %c0_11] : memref<32x128xf32, #tpu.memory_space<vmem>>, vector<32x128xf32>
      %c0_12 = arith.constant 0 : index
      %c0_13 = arith.constant 0 : index
      %13 = vector.load %arg5[%c0_12, %c0_13] : memref<1x128xf32, #tpu.memory_space<vmem>>, vector<1x128xf32>
      %14 = vector.broadcast %13 : vector<1x128xf32> to vector<32x128xf32>
      %15 = arith.addf %12, %14 : vector<32x128xf32>
      %cst_14 = arith.constant 0.000000e+00 : f32
      %16 = vector.broadcast %cst_14 : f32 to vector<32x128xf32>
      %17 = arith.cmpf oge, %15, %16 : vector<32x128xf32>
      %cst_15 = arith.constant 2.000000e-01 : f32
      %18 = vector.broadcast %cst_15 : f32 to vector<32x128xf32>
      %19 = arith.mulf %18, %15 : vector<32x128xf32>
      %20 = arith.select %17, %15, %19 : vector<32x128xi1>, vector<32x128xf32>
      %c0_16 = arith.constant 0 : index
      %c0_17 = arith.constant 0 : index
      %21 = vector.load %arg6[%c0_16, %c0_17] : memref<32x128xf32, #tpu.memory_space<vmem>>, vector<32x128xf32>
      tpu.vector_store %arg6[%c0_16, %c0_17], %20 {strides = array<i32>} : memref<32x128xf32, #tpu.memory_space<vmem>>, vector<32x128xf32>,
    } else {
    }
    return
  }
  func.func @transform_0(%arg0: i32, %arg1: i32, %arg2: i32) -> (i32, i32) {
    %c0_i32 = arith.constant 0 : i32
    return %arg0, %arg2 : i32, i32
  }
  func.func @transform_1(%arg0: i32, %arg1: i32, %arg2: i32) -> (i32, i32) {
    %c0_i32 = arith.constant 0 : i32
    return %arg2, %arg1 : i32, i32
  }
  func.func @transform_2(%arg0: i32, %arg1: i32, %arg2: i32) -> (i32, i32) {
    %c0_i32 = arith.constant 0 : i32
    %c0_i32_0 = arith.constant 0 : i32
    return %c0_i32, %arg1 : i32, i32
  }
  func.func @transform_3(%arg0: i32, %arg1: i32, %arg2: i32) -> (i32, i32) {
    %c0_i32 = arith.constant 0 : i32
    return %arg0, %arg1 : i32, i32
  }
}

module attributes {stable_mosaic.version = 11 : i64} {
  func.func @_mm_bias_lrelu_kernel(%arg0: i32, %arg1: i32, %arg2: i32, %arg3: memref<8x2048xbf16, #tpu.memory_space<vmem>>, %arg4: memref<2048x256xbf16, #tpu.memory_space<vmem>>, %arg5: memref<1x256xf32, #tpu.memory_space<vmem>>, %arg6: memref<8x256xf32, #tpu.memory_space<vmem>>, %arg7: memref<8x256xf32, #tpu.memory_space<vmem>>) attributes {dimension_semantics = [#tpu.dimension_semantics<parallel>, #tpu.dimension_semantics<parallel>, #tpu.dimension_semantics<arbitrary>], iteration_bounds = array<i64: 1, 1, 1>, scalar_prefetch = 0 : i64, scratch_operands = 1 : i64, tpu.core_type = #tpu.core_type<tc>, window_params = [{transform_indices = @transform_0, window_bounds = array<i64: 8, 2048>}, {transform_indices = @transform_1, window_bounds = array<i64: 2048, 256>}, {transform_indices = @transform_2, window_bounds = array<i64: 1, 256>}, {transform_indices = @transform_3, window_bounds = array<i64: 8, 256>}]} {
    %c0_i32 = arith.constant 0 : i32
    %0 = arith.cmpi eq, %arg2, %c0_i32 : i32
    %1 = arith.extui %0 : i1 to i32
    %c0_i32_0 = arith.constant 0 : i32
    %2 = arith.cmpi ne, %1, %c0_i32_0 : i32
    scf.if %2 {
      %cst_10 = arith.constant 0.000000e+00 : f32
      %12 = vector.broadcast %cst_10 : f32 to vector<8x256xf32>
      %c0_11 = arith.constant 0 : index
      %c0_12 = arith.constant 0 : index
      %13 = vector.load %arg7[%c0_11, %c0_12] : memref<8x256xf32, #tpu.memory_space<vmem>>, vector<8x256xf32>
      tpu.vector_store %arg7[%c0_11, %c0_12], %12 {strides = array<i32>} : memref<8x256xf32, #tpu.memory_space<vmem>>, vector<8x256xf32>,
    } else {
    }
    %c0 = arith.constant 0 : index
    %c0_1 = arith.constant 0 : index
    %3 = vector.load %arg7[%c0, %c0_1] : memref<8x256xf32, #tpu.memory_space<vmem>>, vector<8x256xf32>
    %c0_2 = arith.constant 0 : index
    %c0_3 = arith.constant 0 : index
    %4 = vector.load %arg3[%c0_2, %c0_3] : memref<8x2048xbf16, #tpu.memory_space<vmem>>, vector<8x2048xbf16>
    %c0_4 = arith.constant 0 : index
    %c0_5 = arith.constant 0 : index
    %5 = vector.load %arg4[%c0_4, %c0_5] : memref<2048x256xbf16, #tpu.memory_space<vmem>>, vector<2048x256xbf16>
    %cst = arith.constant dense<0.000000e+00> : vector<8x256xf32>
    %6 = tpu.matmul %4, %5, %cst {dimension_numbers = #tpu.dot_dimension_numbers<[1], [0], [0], [1], [0, 0, 1, 1], [], []>} : vector<8x2048xbf16>, vector<2048x256xbf16>, vector<8x256xf32> -> vector<8x256xf32>
    %7 = arith.addf %3, %6 : vector<8x256xf32>
    %c0_6 = arith.constant 0 : index
    %c0_7 = arith.constant 0 : index
    %8 = vector.load %arg7[%c0_6, %c0_7] : memref<8x256xf32, #tpu.memory_space<vmem>>, vector<8x256xf32>
    tpu.vector_store %arg7[%c0_6, %c0_7], %7 {strides = array<i32>} : memref<8x256xf32, #tpu.memory_space<vmem>>, vector<8x256xf32>,
    %c0_i32_8 = arith.constant 0 : i32
    %9 = arith.cmpi eq, %arg2, %c0_i32_8 : i32
    %10 = arith.extui %9 : i1 to i32
    %c0_i32_9 = arith.constant 0 : i32
    %11 = arith.cmpi ne, %10, %c0_i32_9 : i32
    scf.if %11 {
      %c0_10 = arith.constant 0 : index
      %c0_11 = arith.constant 0 : index
      %12 = vector.load %arg7[%c0_10, %c0_11] : memref<8x256xf32, #tpu.memory_space<vmem>>, vector<8x256xf32>
      %c0_12 = arith.constant 0 : index
      %c0_13 = arith.constant 0 : index
      %13 = vector.load %arg5[%c0_12, %c0_13] : memref<1x256xf32, #tpu.memory_space<vmem>>, vector<1x256xf32>
      %14 = vector.broadcast %13 : vector<1x256xf32> to vector<8x256xf32>
      %15 = arith.addf %12, %14 : vector<8x256xf32>
      %cst_14 = arith.constant 0.000000e+00 : f32
      %16 = vector.broadcast %cst_14 : f32 to vector<8x256xf32>
      %17 = arith.cmpf oge, %15, %16 : vector<8x256xf32>
      %cst_15 = arith.constant 2.000000e-01 : f32
      %18 = vector.broadcast %cst_15 : f32 to vector<8x256xf32>
      %19 = arith.mulf %18, %15 : vector<8x256xf32>
      %20 = arith.select %17, %15, %19 : vector<8x256xi1>, vector<8x256xf32>
      %c0_16 = arith.constant 0 : index
      %c0_17 = arith.constant 0 : index
      %21 = vector.load %arg6[%c0_16, %c0_17] : memref<8x256xf32, #tpu.memory_space<vmem>>, vector<8x256xf32>
      tpu.vector_store %arg6[%c0_16, %c0_17], %20 {strides = array<i32>} : memref<8x256xf32, #tpu.memory_space<vmem>>, vector<8x256xf32>,
    } else {
    }
    return
  }
  func.func @transform_0(%arg0: i32, %arg1: i32, %arg2: i32) -> (i32, i32) {
    %c0_i32 = arith.constant 0 : i32
    return %arg0, %arg2 : i32, i32
  }
  func.func @transform_1(%arg0: i32, %arg1: i32, %arg2: i32) -> (i32, i32) {
    %c0_i32 = arith.constant 0 : i32
    return %arg2, %arg1 : i32, i32
  }
  func.func @transform_2(%arg0: i32, %arg1: i32, %arg2: i32) -> (i32, i32) {
    %c0_i32 = arith.constant 0 : i32
    %c0_i32_0 = arith.constant 0 : i32
    return %c0_i32, %arg1 : i32, i32
  }
  func.func @transform_3(%arg0: i32, %arg1: i32, %arg2: i32) -> (i32, i32) {
    %c0_i32 = arith.constant 0 : i32
    return %arg0, %arg1 : i32, i32
  }
}

module attributes {stable_mosaic.version = 11 : i64} {
  func.func @_mm_bias_lrelu_kernel(%arg0: i32, %arg1: i32, %arg2: i32, %arg3: memref<8x2048xbf16, #tpu.memory_space<vmem>>, %arg4: memref<2048x256xbf16, #tpu.memory_space<vmem>>, %arg5: memref<1x256xf32, #tpu.memory_space<vmem>>, %arg6: memref<8x256xf32, #tpu.memory_space<vmem>>, %arg7: memref<8x256xf32, #tpu.memory_space<vmem>>) attributes {dimension_semantics = [#tpu.dimension_semantics<parallel>, #tpu.dimension_semantics<parallel>, #tpu.dimension_semantics<arbitrary>], iteration_bounds = array<i64: 1, 2, 2>, scalar_prefetch = 0 : i64, scratch_operands = 1 : i64, tpu.core_type = #tpu.core_type<tc>, window_params = [{transform_indices = @transform_0, window_bounds = array<i64: 8, 2048>}, {transform_indices = @transform_1, window_bounds = array<i64: 2048, 256>}, {transform_indices = @transform_2, window_bounds = array<i64: 1, 256>}, {transform_indices = @transform_3, window_bounds = array<i64: 8, 256>}]} {
    %c0_i32 = arith.constant 0 : i32
    %0 = arith.cmpi eq, %arg2, %c0_i32 : i32
    %1 = arith.extui %0 : i1 to i32
    %c0_i32_0 = arith.constant 0 : i32
    %2 = arith.cmpi ne, %1, %c0_i32_0 : i32
    scf.if %2 {
      %cst_9 = arith.constant 0.000000e+00 : f32
      %12 = vector.broadcast %cst_9 : f32 to vector<8x256xf32>
      %c0_10 = arith.constant 0 : index
      %c0_11 = arith.constant 0 : index
      %13 = vector.load %arg7[%c0_10, %c0_11] : memref<8x256xf32, #tpu.memory_space<vmem>>, vector<8x256xf32>
      tpu.vector_store %arg7[%c0_10, %c0_11], %12 {strides = array<i32>} : memref<8x256xf32, #tpu.memory_space<vmem>>, vector<8x256xf32>,
    } else {
    }
    %c0 = arith.constant 0 : index
    %c0_1 = arith.constant 0 : index
    %3 = vector.load %arg7[%c0, %c0_1] : memref<8x256xf32, #tpu.memory_space<vmem>>, vector<8x256xf32>
    %c0_2 = arith.constant 0 : index
    %c0_3 = arith.constant 0 : index
    %4 = vector.load %arg3[%c0_2, %c0_3] : memref<8x2048xbf16, #tpu.memory_space<vmem>>, vector<8x2048xbf16>
    %c0_4 = arith.constant 0 : index
    %c0_5 = arith.constant 0 : index
    %5 = vector.load %arg4[%c0_4, %c0_5] : memref<2048x256xbf16, #tpu.memory_space<vmem>>, vector<2048x256xbf16>
    %cst = arith.constant dense<0.000000e+00> : vector<8x256xf32>
    %6 = tpu.matmul %4, %5, %cst {dimension_numbers = #tpu.dot_dimension_numbers<[1], [0], [0], [1], [0, 0, 1, 1], [], []>} : vector<8x2048xbf16>, vector<2048x256xbf16>, vector<8x256xf32> -> vector<8x256xf32>
    %7 = arith.addf %3, %6 : vector<8x256xf32>
    %c0_6 = arith.constant 0 : index
    %c0_7 = arith.constant 0 : index
    %8 = vector.load %arg7[%c0_6, %c0_7] : memref<8x256xf32, #tpu.memory_space<vmem>>, vector<8x256xf32>
    tpu.vector_store %arg7[%c0_6, %c0_7], %7 {strides = array<i32>} : memref<8x256xf32, #tpu.memory_space<vmem>>, vector<8x256xf32>,
    %c1_i32 = arith.constant 1 : i32
    %9 = arith.cmpi eq, %arg2, %c1_i32 : i32
    %10 = arith.extui %9 : i1 to i32
    %c0_i32_8 = arith.constant 0 : i32
    %11 = arith.cmpi ne, %10, %c0_i32_8 : i32
    scf.if %11 {
      %c0_9 = arith.constant 0 : index
      %c0_10 = arith.constant 0 : index
      %12 = vector.load %arg7[%c0_9, %c0_10] : memref<8x256xf32, #tpu.memory_space<vmem>>, vector<8x256xf32>
      %c0_11 = arith.constant 0 : index
      %c0_12 = arith.constant 0 : index
      %13 = vector.load %arg5[%c0_11, %c0_12] : memref<1x256xf32, #tpu.memory_space<vmem>>, vector<1x256xf32>
      %14 = vector.broadcast %13 : vector<1x256xf32> to vector<8x256xf32>
      %15 = arith.addf %12, %14 : vector<8x256xf32>
      %cst_13 = arith.constant 0.000000e+00 : f32
      %16 = vector.broadcast %cst_13 : f32 to vector<8x256xf32>
      %17 = arith.cmpf oge, %15, %16 : vector<8x256xf32>
      %cst_14 = arith.constant 2.000000e-01 : f32
      %18 = vector.broadcast %cst_14 : f32 to vector<8x256xf32>
      %19 = arith.mulf %18, %15 : vector<8x256xf32>
      %20 = arith.select %17, %15, %19 : vector<8x256xi1>, vector<8x256xf32>
      %c0_15 = arith.constant 0 : index
      %c0_16 = arith.constant 0 : index
      %21 = vector.load %arg6[%c0_15, %c0_16] : memref<8x256xf32, #tpu.memory_space<vmem>>, vector<8x256xf32>
      tpu.vector_store %arg6[%c0_15, %c0_16], %20 {strides = array<i32>} : memref<8x256xf32, #tpu.memory_space<vmem>>, vector<8x256xf32>,
    } else {
    }
    return
  }
  func.func @transform_0(%arg0: i32, %arg1: i32, %arg2: i32) -> (i32, i32) {
    %c0_i32 = arith.constant 0 : i32
    return %arg0, %arg2 : i32, i32
  }
  func.func @transform_1(%arg0: i32, %arg1: i32, %arg2: i32) -> (i32, i32) {
    %c0_i32 = arith.constant 0 : i32
    return %arg2, %arg1 : i32, i32
  }
  func.func @transform_2(%arg0: i32, %arg1: i32, %arg2: i32) -> (i32, i32) {
    %c0_i32 = arith.constant 0 : i32
    %c0_i32_0 = arith.constant 0 : i32
    return %c0_i32, %arg1 : i32, i32
  }
  func.func @transform_3(%arg0: i32, %arg1: i32, %arg2: i32) -> (i32, i32) {
    %c0_i32 = arith.constant 0 : i32
    return %arg0, %arg1 : i32, i32
  }
}

module attributes {stable_mosaic.version = 11 : i64} {
  func.func @_mm_bias_lrelu_kernel(%arg0: i32, %arg1: i32, %arg2: i32, %arg3: memref<8x2048xbf16, #tpu.memory_space<vmem>>, %arg4: memref<2048x128xbf16, #tpu.memory_space<vmem>>, %arg5: memref<1x128xf32, #tpu.memory_space<vmem>>, %arg6: memref<8x128xf32, #tpu.memory_space<vmem>>, %arg7: memref<8x128xf32, #tpu.memory_space<vmem>>) attributes {dimension_semantics = [#tpu.dimension_semantics<parallel>, #tpu.dimension_semantics<parallel>, #tpu.dimension_semantics<arbitrary>], iteration_bounds = array<i64: 1, 1, 4>, scalar_prefetch = 0 : i64, scratch_operands = 1 : i64, tpu.core_type = #tpu.core_type<tc>, window_params = [{transform_indices = @transform_0, window_bounds = array<i64: 8, 2048>}, {transform_indices = @transform_1, window_bounds = array<i64: 2048, 128>}, {transform_indices = @transform_2, window_bounds = array<i64: 1, 128>}, {transform_indices = @transform_3, window_bounds = array<i64: 8, 128>}]} {
    %c0_i32 = arith.constant 0 : i32
    %0 = arith.cmpi eq, %arg2, %c0_i32 : i32
    %1 = arith.extui %0 : i1 to i32
    %c0_i32_0 = arith.constant 0 : i32
    %2 = arith.cmpi ne, %1, %c0_i32_0 : i32
    scf.if %2 {
      %cst_9 = arith.constant 0.000000e+00 : f32
      %12 = vector.broadcast %cst_9 : f32 to vector<8x128xf32>
      %c0_10 = arith.constant 0 : index
      %c0_11 = arith.constant 0 : index
      %13 = vector.load %arg7[%c0_10, %c0_11] : memref<8x128xf32, #tpu.memory_space<vmem>>, vector<8x128xf32>
      tpu.vector_store %arg7[%c0_10, %c0_11], %12 {strides = array<i32>} : memref<8x128xf32, #tpu.memory_space<vmem>>, vector<8x128xf32>,
    } else {
    }
    %c0 = arith.constant 0 : index
    %c0_1 = arith.constant 0 : index
    %3 = vector.load %arg7[%c0, %c0_1] : memref<8x128xf32, #tpu.memory_space<vmem>>, vector<8x128xf32>
    %c0_2 = arith.constant 0 : index
    %c0_3 = arith.constant 0 : index
    %4 = vector.load %arg3[%c0_2, %c0_3] : memref<8x2048xbf16, #tpu.memory_space<vmem>>, vector<8x2048xbf16>
    %c0_4 = arith.constant 0 : index
    %c0_5 = arith.constant 0 : index
    %5 = vector.load %arg4[%c0_4, %c0_5] : memref<2048x128xbf16, #tpu.memory_space<vmem>>, vector<2048x128xbf16>
    %cst = arith.constant dense<0.000000e+00> : vector<8x128xf32>
    %6 = tpu.matmul %4, %5, %cst {dimension_numbers = #tpu.dot_dimension_numbers<[1], [0], [0], [1], [0, 0, 1, 1], [], []>} : vector<8x2048xbf16>, vector<2048x128xbf16>, vector<8x128xf32> -> vector<8x128xf32>
    %7 = arith.addf %3, %6 : vector<8x128xf32>
    %c0_6 = arith.constant 0 : index
    %c0_7 = arith.constant 0 : index
    %8 = vector.load %arg7[%c0_6, %c0_7] : memref<8x128xf32, #tpu.memory_space<vmem>>, vector<8x128xf32>
    tpu.vector_store %arg7[%c0_6, %c0_7], %7 {strides = array<i32>} : memref<8x128xf32, #tpu.memory_space<vmem>>, vector<8x128xf32>,
    %c3_i32 = arith.constant 3 : i32
    %9 = arith.cmpi eq, %arg2, %c3_i32 : i32
    %10 = arith.extui %9 : i1 to i32
    %c0_i32_8 = arith.constant 0 : i32
    %11 = arith.cmpi ne, %10, %c0_i32_8 : i32
    scf.if %11 {
      %c0_9 = arith.constant 0 : index
      %c0_10 = arith.constant 0 : index
      %12 = vector.load %arg7[%c0_9, %c0_10] : memref<8x128xf32, #tpu.memory_space<vmem>>, vector<8x128xf32>
      %c0_11 = arith.constant 0 : index
      %c0_12 = arith.constant 0 : index
      %13 = vector.load %arg5[%c0_11, %c0_12] : memref<1x128xf32, #tpu.memory_space<vmem>>, vector<1x128xf32>
      %14 = vector.broadcast %13 : vector<1x128xf32> to vector<8x128xf32>
      %15 = arith.addf %12, %14 : vector<8x128xf32>
      %c0_13 = arith.constant 0 : index
      %c0_14 = arith.constant 0 : index
      %16 = vector.load %arg6[%c0_13, %c0_14] : memref<8x128xf32, #tpu.memory_space<vmem>>, vector<8x128xf32>
      tpu.vector_store %arg6[%c0_13, %c0_14], %15 {strides = array<i32>} : memref<8x128xf32, #tpu.memory_space<vmem>>, vector<8x128xf32>,
    } else {
    }
    return
  }
  func.func @transform_0(%arg0: i32, %arg1: i32, %arg2: i32) -> (i32, i32) {
    %c0_i32 = arith.constant 0 : i32
    return %arg0, %arg2 : i32, i32
  }
  func.func @transform_1(%arg0: i32, %arg1: i32, %arg2: i32) -> (i32, i32) {
    %c0_i32 = arith.constant 0 : i32
    return %arg2, %arg1 : i32, i32
  }
  func.func @transform_2(%arg0: i32, %arg1: i32, %arg2: i32) -> (i32, i32) {
    %c0_i32 = arith.constant 0 : i32
    %c0_i32_0 = arith.constant 0 : i32
    return %c0_i32, %arg1 : i32, i32
  }
  func.func @transform_3(%arg0: i32, %arg1: i32, %arg2: i32) -> (i32, i32) {
    %c0_i32 = arith.constant 0 : i32
    return %arg0, %arg1 : i32, i32
  }
}

</mosaic_0001>

<bundles_post_ra>
// kernel: critic_forward.5
= control target key start
LH: loop header
LB: loop body
LE: loop exit
PB: predicated region body
PF: predicated region fallthrough
CT: control target
= control target key end

     0   :  { %8 = vsyncpa [#allocation4], 0  ;;  %s554_s12 = smov [#allocation3]   ;;  %s741_s0 = inlined_call_operand.vmem [shape: bf16[128,128], index: 0, kind: input, shape index: {}]   ;;  %s742_s1 = inlined_call_operand.vmem [shape: bf16[128,64], index: 1, kind: input, shape index: {}]   ;;  %s743_s2 = inlined_call_operand.hbm [shape: f32[1,64], index: 2, kind: input, shape index: {}]   ;;  %s744_s3 = inlined_call_operand.vmem [shape: f32[128,64], index: 3, kind: output, shape index: {}]  }
   0x1   :  { %s19_s13 = sshll.u32 %s554_s12, 4  ;;  %s20_s13 = int_to_ptr.vmem [resolvable:$true] %s19_s13 }
   0x2   :  { %s540_s14 = scalar_lea.vmem %s20_s13, 16  ;;  %s544_s15 = scalar_lea.vmem %s20_s13, 32 }
   0x3   :  { %p541_p0 = scmp.ne.s32.totalorder %s20_s13, %s540_s14  ;;  %p545_p1 = scmp.lt.s32.totalorder %s20_s13, %s20_s13 }
   0x4   :  { %p546_p2 = scmp.lt.s32.totalorder %s544_s15, %s540_s14 }
   0x6   :  { %p547_p3 = por %p546_p2, %p545_p1 }
   0x8   :  { %p548_p4 = pnand %p547_p3, %p541_p0 }
   0xa   :  { %551 = shalt.err (!%p548_p4)
}
   0xb   :  { %22 = dma.hbm_to_vmem [thread:$0]  %s743_s2, 16, %s20_s13, [#allocation4]  }
   0xc   :  { %552 = dma.done.wait [#allocation4], 16  }
   0xd   :  { %553 = vsyncadd [#allocation4], 4294967280  ;;  %vm31_vm0 = vcmask 523264   ;;  %v555_v0 = vmov 0.0   ;;  %v516_v1 = vld [vmem:[%s742_s1 + $0x38] sm:$0xff]   ;;  %v517_v2 = vld [vmem:[%s742_s1 + $0x30] sm:$0xff]  }
   0xe   :  { %34 = vst.msk [vmem:[#allocation2 + $0x10] sm:$0xff] %vm31_vm0, %v555_v0  ;;  %32 = vst.msk [vmem:[#allocation2] sm:$0xff] %vm31_vm0, %v555_v0  ;;  %466 = vmatprep.subr.bf16.mxu0 %v516_v1  ;;  %498 = vmatprep.subr.bf16.mxu1 %v516_v1  ;;  %v518_v3 = vld [vmem:[%s742_s1 + $0x28] sm:$0xff]   ;;  %v519_v4 = vld [vmem:[%s742_s1 + $0x20] sm:$0xff]  }
   0xf   :  { %33 = vst.msk [vmem:[#allocation2 + $0x8] sm:$0xff] %vm31_vm0, %v555_v0  ;;  %35 = vst.msk [vmem:[#allocation2 + $0x18] sm:$0xff] %vm31_vm0, %v555_v0  ;;  %467 = vmatpush3.bf16.msra.mxu0 %v516_v1  ;;  %506 = vmatpush3.bf16.msra.mxu1 %v516_v1  ;;  %v524_v5 = vld [vmem:[%s741_s0] sm:$0xff]   ;;  %v520_v7 = vld [vmem:[%s742_s1 + $0x18] sm:$0xff]  }
  0x10   :  { %36 = vst.msk [vmem:[#allocation2 + $0x20] sm:$0xff] %vm31_vm0, %v555_v0  ;;  %37 = vst.msk [vmem:[#allocation2 + $0x28] sm:$0xff] %vm31_vm0, %v555_v0  ;;  %468 = vmatprep.subr.bf16.mxu0 %v517_v2  ;;  %499 = vmatprep.subr.bf16.mxu1 %v517_v2  ;;  %v525_v6 = vld [vmem:[%s741_s0 + $0x20] sm:$0xff]   ;;  %v521_v8 = vld [vmem:[%s742_s1 + $0x10] sm:$0xff]  }
  0x11   :  { %38 = vst.msk [vmem:[#allocation2 + $0x30] sm:$0xff] %vm31_vm0, %v555_v0  ;;  %39 = vst.msk [vmem:[#allocation2 + $0x38] sm:$0xff] %vm31_vm0, %v555_v0  ;;  %482 = vmatprep.mubr.bf16.mxu0 %v524_v5  ;;  %490 = vmatprep.mubr.bf16.mxu1 %v525_v6  ;;  %v522_v9 = vld [vmem:[%s742_s1 + $0x8] sm:$0xff]   ;;  %v523_v10 = vld [vmem:[%s742_s1] sm:$0xff]  }
  0x12   :  { %40 = vst.msk [vmem:[#allocation2 + $0x40] sm:$0xff] %vm31_vm0, %v555_v0  ;;  %41 = vst.msk [vmem:[#allocation2 + $0x48] sm:$0xff] %vm31_vm0, %v555_v0  ;;  %v526_v11 = vld [vmem:[%s741_s0 + $0x8] sm:$0xff]   ;;  %v528_v13 = vld [vmem:[%s741_s0 + $0x10] sm:$0xff]  }
  0x13   :  { %42 = vst.msk [vmem:[#allocation2 + $0x50] sm:$0xff] %vm31_vm0, %v555_v0  ;;  %43 = vst.msk [vmem:[#allocation2 + $0x58] sm:$0xff] %vm31_vm0, %v555_v0  ;;  %469 = vmatpush3.bf16.msra.mxu0 %v517_v2  ;;  %507 = vmatpush3.bf16.msra.mxu1 %v517_v2  ;;  %v527_v12 = vld [vmem:[%s741_s0 + $0x28] sm:$0xff]   ;;  %v529_v14 = vld [vmem:[%s741_s0 + $0x30] sm:$0xff]  }
  0x14   :  { %44 = vst.msk [vmem:[#allocation2 + $0x60] sm:$0xff] %vm31_vm0, %v555_v0  ;;  %45 = vst.msk [vmem:[#allocation2 + $0x68] sm:$0xff] %vm31_vm0, %v555_v0  ;;  %470 = vmatprep.subr.bf16.mxu0 %v518_v3  ;;  %500 = vmatprep.subr.bf16.mxu1 %v518_v3  ;;  %v530_v15 = vld [vmem:[%s741_s0 + $0x18] sm:$0xff]   ;;  %v649_v43 = vld [vmem:[#allocation3] ss:$0 sm:$0xff] }
  0x15   :  { %46 = vst.msk [vmem:[#allocation2 + $0x70] sm:$0xff] %vm31_vm0, %v555_v0  ;;  %47 = vst.msk [vmem:[#allocation2 + $0x78] sm:$0xff] %vm31_vm0, %v555_v0  ;;  %v531_v16 = vld [vmem:[%s741_s0 + $0x38] sm:$0xff]   ;;  %v50_v17 = vld [vmem:[#allocation2 + $0x10] sm:$0xff] }
  0x16   :  { %v48_v21 = vld [vmem:[#allocation2] sm:$0xff]  ;;  %v51_v27 = vld [vmem:[#allocation2 + $0x18] sm:$0xff]  ;;  %v49_v33 = vld [vmem:[#allocation2 + $0x8] sm:$0xff] }
  0x17   :  { %471 = vmatpush3.bf16.msra.mxu0 %v518_v3  ;;  %508 = vmatpush3.bf16.msra.mxu1 %v518_v3  ;;  %v52_v46 = vld [vmem:[#allocation2 + $0x20] sm:$0xff] }
  0x18   :  { %472 = vmatprep.subr.bf16.mxu0 %v519_v4  ;;  %501 = vmatprep.subr.bf16.mxu1 %v519_v4  ;;  %v54_v39 = vld [vmem:[#allocation2 + $0x30] sm:$0xff]  ;;  %v55_v58 = vld [vmem:[#allocation2 + $0x38] sm:$0xff] }
  0x19   :  { %v56_v22 = vld [vmem:[#allocation2 + $0x40] sm:$0xff]  ;;  %v57_v34 = vld [vmem:[#allocation2 + $0x48] sm:$0xff] }
  0x1a   :  { %v58_v18 = vld [vmem:[#allocation2 + $0x50] sm:$0xff]  ;;  %v59_v28 = vld [vmem:[#allocation2 + $0x58] sm:$0xff] }
  0x1b   :  { %473 = vmatpush3.bf16.msra.mxu0 %v519_v4  ;;  %509 = vmatpush3.bf16.msra.mxu1 %v519_v4  ;;  %v60_v47 = vld [vmem:[#allocation2 + $0x60] sm:$0xff] }
  0x1c   :  { %474 = vmatprep.subr.bf16.mxu0 %v520_v7  ;;  %502 = vmatprep.subr.bf16.mxu1 %v520_v7  ;;  %v62_v40 = vld [vmem:[#allocation2 + $0x70] sm:$0xff]  ;;  %v63_v59 = vld [vmem:[#allocation2 + $0x78] sm:$0xff] }
  0x1f   :  { %475 = vmatpush3.bf16.msra.mxu0 %v520_v7  ;;  %510 = vmatpush3.bf16.msra.mxu1 %v520_v7 }
  0x20   :  { %476 = vmatprep.subr.bf16.mxu0 %v521_v8  ;;  %503 = vmatprep.subr.bf16.mxu1 %v521_v8 }
  0x23   :  { %477 = vmatpush3.bf16.msra.mxu0 %v521_v8  ;;  %511 = vmatpush3.bf16.msra.mxu1 %v521_v8 }
  0x24   :  { %478 = vmatprep.subr.bf16.mxu0 %v522_v9  ;;  %504 = vmatprep.subr.bf16.mxu1 %v522_v9 }
  0x27   :  { %479 = vmatpush3.bf16.msra.mxu0 %v522_v9  ;;  %512 = vmatpush3.bf16.msra.mxu1 %v522_v9 }
  0x28   :  { %480 = vmatprep.subr.bf16.mxu0 %v523_v10  ;;  %505 = vmatprep.subr.bf16.mxu1 %v523_v10 }
  0x2b   :  { %481 = vmatpush3.bf16.msra.mxu0 %v523_v10  ;;  %513 = vmatpush3.bf16.msra.mxu1 %v523_v10 }
  0x2e   :  { %483 = vmatmul.mubr.bf16.vlgmr.msra.gmra.mxu0 %v526_v11  ;;  %491 = vmatmul.mubr.bf16.vlgmr.msra.gmra.mxu1 %v527_v12  ;;  %v53_v12 = vld [vmem:[#allocation2 + $0x28] sm:$0xff] }
  0x2f   :  { %486 = vmatprep.mubr.bf16.mxu0 %v528_v13  ;;  %494 = vmatprep.mubr.bf16.mxu1 %v529_v14  ;;  %v61_v14 = vld [vmem:[#allocation2 + $0x68] sm:$0xff] }
  0x36   :  { %487 = vmatmul.mubr.bf16.gmra.mxu0 %v530_v15  ;;  %495 = vmatmul.mubr.bf16.gmra.mxu1 %v531_v16 }
  0xee   :  { %v484_v19 = vpop.f32.mrf.mxu0  ;;  %v492_v20 = vpop.f32.mrf.mxu1 }
  0xef   :  { %v291_v23 = vadd.f32 %v484_v19, %v50_v17  ;;  %v299_v24 = vadd.f32 %v492_v20, %v58_v18 }
  0xf0   :  { %v226_v25 = vpop.f32.mrf.mxu0  ;;  %v258_v26 = vpop.f32.mrf.mxu1 }
  0xf1   :  { %308 = vst.msk [vmem:[#allocation2 + $0x10] sm:$0xff] %vm31_vm0, %v291_v23  ;;  %316 = vst.msk [vmem:[#allocation2 + $0x50] sm:$0xff] %vm31_vm0, %v299_v24  ;;  %v289_v29 = vadd.f32 %v226_v25, %v48_v21  ;;  %v297_v30 = vadd.f32 %v258_v26, %v56_v22 }
  0xf2   :  { %v485_v31 = vpop.f32.mrf.mxu0  ;;  %v493_v32 = vpop.f32.mrf.mxu1 }
  0xf3   :  { %306 = vst.msk [vmem:[#allocation2] sm:$0xff] %vm31_vm0, %v289_v29  ;;  %314 = vst.msk [vmem:[#allocation2 + $0x40] sm:$0xff] %vm31_vm0, %v297_v30  ;;  %v292_v35 = vadd.f32 %v485_v31, %v51_v27  ;;  %v300_v36 = vadd.f32 %v493_v32, %v59_v28 }
  0xf4   :  { %v229_v37 = vpop.f32.mrf.mxu0  ;;  %v261_v38 = vpop.f32.mrf.mxu1 }
  0xf5   :  { %309 = vst.msk [vmem:[#allocation2 + $0x18] sm:$0xff] %vm31_vm0, %v292_v35  ;;  %317 = vst.msk [vmem:[#allocation2 + $0x58] sm:$0xff] %vm31_vm0, %v300_v36  ;;  %v290_v41 = vadd.f32 %v229_v37, %v49_v33  ;;  %v298_v42 = vadd.f32 %v261_v38, %v57_v34 }
  0xf6   :  { %v488_v44 = vpop.f32.mrf.mxu0  ;;  %v496_v45 = vpop.f32.mrf.mxu1 }
  0xf7   :  { %307 = vst.msk [vmem:[#allocation2 + $0x8] sm:$0xff] %vm31_vm0, %v290_v41  ;;  %315 = vst.msk [vmem:[#allocation2 + $0x48] sm:$0xff] %vm31_vm0, %v298_v42  ;;  %v295_v48 = vadd.f32 %v488_v44, %v54_v39  ;;  %v303_v49 = vadd.f32 %v496_v45, %v62_v40 }
  0xf8   :  { %v327_v50 = vld [vmem:[#allocation2 + $0x10] sm:$0xff]  ;;  %v242_v52 = vpop.f32.mrf.mxu0  ;;  %v274_v53 = vpop.f32.mrf.mxu1 }
  0xf9   :  { %v335_v51 = vld [vmem:[#allocation2 + $0x50] sm:$0xff]  ;;  %v350_v54 = vadd.f32 %v649_v43, %v327_v50  ;;  %312 = vst.msk [vmem:[#allocation2 + $0x30] sm:$0xff] %vm31_vm0, %v295_v48  ;;  %320 = vst.msk [vmem:[#allocation2 + $0x70] sm:$0xff] %vm31_vm0, %v303_v49  ;;  %v293_v56 = vadd.f32 %v242_v52, %v52_v46  ;;  %v301_v57 = vadd.f32 %v274_v53, %v60_v47 }
  0xfa   :  { %v358_v55 = vadd.f32 %v649_v43, %v335_v51  ;;  %v325_v60 = vld [vmem:[#allocation2] sm:$0xff]  ;;  %v489_v62 = vpop.f32.mrf.mxu0  ;;  %v497_v63 = vpop.f32.mrf.mxu1 }
  0xfb   :  { %v333_v61 = vld [vmem:[#allocation2 + $0x40] sm:$0xff]  ;;  %vm366_vm1 = vcmp.ge.f32.partialorder %v350_v54, 0.0  ;;  %v382_v0 = vmul.f32 0.2, %v350_v54  ;;  %310 = vst.msk [vmem:[#allocation2 + $0x20] sm:$0xff] %vm31_vm0, %v293_v56  ;;  %318 = vst.msk [vmem:[#allocation2 + $0x60] sm:$0xff] %vm31_vm0, %v301_v57  ;;  %v348_v2 = vadd.f32 %v649_v43, %v325_v60  ;;  %v296_v6 = vadd.f32 %v489_v62, %v55_v58 }
  0xfc   :  { %vm374_vm2 = vcmp.ge.f32.partialorder %v358_v55, 0.0  ;;  %v390_v1 = vmul.f32 0.2, %v358_v55  ;;  %v356_v3 = vadd.f32 %v649_v43, %v333_v61  ;;  %v328_v4 = vld [vmem:[#allocation2 + $0x18] sm:$0xff]  ;;  %v304_v7 = vadd.f32 %v497_v63, %v63_v59  ;;  %v245_v13 = vpop.f32.mrf.mxu0  ;;  %v277_v15 = vpop.f32.mrf.mxu1 }
  0xfd   :  { %v336_v5 = vld [vmem:[#allocation2 + $0x58] sm:$0xff]  ;;  %v398_v8 = vsel %vm366_vm1, %v350_v54, %v382_v0  ;;  %v351_v10 = vadd.f32 %v649_v43, %v328_v4  ;;  %vm364_vm3 = vcmp.ge.f32.partialorder %v348_v2, 0.0  ;;  %v380_v16 = vmul.f32 0.2, %v348_v2  ;;  %313 = vst.msk [vmem:[#allocation2 + $0x38] sm:$0xff] %vm31_vm0, %v296_v6 }
  0xfe   :  { %v406_v9 = vsel %vm374_vm2, %v358_v55, %v390_v1  ;;  %v359_v11 = vadd.f32 %v649_v43, %v336_v5  ;;  %414 = vst.msk [vmem:[%s744_s3 + $0x10] sm:$0xff] %vm31_vm0, %v398_v8  ;;  %vm372_vm4 = vcmp.ge.f32.partialorder %v356_v3, 0.0  ;;  %v388_v17 = vmul.f32 0.2, %v356_v3  ;;  %321 = vst.msk [vmem:[#allocation2 + $0x78] sm:$0xff] %vm31_vm0, %v304_v7  ;;  %v326_v22 = vld [vmem:[#allocation2 + $0x8] sm:$0xff] }
  0xff   :  { %422 = vst.msk [vmem:[%s744_s3 + $0x50] sm:$0xff] %vm31_vm0, %v406_v9  ;;  %vm367_vm5 = vcmp.ge.f32.partialorder %v351_v10, 0.0  ;;  %v383_v18 = vmul.f32 0.2, %v351_v10  ;;  %v396_v20 = vsel %vm364_vm3, %v348_v2, %v380_v16  ;;  %v334_v23 = vld [vmem:[#allocation2 + $0x48] sm:$0xff]  ;;  %v294_v25 = vadd.f32 %v245_v13, %v53_v12 }
 0x100   :  { %vm375_vm6 = vcmp.ge.f32.partialorder %v359_v11, 0.0  ;;  %v391_v19 = vmul.f32 0.2, %v359_v11  ;;  %v404_v21 = vsel %vm372_vm4, %v356_v3, %v388_v17  ;;  %v331_v24 = vld [vmem:[#allocation2 + $0x30] sm:$0xff]  ;;  %v302_v26 = vadd.f32 %v277_v15, %v61_v14  ;;  %412 = vst.msk [vmem:[%s744_s3] sm:$0xff] %vm31_vm0, %v396_v20 }
 0x101   :  { %420 = vst.msk [vmem:[%s744_s3 + $0x40] sm:$0xff] %vm31_vm0, %v404_v21  ;;  %v399_v27 = vsel %vm367_vm5, %v351_v10, %v383_v18  ;;  %v349_v29 = vadd.f32 %v649_v43, %v326_v22  ;;  %v357_v30 = vadd.f32 %v649_v43, %v334_v23  ;;  %v339_v31 = vld [vmem:[#allocation2 + $0x70] sm:$0xff]  ;;  %v354_v32 = vadd.f32 %v649_v43, %v331_v24 }
 0x102   :  { %v407_v28 = vsel %vm375_vm6, %v359_v11, %v391_v19  ;;  %415 = vst.msk [vmem:[%s744_s3 + $0x18] sm:$0xff] %vm31_vm0, %v399_v27  ;;  %v362_v33 = vadd.f32 %v649_v43, %v339_v31  ;;  %v329_v34 = vld [vmem:[#allocation2 + $0x20] sm:$0xff]  ;;  %311 = vst.msk [vmem:[#allocation2 + $0x28] sm:$0xff] %vm31_vm0, %v294_v25 }
 0x103   :  { %423 = vst.msk [vmem:[%s744_s3 + $0x58] sm:$0xff] %vm31_vm0, %v407_v28  ;;  %v337_v35 = vld [vmem:[#allocation2 + $0x60] sm:$0xff]  ;;  %319 = vst.msk [vmem:[#allocation2 + $0x68] sm:$0xff] %vm31_vm0, %v302_v26  ;;  %vm365_vm7 = vcmp.ge.f32.partialorder %v349_v29, 0.0  ;;  %v381_v36 = vmul.f32 0.2, %v349_v29  ;;  %v352_v42 = vadd.f32 %v649_v43, %v329_v34 }
 0x104   :  { %vm373_vm8 = vcmp.ge.f32.partialorder %v357_v30, 0.0  ;;  %v389_v37 = vmul.f32 0.2, %v357_v30  ;;  %vm370_vm9 = vcmp.ge.f32.partialorder %v354_v32, 0.0  ;;  %v386_v38 = vmul.f32 0.2, %v354_v32 }
 0x105   :  { %vm378_vm10 = vcmp.ge.f32.partialorder %v362_v33, 0.0  ;;  %v394_v39 = vmul.f32 0.2, %v362_v33  ;;  %v397_v40 = vsel %vm365_vm7, %v349_v29, %v381_v36  ;;  %v360_v44 = vadd.f32 %v649_v43, %v337_v35  ;;  %v332_v45 = vld [vmem:[#allocation2 + $0x38] sm:$0xff] }
 0x106   :  { %v405_v41 = vsel %vm373_vm8, %v357_v30, %v389_v37  ;;  %v340_v46 = vld [vmem:[#allocation2 + $0x78] sm:$0xff]  ;;  %413 = vst.msk [vmem:[%s744_s3 + $0x8] sm:$0xff] %vm31_vm0, %v397_v40  ;;  %v402_v47 = vsel %vm370_vm9, %v354_v32, %v386_v38  ;;  %v355_v49 = vadd.f32 %v649_v43, %v332_v45  ;;  %vm368_vm11 = vcmp.ge.f32.partialorder %v352_v42, 0.0 }
 0x107   :  { %421 = vst.msk [vmem:[%s744_s3 + $0x48] sm:$0xff] %vm31_vm0, %v405_v41  ;;  %v410_v48 = vsel %vm378_vm10, %v362_v33, %v394_v39  ;;  %v363_v50 = vadd.f32 %v649_v43, %v340_v46  ;;  %418 = vst.msk [vmem:[%s744_s3 + $0x30] sm:$0xff] %vm31_vm0, %v402_v47  ;;  %v384_v51 = vmul.f32 0.2, %v352_v42  ;;  %vm376_vm12 = vcmp.ge.f32.partialorder %v360_v44, 0.0 }
 0x108   :  { %426 = vst.msk [vmem:[%s744_s3 + $0x70] sm:$0xff] %vm31_vm0, %v410_v48  ;;  %v392_v52 = vmul.f32 0.2, %v360_v44  ;;  %vm371_vm13 = vcmp.ge.f32.partialorder %v355_v49, 0.0  ;;  %v387_v53 = vmul.f32 0.2, %v355_v49 }
 0x109   :  { %vm379_vm14 = vcmp.ge.f32.partialorder %v363_v50, 0.0  ;;  %v395_v54 = vmul.f32 0.2, %v363_v50  ;;  %v400_v55 = vsel %vm368_vm11, %v352_v42, %v384_v51  ;;  %v330_v57 = vld [vmem:[#allocation2 + $0x28] sm:$0xff] }
 0x10a   :  { %v408_v56 = vsel %vm376_vm12, %v360_v44, %v392_v52  ;;  %v338_v58 = vld [vmem:[#allocation2 + $0x68] sm:$0xff]  ;;  %416 = vst.msk [vmem:[%s744_s3 + $0x20] sm:$0xff] %vm31_vm0, %v400_v55  ;;  %v403_v59 = vsel %vm371_vm13, %v355_v49, %v387_v53  ;;  %v353_v61 = vadd.f32 %v649_v43, %v330_v57 }
 0x10b   :  { %424 = vst.msk [vmem:[%s744_s3 + $0x60] sm:$0xff] %vm31_vm0, %v408_v56  ;;  %v411_v60 = vsel %vm379_vm14, %v363_v50, %v395_v54  ;;  %v361_v62 = vadd.f32 %v649_v43, %v338_v58  ;;  %419 = vst.msk [vmem:[%s744_s3 + $0x38] sm:$0xff] %vm31_vm0, %v403_v59 }
 0x10c   :  { %427 = vst.msk [vmem:[%s744_s3 + $0x78] sm:$0xff] %vm31_vm0, %v411_v60  ;;  %vm369_vm15 = vcmp.ge.f32.partialorder %v353_v61, 0.0  ;;  %v385_v63 = vmul.f32 0.2, %v353_v61 }
 0x10d   :  { %vm377_vm1 = vcmp.ge.f32.partialorder %v361_v62, 0.0  ;;  %v393_v0 = vmul.f32 0.2, %v361_v62 }
 0x10e   :  { %v401_v1 = vsel %vm369_vm15, %v353_v61, %v385_v63 }
 0x10f   :  { %v409_v2 = vsel %vm377_vm1, %v361_v62, %v393_v0  ;;  %417 = vst.msk [vmem:[%s744_s3 + $0x28] sm:$0xff] %vm31_vm0, %v401_v1 }
 0x110   :  { %425 = vst.msk [vmem:[%s744_s3 + $0x68] sm:$0xff] %vm31_vm0, %v409_v2 }
 0x111   :  { %432 = vsyncpa [#allocation4], 1 }

// kernel: critic_forward.6
= control target key start
LH: loop header
LB: loop body
LE: loop exit
PB: predicated region body
PF: predicated region fallthrough
CT: control target
= control target key end

     0   :  { %8 = vsyncpa [#allocation4], 0  ;;  %s1300_s0 = inlined_call_operand.vmem [shape: bf16[32,1024], index: 0, kind: input, shape index: {}]   ;;  %s1301_s1 = inlined_call_operand.hbm [shape: bf16[1024,128], index: 1, kind: input, shape index: {}]   ;;  %s1302_s2 = inlined_call_operand.hbm [shape: f32[1,128], index: 2, kind: input, shape index: {}]   ;;  %s1303_s3 = inlined_call_operand.vmem [shape: f32[32,128], index: 3, kind: output, shape index: {}]  }
   0x1   :  { %9 = vsyncpa [#allocation6], 0  ;;  %s1210_s12 = smov [#allocation3]  }
   0x2   :  { %s17_s13 = sshll.u32 %s1210_s12, 4  ;;  %s18_s13 = int_to_ptr.vmem [resolvable:$true] %s17_s13 }
   0x3   :  { %s1174_s14 = scalar_lea.vmem %s18_s13, 8192  ;;  %p1179_p1 = scmp.lt.s32.totalorder %s18_s13, %s18_s13 }
   0x4   :  { %p1175_p0 = scmp.ne.s32.totalorder %s18_s13, %s1174_s14  ;;  %p1180_p2 = scmp.lt.s32.totalorder %s1174_s14, %s1174_s14 }
   0x6   :  { %p1181_p3 = por %p1180_p2, %p1179_p1 }
   0x8   :  { %p1182_p4 = pnand %p1181_p3, %p1175_p0 }
   0xa   :  { %1185 = shalt.err (!%p1182_p4)
}
   0xb   :  { %s1211_s15 = smov 64   ;;  %s1212_s16 = smov 4  }
   0xc   :  { %23 = dma.hbm_to_vmem [thread:$0]  %s1301_s1, 8192, %s18_s13, [#allocation4], %s1211_s15, %s1211_s15, %s1212_s16  }
   0xd   :  { %s1213_s19 = smov [#allocation5]  }
   0xe   :  { %s30_s20 = sshll.u32 %s1213_s19, 4  ;;  %s31_s20 = int_to_ptr.vmem [resolvable:$true] %s30_s20 }
   0xf   :  { %s1194_s21 = scalar_lea.vmem %s31_s20, 16  ;;  %s1198_s22 = scalar_lea.vmem %s31_s20, 32 }
  0x10   :  { %p1195_p5 = scmp.ne.s32.totalorder %s31_s20, %s1194_s21  ;;  %p1199_p6 = scmp.lt.s32.totalorder %s31_s20, %s31_s20 }
  0x11   :  { %p1200_p7 = scmp.lt.s32.totalorder %s1198_s22, %s1194_s21 }
  0x13   :  { %p1201_p8 = por %p1200_p7, %p1199_p6 }
  0x15   :  { %p1202_p9 = pnand %p1201_p8, %p1195_p5 }
  0x17   :  { %1205 = shalt.err (!%p1202_p9)
}
  0x18   :  { %33 = dma.hbm_to_vmem [thread:$0]  %s1302_s2, 16, %s31_s20, [#allocation6]  }
  0x19   :  { %1206 = dma.done.wait [#allocation4], 8192  }
  0x1a   :  { %1207 = vsyncadd [#allocation4], 4294959104 }
  0x1b   :  { %1208 = dma.done.wait [#allocation6], 16  }
  0x1c   :  { %1209 = vsyncadd [#allocation6], 4294967280  ;;  %v1102_v0 = vld [vmem:[#allocation3 + $0x78] sm:$0xff]   ;;  %v1106_v4 = vld [vmem:[#allocation3 + $0x70] sm:$0xff]  }
  0x1d   :  { %v1103_v1 = vld [vmem:[#allocation3 + $0xf8] sm:$0xff]   ;;  %986 = vmatprep.subr.bf16.mxu0 %v1102_v0  ;;  %v1107_v5 = vld [vmem:[#allocation3 + $0xf0] sm:$0xff]   ;;  %v1110_v8 = vld [vmem:[#allocation3 + $0x68] sm:$0xff]  }
  0x1e   :  { %v1104_v2 = vld [vmem:[#allocation3 + $0x38] sm:$0xff]   ;;  %1014 = vmatprep.subr.bf16.mxu1 %v1103_v1  ;;  %v1108_v6 = vld [vmem:[#allocation3 + $0x30] sm:$0xff]   ;;  %v1111_v9 = vld [vmem:[#allocation3 + $0xe8] sm:$0xff]  }
  0x1f   :  { %v1105_v3 = vld [vmem:[#allocation3 + $0xb8] sm:$0xff]   ;;  %987 = vmatpush3.bf16.msra.mxu0 %v1104_v2  ;;  %v1109_v7 = vld [vmem:[#allocation3 + $0xb0] sm:$0xff]   ;;  %v1112_v10 = vld [vmem:[#allocation3 + $0x28] sm:$0xff]  }
  0x20   :  { %1015 = vmatpush3.bf16.msra.mxu1 %v1105_v3  ;;  %988 = vmatprep.subr.bf16.mxu0 %v1106_v4  ;;  %v1113_v11 = vld [vmem:[#allocation3 + $0xa8] sm:$0xff]   ;;  %v1114_v12 = vld [vmem:[#allocation3 + $0x60] sm:$0xff]   ;;  %v1118_v16 = vld [vmem:[#allocation3 + $0x58] sm:$0xff]  }
  0x21   :  { %1016 = vmatprep.subr.bf16.mxu1 %v1107_v5  ;;  %v1115_v13 = vld [vmem:[#allocation3 + $0xe0] sm:$0xff]   ;;  %v1119_v17 = vld [vmem:[#allocation3 + $0xd8] sm:$0xff]   ;;  %v1122_v20 = vld [vmem:[#allocation3 + $0x50] sm:$0xff]  }
  0x22   :  { %v1116_v14 = vld [vmem:[#allocation3 + $0x20] sm:$0xff]   ;;  %v1120_v18 = vld [vmem:[#allocation3 + $0x18] sm:$0xff]   ;;  %v1123_v21 = vld [vmem:[#allocation3 + $0xd0] sm:$0xff]  }
  0x23   :  { %989 = vmatpush3.bf16.msra.mxu0 %v1108_v6  ;;  %v1117_v15 = vld [vmem:[#allocation3 + $0xa0] sm:$0xff]   ;;  %v1121_v19 = vld [vmem:[#allocation3 + $0x98] sm:$0xff]   ;;  %v1124_v22 = vld [vmem:[#allocation3 + $0x10] sm:$0xff]  }
  0x24   :  { %1017 = vmatpush3.bf16.msra.mxu1 %v1109_v7  ;;  %990 = vmatprep.subr.bf16.mxu0 %v1110_v8  ;;  %v1125_v23 = vld [vmem:[#allocation3 + $0x90] sm:$0xff]   ;;  %v1126_v24 = vld [vmem:[#allocation3 + $0x48] sm:$0xff]   ;;  %v1130_v28 = vld [vmem:[#allocation3 + $0x40] sm:$0xff]  }
  0x25   :  { %1018 = vmatprep.subr.bf16.mxu1 %v1111_v9  ;;  %v1127_v25 = vld [vmem:[#allocation3 + $0xc8] sm:$0xff]   ;;  %v1131_v29 = vld [vmem:[#allocation3 + $0xc0] sm:$0xff]   ;;  %v1134_v40 = vld [vmem:[#allocation3 + $0x178] sm:$0xff]  }
  0x26   :  { %v1128_v26 = vld [vmem:[#allocation3 + $0x8] sm:$0xff]   ;;  %v1132_v30 = vld [vmem:[#allocation3] sm:$0xff]   ;;  %v1135_v41 = vld [vmem:[#allocation3 + $0x1f8] sm:$0xff]  }
  0x27   :  { %991 = vmatpush3.bf16.msra.mxu0 %v1112_v10  ;;  %v1129_v27 = vld [vmem:[#allocation3 + $0x88] sm:$0xff]   ;;  %v1133_v31 = vld [vmem:[#allocation3 + $0x80] sm:$0xff]   ;;  %v1136_v42 = vld [vmem:[#allocation3 + $0x138] sm:$0xff]  }
  0x28   :  { %1019 = vmatpush3.bf16.msra.mxu1 %v1113_v11  ;;  %992 = vmatprep.subr.bf16.mxu0 %v1114_v12  ;;  %v53_v32 = vld [vmem:[%s1300_s0] sm:$0xff]  ;;  %v54_v34 = vld [vmem:[%s1300_s0 + $0x8] sm:$0xff]  ;;  %v1137_v43 = vld [vmem:[#allocation3 + $0x1b8] sm:$0xff]  }
  0x29   :  { %1020 = vmatprep.subr.bf16.mxu1 %v1115_v13  ;;  %v57_v33 = vld [vmem:[%s1300_s0 + $0x20] sm:$0xff]  ;;  %v58_v37 = vld [vmem:[%s1300_s0 + $0x28] sm:$0xff]  ;;  %v1138_v44 = vld [vmem:[#allocation3 + $0x170] sm:$0xff]  }
  0x2a   :  { %v905_v35 = vcombine.low %v53_v32, %v57_v33  ;;  %v906_v36 = vcombine.high %v53_v32, %v57_v33  ;;  %v907_v38 = vcombine.low %v54_v34, %v58_v37  ;;  %v908_v39 = vcombine.high %v54_v34, %v58_v37  ;;  %v1139_v45 = vld [vmem:[#allocation3 + $0x1f0] sm:$0xff]   ;;  %v1142_v48 = vld [vmem:[#allocation3 + $0x168] sm:$0xff]   ;;  %v1146_v52 = vld [vmem:[#allocation3 + $0x160] sm:$0xff]  }
  0x2b   :  { %993 = vmatpush3.bf16.msra.mxu0 %v1116_v14  ;;  %v1140_v46 = vld [vmem:[#allocation3 + $0x130] sm:$0xff]   ;;  %v1143_v49 = vld [vmem:[#allocation3 + $0x1e8] sm:$0xff]   ;;  %v1147_v53 = vld [vmem:[#allocation3 + $0x1e0] sm:$0xff]  }
  0x2c   :  { %1021 = vmatpush3.bf16.msra.mxu1 %v1117_v15  ;;  %994 = vmatprep.subr.bf16.mxu0 %v1118_v16  ;;  %v1141_v47 = vld [vmem:[#allocation3 + $0x1b0] sm:$0xff]   ;;  %v1144_v50 = vld [vmem:[#allocation3 + $0x128] sm:$0xff]   ;;  %v1148_v54 = vld [vmem:[#allocation3 + $0x120] sm:$0xff]  }
  0x2d   :  { %1022 = vmatprep.subr.bf16.mxu1 %v1119_v17  ;;  %693 = vmatprep.mubr.bf16.mxu0 %v906_v36  ;;  %v1145_v51 = vld [vmem:[#allocation3 + $0x1a8] sm:$0xff]   ;;  %v1149_v55 = vld [vmem:[#allocation3 + $0x1a0] sm:$0xff]   ;;  %v1150_v56 = vld [vmem:[#allocation3 + $0x158] sm:$0xff]  }
  0x2e   :  { %742 = vmatprep.mubr.bf16.mxu1 %v908_v39  ;;  %v1151_v57 = vld [vmem:[#allocation3 + $0x1d8] sm:$0xff]   ;;  %v61_v58 = vld [vmem:[%s1300_s0 + $0x40] sm:$0xff]  ;;  %v62_v61 = vld [vmem:[%s1300_s0 + $0x48] sm:$0xff] }
  0x2f   :  { %995 = vmatpush3.bf16.msra.mxu0 %v1120_v18  ;;  %v65_v59 = vld [vmem:[%s1300_s0 + $0x60] sm:$0xff]  ;;  %v66_v62 = vld [vmem:[%s1300_s0 + $0x68] sm:$0xff]  ;;  %v1152_v1 = vld [vmem:[#allocation3 + $0x118] sm:$0xff]  }
  0x30   :  { %1023 = vmatpush3.bf16.msra.mxu1 %v1121_v19  ;;  %996 = vmatprep.subr.bf16.mxu0 %v1122_v20  ;;  %v914_v60 = vcombine.high %v61_v58, %v65_v59  ;;  %v913_v63 = vcombine.low %v61_v58, %v65_v59  ;;  %v916_v0 = vcombine.high %v62_v61, %v66_v62  ;;  %v1153_v3 = vld [vmem:[#allocation3 + $0x198] sm:$0xff]   ;;  %v1154_v4 = vld [vmem:[#allocation3 + $0x150] sm:$0xff]   ;;  %v1158_v8 = vld [vmem:[#allocation3 + $0x148] sm:$0xff]  }
  0x31   :  { %1024 = vmatprep.subr.bf16.mxu1 %v1123_v21  ;;  %v915_v2 = vcombine.low %v62_v61, %v66_v62  ;;  %v1155_v5 = vld [vmem:[#allocation3 + $0x1d0] sm:$0xff]   ;;  %v1159_v9 = vld [vmem:[#allocation3 + $0x1c8] sm:$0xff]   ;;  %v1162_v12 = vld [vmem:[#allocation3 + $0x140] sm:$0xff]  }
  0x32   :  { %v1156_v6 = vld [vmem:[#allocation3 + $0x110] sm:$0xff]   ;;  %v1160_v10 = vld [vmem:[#allocation3 + $0x108] sm:$0xff]   ;;  %v1163_v13 = vld [vmem:[#allocation3 + $0x1c0] sm:$0xff]  }
  0x33   :  { %997 = vmatpush3.bf16.msra.mxu0 %v1124_v22  ;;  %v1157_v7 = vld [vmem:[#allocation3 + $0x190] sm:$0xff]   ;;  %v1161_v11 = vld [vmem:[#allocation3 + $0x188] sm:$0xff]   ;;  %v1164_v14 = vld [vmem:[#allocation3 + $0x100] sm:$0xff]  }
  0x34   :  { %1025 = vmatpush3.bf16.msra.mxu1 %v1125_v23  ;;  %998 = vmatprep.subr.bf16.mxu0 %v1126_v24  ;;  %v1165_v15 = vld [vmem:[#allocation3 + $0x180] sm:$0xff]   ;;  %v55_v16 = vld [vmem:[%s1300_s0 + $0x10] sm:$0xff]  ;;  %v56_v18 = vld [vmem:[%s1300_s0 + $0x18] sm:$0xff] }
  0x35   :  { %1026 = vmatprep.subr.bf16.mxu1 %v1127_v25  ;;  %v59_v17 = vld [vmem:[%s1300_s0 + $0x30] sm:$0xff]  ;;  %v60_v19 = vld [vmem:[%s1300_s0 + $0x38] sm:$0xff] }
  0x36   :  { %v909_v20 = vcombine.low %v55_v16, %v59_v17  ;;  %v910_v21 = vcombine.high %v55_v16, %v59_v17  ;;  %v911_v22 = vcombine.low %v56_v18, %v60_v19  ;;  %v912_v23 = vcombine.high %v56_v18, %v60_v19  ;;  %v63_v24 = vld [vmem:[%s1300_s0 + $0x50] sm:$0xff] }
  0x37   :  { %999 = vmatpush3.bf16.msra.mxu0 %v1128_v26  ;;  %v67_v25 = vld [vmem:[%s1300_s0 + $0x70] sm:$0xff]  ;;  %v64_v26 = vld [vmem:[%s1300_s0 + $0x58] sm:$0xff] }
  0x38   :  { %1027 = vmatpush3.bf16.msra.mxu1 %v1129_v27  ;;  %1000 = vmatprep.subr.bf16.mxu0 %v1130_v28  ;;  %v918_v27 = vcombine.high %v63_v24, %v67_v25  ;;  %v68_v28 = vld [vmem:[%s1300_s0 + $0x78] sm:$0xff] }
  0x39   :  { %1028 = vmatprep.subr.bf16.mxu1 %v1131_v29  ;;  %v920_v29 = vcombine.high %v64_v26, %v68_v28 }
  0x3b   :  { %1001 = vmatpush3.bf16.msra.mxu0 %v1132_v30  ;;  %v917_v30 = vcombine.low %v63_v24, %v67_v25 }
  0x3c   :  { %1029 = vmatpush3.bf16.msra.mxu1 %v1133_v31  ;;  %1042 = vmatprep.subr.bf16.mxu0 %v1134_v40  ;;  %v919_v31 = vcombine.low %v64_v26, %v68_v28 }
  0x3d   :  { %1070 = vmatprep.subr.bf16.mxu1 %v1135_v41 }
  0x3e   :  { %694 = vmatmul.mubr.bf16.vlgmr.msra.gmra.mxu0 %v905_v35 }
  0x3f   :  { %743 = vmatmul.mubr.bf16.vlgmr.msra.gmra.mxu1 %v907_v38  ;;  %1043 = vmatpush3.bf16.msra.mxu0 %v1136_v42 }
  0x40   :  { %1071 = vmatpush3.bf16.msra.mxu1 %v1137_v43  ;;  %1044 = vmatprep.subr.bf16.mxu0 %v1138_v44 }
  0x41   :  { %1072 = vmatprep.subr.bf16.mxu1 %v1139_v45  ;;  %701 = vmatprep.mubr.bf16.mxu0 %v914_v60 }
  0x42   :  { %750 = vmatprep.mubr.bf16.mxu1 %v916_v0  ;;  %v985_v0 = vld [vmem:[#allocation5] ss:$0 sm:$0xff] }
  0x43   :  { %1045 = vmatpush3.bf16.msra.mxu0 %v1140_v46 }
  0x44   :  { %1073 = vmatpush3.bf16.msra.mxu1 %v1141_v47  ;;  %1046 = vmatprep.subr.bf16.mxu0 %v1142_v48 }
  0x45   :  { %1074 = vmatprep.subr.bf16.mxu1 %v1143_v49 }
  0x46   :  { %702 = vmatmul.mubr.bf16.gmra.mxu0 %v913_v63 }
  0x47   :  { %1047 = vmatpush3.bf16.msra.mxu0 %v1144_v50  ;;  %751 = vmatmul.mubr.bf16.gmra.mxu1 %v915_v2 }
  0x48   :  { %1075 = vmatpush3.bf16.msra.mxu1 %v1145_v51  ;;  %1048 = vmatprep.subr.bf16.mxu0 %v1146_v52 }
  0x49   :  { %1076 = vmatprep.subr.bf16.mxu1 %v1147_v53  ;;  %791 = vmatprep.mubr.bf16.mxu0 %v910_v21 }
  0x4a   :  { %840 = vmatprep.mubr.bf16.mxu1 %v912_v23 }
  0x4b   :  { %1049 = vmatpush3.bf16.msra.mxu0 %v1148_v54 }
  0x4c   :  { %1077 = vmatpush3.bf16.msra.mxu1 %v1149_v55  ;;  %1050 = vmatprep.subr.bf16.mxu0 %v1150_v56 }
  0x4d   :  { %1078 = vmatprep.subr.bf16.mxu1 %v1151_v57 }
  0x4f   :  { %1051 = vmatpush3.bf16.msra.mxu0 %v1152_v1 }
  0x50   :  { %1079 = vmatpush3.bf16.msra.mxu1 %v1153_v3  ;;  %1052 = vmatprep.subr.bf16.mxu0 %v1154_v4 }
  0x51   :  { %1080 = vmatprep.subr.bf16.mxu1 %v1155_v5 }
  0x53   :  { %1053 = vmatpush3.bf16.msra.mxu0 %v1156_v6 }
  0x54   :  { %1081 = vmatpush3.bf16.msra.mxu1 %v1157_v7  ;;  %1054 = vmatprep.subr.bf16.mxu0 %v1158_v8 }
  0x55   :  { %1082 = vmatprep.subr.bf16.mxu1 %v1159_v9 }
  0x57   :  { %1055 = vmatpush3.bf16.msra.mxu0 %v1160_v10 }
  0x58   :  { %1083 = vmatpush3.bf16.msra.mxu1 %v1161_v11  ;;  %1056 = vmatprep.subr.bf16.mxu0 %v1162_v12 }
  0x59   :  { %1084 = vmatprep.subr.bf16.mxu1 %v1163_v13 }
  0x5b   :  { %1057 = vmatpush3.bf16.msra.mxu0 %v1164_v14 }
  0x5c   :  { %1085 = vmatpush3.bf16.msra.mxu1 %v1165_v15 }
  0x5e   :  { %792 = vmatmul.mubr.bf16.vlgmr.msra.gmra.mxu0 %v909_v20 }
  0x5f   :  { %841 = vmatmul.mubr.bf16.vlgmr.msra.gmra.mxu1 %v911_v22  ;;  %799 = vmatprep.mubr.bf16.mxu0 %v918_v27 }
  0x60   :  { %848 = vmatprep.mubr.bf16.mxu1 %v920_v29 }
  0x66   :  { %800 = vmatmul.mubr.bf16.gmra.mxu0 %v917_v30 }
  0x67   :  { %849 = vmatmul.mubr.bf16.gmra.mxu1 %v919_v31 }
  0xfe   :  { %v1002_v32 = vpop.f32.mrf.mxu0 }
  0xff   :  { %v1030_v33 = vpop.f32.mrf.mxu1 }
 0x100   :  { %v1003_v34 = vpop.f32.mrf.mxu0 }
 0x101   :  { %v1031_v35 = vpop.f32.mrf.mxu1  ;;  %v1004_v48 = vadd.f32 %v1003_v34, %v1002_v32 }
 0x102   :  { %v1005_v36 = vpop.f32.mrf.mxu0  ;;  %v1032_v49 = vadd.f32 %v1031_v35, %v1030_v33 }
 0x103   :  { %v1033_v37 = vpop.f32.mrf.mxu1 }
 0x104   :  { %v1006_v38 = vpop.f32.mrf.mxu0  ;;  %v745_v54 = vadd.f32 %v1032_v49, %v1004_v48 }
 0x105   :  { %v1034_v39 = vpop.f32.mrf.mxu1  ;;  %v1007_v55 = vadd.f32 %v1006_v38, %v1005_v36 }
 0x106   :  { %v1008_v40 = vpop.f32.mrf.mxu0  ;;  %v1035_v56 = vadd.f32 %v1034_v39, %v1033_v37 }
 0x107   :  { %v1036_v41 = vpop.f32.mrf.mxu1 }
 0x108   :  { %v1009_v42 = vpop.f32.mrf.mxu0  ;;  %v748_v3 = vadd.f32 %v1035_v56, %v1007_v55 }
 0x109   :  { %v1037_v43 = vpop.f32.mrf.mxu1  ;;  %v1010_v62 = vadd.f32 %v1009_v42, %v1008_v40 }
 0x10a   :  { %v1011_v44 = vpop.f32.mrf.mxu0  ;;  %v1038_v63 = vadd.f32 %v1037_v43, %v1036_v41 }
 0x10b   :  { %v1039_v45 = vpop.f32.mrf.mxu1 }
 0x10c   :  { %v1012_v46 = vpop.f32.mrf.mxu0  ;;  %v753_v11 = vadd.f32 %v1038_v63, %v1010_v62 }
 0x10d   :  { %v1040_v47 = vpop.f32.mrf.mxu1  ;;  %v1013_v12 = vadd.f32 %v1012_v46, %v1011_v44 }
 0x10e   :  { %v1041_v13 = vadd.f32 %v1040_v47, %v1039_v45 }
 0x110   :  { %v756_v25 = vadd.f32 %v1041_v13, %v1013_v12 }
 0x11e   :  { %v1058_v50 = vpop.f32.mrf.mxu0 }
 0x11f   :  { %v1086_v51 = vpop.f32.mrf.mxu1 }
 0x120   :  { %v1059_v52 = vpop.f32.mrf.mxu0 }
 0x121   :  { %v1087_v53 = vpop.f32.mrf.mxu1  ;;  %v1060_v57 = vadd.f32 %v1059_v52, %v1058_v50 }
 0x122   :  { %v1061_v58 = vpop.f32.mrf.mxu0  ;;  %v1088_v61 = vadd.f32 %v1087_v53, %v1086_v51 }
 0x123   :  { %v1089_v59 = vpop.f32.mrf.mxu1  ;;  %v794_v60 = vadd.f32 %v1060_v57, %v745_v54 }
 0x124   :  { %v1062_v1 = vpop.f32.mrf.mxu0 }
 0x125   :  { %v1090_v2 = vpop.f32.mrf.mxu1  ;;  %v843_v4 = vadd.f32 %v1088_v61, %v794_v60  ;;  %v1063_v5 = vadd.f32 %v1062_v1, %v1061_v58 }
 0x126   :  { %v1064_v6 = vpop.f32.mrf.mxu0  ;;  %v1091_v10 = vadd.f32 %v1090_v2, %v1089_v59 }
 0x127   :  { %v1092_v7 = vpop.f32.mrf.mxu1  ;;  %v879_v8 = vadd.f32 %v985_v0, %v843_v4  ;;  %v797_v9 = vadd.f32 %v1063_v5, %v748_v3 }
 0x128   :  { %v1065_v14 = vpop.f32.mrf.mxu0 }
 0x129   :  { %v1093_v15 = vpop.f32.mrf.mxu1  ;;  %vm883_vm0 = vcmp.ge.f32.partialorder %v879_v8, 0.0  ;;  %v887_v16 = vmul.f32 0.2, %v879_v8  ;;  %v846_v17 = vadd.f32 %v1091_v10, %v797_v9  ;;  %v1066_v18 = vadd.f32 %v1065_v14, %v1064_v6 }
 0x12a   :  { %v1067_v19 = vpop.f32.mrf.mxu0  ;;  %v1094_v24 = vadd.f32 %v1093_v15, %v1092_v7 }
 0x12b   :  { %v1095_v20 = vpop.f32.mrf.mxu1  ;;  %v891_v21 = vsel %vm883_vm0, %v879_v8, %v887_v16  ;;  %v880_v22 = vadd.f32 %v985_v0, %v846_v17  ;;  %v802_v23 = vadd.f32 %v1066_v18, %v753_v11 }
 0x12c   :  { %895 = vst [vmem:[%s1303_s3] sm:$0xff] %v891_v21  ;;  %v1068_v26 = vpop.f32.mrf.mxu0 }
 0x12d   :  { %v1096_v27 = vpop.f32.mrf.mxu1  ;;  %vm884_vm1 = vcmp.ge.f32.partialorder %v880_v22, 0.0  ;;  %v888_v28 = vmul.f32 0.2, %v880_v22  ;;  %v851_v29 = vadd.f32 %v1094_v24, %v802_v23  ;;  %v1069_v30 = vadd.f32 %v1068_v26, %v1067_v19 }
 0x12e   :  { %v1097_v34 = vadd.f32 %v1096_v27, %v1095_v20 }
 0x12f   :  { %v892_v31 = vsel %vm884_vm1, %v880_v22, %v888_v28  ;;  %v881_v32 = vadd.f32 %v985_v0, %v851_v29  ;;  %v805_v33 = vadd.f32 %v1069_v30, %v756_v25 }
 0x130   :  { %896 = vst [vmem:[%s1303_s3 + $0x8] sm:$0xff] %v892_v31 }
 0x131   :  { %vm885_vm2 = vcmp.ge.f32.partialorder %v881_v32, 0.0  ;;  %v889_v35 = vmul.f32 0.2, %v881_v32  ;;  %v854_v36 = vadd.f32 %v1097_v34, %v805_v33 }
 0x133   :  { %v893_v37 = vsel %vm885_vm2, %v881_v32, %v889_v35  ;;  %v882_v38 = vadd.f32 %v985_v0, %v854_v36 }
 0x134   :  { %897 = vst [vmem:[%s1303_s3 + $0x10] sm:$0xff] %v893_v37 }
 0x135   :  { %vm886_vm3 = vcmp.ge.f32.partialorder %v882_v38, 0.0  ;;  %v890_v39 = vmul.f32 0.2, %v882_v38 }
 0x137   :  { %v894_v40 = vsel %vm886_vm3, %v882_v38, %v890_v39 }
 0x138   :  { %898 = vst [vmem:[%s1303_s3 + $0x18] sm:$0xff] %v894_v40 }
 0x139   :  { %903 = vsyncpa [#allocation4], 1 }
 0x13a   :  { %904 = vsyncpa [#allocation6], 1 }

// kernel: critic_forward.7
= control target key start
LH: loop header
LB: loop body
LE: loop exit
PB: predicated region body
PF: predicated region fallthrough
CT: control target
= control target key end

     0   :  { %s3514_s1 = inlined_call_operand.vmem [shape: bf16[2048,256], index: 1, kind: input, shape index: {}]   ;;  %s3515_s0 = inlined_call_operand.vmem [shape: bf16[8,2048], index: 0, kind: input, shape index: {}]   ;;  %s3516_s2 = inlined_call_operand.vmem [shape: f32[1,256], index: 2, kind: input, shape index: {}]   ;;  %s3517_s3 = inlined_call_operand.vmem [shape: f32[8,256], index: 3, kind: output, shape index: {}]  }
   0x1   :  { %v2257_v0 = vld [vmem:[%s3514_s1 + $0x74] ss:$8 sps:$4 sm:$0xff]   ;;  %v2261_v2 = vld [vmem:[%s3514_s1 + $0x70] ss:$8 sps:$4 sm:$0xff]   ;;  %v2263_v4 = vld [vmem:[%s3514_s1 + $0x64] ss:$8 sps:$4 sm:$0xff]  }
   0x2   :  { %v2259_v1 = vld [vmem:[%s3514_s1 + $0x174] ss:$8 sps:$4 sm:$0xff]   ;;  %1622 = vmatprep.subr.bf16.mxu0 %v2257_v0  ;;  %v2262_v3 = vld [vmem:[%s3514_s1 + $0x170] ss:$8 sps:$4 sm:$0xff]   ;;  %v2265_v5 = vld [vmem:[%s3514_s1 + $0x164] ss:$8 sps:$4 sm:$0xff]  }
   0x3   :  { %1663 = vmatprep.subr.bf16.mxu1 %v2259_v1  ;;  %1623 = vmatpush1.bf16.msra.mxu0 %v2261_v2  ;;  %v2267_v6 = vld [vmem:[%s3514_s1 + $0x60] ss:$8 sps:$4 sm:$0xff]   ;;  %v2269_v8 = vld [vmem:[%s3514_s1 + $0x54] ss:$8 sps:$4 sm:$0xff]   ;;  %v2273_v10 = vld [vmem:[%s3514_s1 + $0x50] ss:$8 sps:$4 sm:$0xff]  }
   0x4   :  { %1664 = vmatpush1.bf16.msra.mxu1 %v2262_v3  ;;  %1624 = vmatprep.subr.bf16.mxu0 %v2263_v4  ;;  %v2268_v7 = vld [vmem:[%s3514_s1 + $0x160] ss:$8 sps:$4 sm:$0xff]   ;;  %v2271_v9 = vld [vmem:[%s3514_s1 + $0x154] ss:$8 sps:$4 sm:$0xff]   ;;  %v2274_v11 = vld [vmem:[%s3514_s1 + $0x150] ss:$8 sps:$4 sm:$0xff]  }
   0x5   :  { %1665 = vmatprep.subr.bf16.mxu1 %v2265_v5  ;;  %v2275_v12 = vld [vmem:[%s3514_s1 + $0x44] ss:$8 sps:$4 sm:$0xff]   ;;  %v2279_v14 = vld [vmem:[%s3514_s1 + $0x40] ss:$8 sps:$4 sm:$0xff]   ;;  %v2281_v16 = vld [vmem:[%s3514_s1 + $0x34] ss:$8 sps:$4 sm:$0xff]  }
   0x6   :  { %v2277_v13 = vld [vmem:[%s3514_s1 + $0x144] ss:$8 sps:$4 sm:$0xff]   ;;  %v2280_v15 = vld [vmem:[%s3514_s1 + $0x140] ss:$8 sps:$4 sm:$0xff]   ;;  %v2283_v17 = vld [vmem:[%s3514_s1 + $0x134] ss:$8 sps:$4 sm:$0xff]  }
   0x7   :  { %1625 = vmatpush1.bf16.msra.mxu0 %v2267_v6  ;;  %v2285_v18 = vld [vmem:[%s3514_s1 + $0x30] ss:$8 sps:$4 sm:$0xff]   ;;  %v2287_v20 = vld [vmem:[%s3514_s1 + $0x24] ss:$8 sps:$4 sm:$0xff]   ;;  %v2291_v22 = vld [vmem:[%s3514_s1 + $0x20] ss:$8 sps:$4 sm:$0xff]  }
   0x8   :  { %1666 = vmatpush1.bf16.msra.mxu1 %v2268_v7  ;;  %1626 = vmatprep.subr.bf16.mxu0 %v2269_v8  ;;  %v2286_v19 = vld [vmem:[%s3514_s1 + $0x130] ss:$8 sps:$4 sm:$0xff]   ;;  %v2289_v21 = vld [vmem:[%s3514_s1 + $0x124] ss:$8 sps:$4 sm:$0xff]   ;;  %v2292_v23 = vld [vmem:[%s3514_s1 + $0x120] ss:$8 sps:$4 sm:$0xff]  }
   0x9   :  { %1667 = vmatprep.subr.bf16.mxu1 %v2271_v9  ;;  %v2293_v24 = vld [vmem:[%s3514_s1 + $0x14] ss:$8 sps:$4 sm:$0xff]   ;;  %v2297_v26 = vld [vmem:[%s3514_s1 + $0x10] ss:$8 sps:$4 sm:$0xff]   ;;  %v2299_v28 = vld [vmem:[%s3514_s1 + $0x4] ss:$8 sps:$4 sm:$0xff]  }
   0xa   :  { %v2295_v25 = vld [vmem:[%s3514_s1 + $0x114] ss:$8 sps:$4 sm:$0xff]   ;;  %v2298_v27 = vld [vmem:[%s3514_s1 + $0x110] ss:$8 sps:$4 sm:$0xff]   ;;  %v2301_v29 = vld [vmem:[%s3514_s1 + $0x104] ss:$8 sps:$4 sm:$0xff]  }
   0xb   :  { %1627 = vmatpush1.bf16.msra.mxu0 %v2273_v10  ;;  %v2303_v30 = vld [vmem:[%s3514_s1] ss:$8 sps:$4 sm:$0xff]   ;;  %v2305_v32 = vld [vmem:[%s3514_s1 + $0xf4] ss:$8 sps:$4 sm:$0xff]   ;;  %v2309_v34 = vld [vmem:[%s3514_s1 + $0xf0] ss:$8 sps:$4 sm:$0xff]  }
   0xc   :  { %1668 = vmatpush1.bf16.msra.mxu1 %v2274_v11  ;;  %1628 = vmatprep.subr.bf16.mxu0 %v2275_v12  ;;  %v2304_v31 = vld [vmem:[%s3514_s1 + $0x100] ss:$8 sps:$4 sm:$0xff]   ;;  %v2307_v33 = vld [vmem:[%s3514_s1 + $0x1f4] ss:$8 sps:$4 sm:$0xff]   ;;  %v2310_v35 = vld [vmem:[%s3514_s1 + $0x1f0] ss:$8 sps:$4 sm:$0xff]  }
   0xd   :  { %1669 = vmatprep.subr.bf16.mxu1 %v2277_v13  ;;  %v2311_v36 = vld [vmem:[%s3514_s1 + $0xe4] ss:$8 sps:$4 sm:$0xff]   ;;  %v2315_v38 = vld [vmem:[%s3514_s1 + $0xe0] ss:$8 sps:$4 sm:$0xff]   ;;  %v2317_v40 = vld [vmem:[%s3514_s1 + $0xd4] ss:$8 sps:$4 sm:$0xff]  }
   0xe   :  { %v2313_v37 = vld [vmem:[%s3514_s1 + $0x1e4] ss:$8 sps:$4 sm:$0xff]   ;;  %v2316_v39 = vld [vmem:[%s3514_s1 + $0x1e0] ss:$8 sps:$4 sm:$0xff]   ;;  %v2319_v41 = vld [vmem:[%s3514_s1 + $0x1d4] ss:$8 sps:$4 sm:$0xff]  }
   0xf   :  { %1629 = vmatpush1.bf16.msra.mxu0 %v2279_v14  ;;  %v2321_v42 = vld [vmem:[%s3514_s1 + $0xd0] ss:$8 sps:$4 sm:$0xff]   ;;  %v2323_v44 = vld [vmem:[%s3514_s1 + $0xc4] ss:$8 sps:$4 sm:$0xff]   ;;  %v2327_v49 = vld [vmem:[%s3514_s1 + $0xc0] ss:$8 sps:$4 sm:$0xff]  }
  0x10   :  { %1670 = vmatpush1.bf16.msra.mxu1 %v2280_v15  ;;  %1630 = vmatprep.subr.bf16.mxu0 %v2281_v16  ;;  %v2322_v43 = vld [vmem:[%s3514_s1 + $0x1d0] ss:$8 sps:$4 sm:$0xff]   ;;  %v2325_v45 = vld [vmem:[%s3514_s1 + $0x1c4] ss:$8 sps:$4 sm:$0xff]   ;;  %v2328_v50 = vld [vmem:[%s3514_s1 + $0x1c0] ss:$8 sps:$4 sm:$0xff]  }
  0x11   :  { %1671 = vmatprep.subr.bf16.mxu1 %v2283_v17  ;;  %v22_v46 = vld [vmem:[%s3515_s0] sm:$0xff]  ;;  %v23_v48 = vld [vmem:[%s3515_s0 + $0x8] sm:$0xff]  ;;  %v2329_v52 = vld [vmem:[%s3514_s1 + $0xb4] ss:$8 sps:$4 sm:$0xff]  }
  0x12   :  { %v1986_v47 = vcombine.high %v22_v46, %v22_v46  ;;  %v1988_v51 = vcombine.high %v23_v48, %v23_v48  ;;  %v2331_v53 = vld [vmem:[%s3514_s1 + $0x1b4] ss:$8 sps:$4 sm:$0xff]   ;;  %v2333_v54 = vld [vmem:[%s3514_s1 + $0xb0] ss:$8 sps:$4 sm:$0xff]   ;;  %v2335_v56 = vld [vmem:[%s3514_s1 + $0xa4] ss:$8 sps:$4 sm:$0xff]   ;;  %v1985_v6 = vcombine.low %v22_v46, %v22_v46  ;;  %v1987_v7 = vcombine.low %v23_v48, %v23_v48 }
  0x13   :  { %1631 = vmatpush1.bf16.msra.mxu0 %v2285_v18  ;;  %v2334_v55 = vld [vmem:[%s3514_s1 + $0x1b0] ss:$8 sps:$4 sm:$0xff]   ;;  %v2337_v57 = vld [vmem:[%s3514_s1 + $0x1a4] ss:$8 sps:$4 sm:$0xff]   ;;  %v2339_v58 = vld [vmem:[%s3514_s1 + $0xa0] ss:$8 sps:$4 sm:$0xff]  }
  0x14   :  { %1672 = vmatpush1.bf16.msra.mxu1 %v2286_v19  ;;  %1632 = vmatprep.subr.bf16.mxu0 %v2287_v20  ;;  %v2340_v59 = vld [vmem:[%s3514_s1 + $0x1a0] ss:$8 sps:$4 sm:$0xff]   ;;  %v2341_v60 = vld [vmem:[%s3514_s1 + $0x94] ss:$8 sps:$4 sm:$0xff]   ;;  %v2345_v62 = vld [vmem:[%s3514_s1 + $0x90] ss:$8 sps:$4 sm:$0xff]  }
  0x15   :  { %1673 = vmatprep.subr.bf16.mxu1 %v2289_v21  ;;  %1654 = vmatprep.mubr.bf16.mxu0 %v1986_v47  ;;  %v2343_v61 = vld [vmem:[%s3514_s1 + $0x194] ss:$8 sps:$4 sm:$0xff]   ;;  %v2346_v63 = vld [vmem:[%s3514_s1 + $0x190] ss:$8 sps:$4 sm:$0xff]   ;;  %v2347_v0 = vld [vmem:[%s3514_s1 + $0x84] ss:$8 sps:$4 sm:$0xff]  }
  0x16   :  { %1695 = vmatprep.mubr.bf16.mxu1 %v1988_v51  ;;  %v2349_v1 = vld [vmem:[%s3514_s1 + $0x184] ss:$8 sps:$4 sm:$0xff]   ;;  %v2351_v2 = vld [vmem:[%s3514_s1 + $0x80] ss:$8 sps:$4 sm:$0xff]   ;;  %v2359_v4 = vld [vmem:[%s3514_s1 + $0x274] ss:$8 sps:$4 sm:$0xff]  }
  0x17   :  { %1633 = vmatpush1.bf16.msra.mxu0 %v2291_v22  ;;  %v2352_v3 = vld [vmem:[%s3514_s1 + $0x180] ss:$8 sps:$4 sm:$0xff]   ;;  %v2362_v5 = vld [vmem:[%s3514_s1 + $0x374] ss:$8 sps:$4 sm:$0xff]   ;;  %v2357_v8 = vld [vmem:[%s3514_s1 + $0x270] ss:$8 sps:$4 sm:$0xff]  }
  0x18   :  { %1674 = vmatpush1.bf16.msra.mxu1 %v2292_v23  ;;  %1634 = vmatprep.subr.bf16.mxu0 %v2293_v24  ;;  %v2360_v9 = vld [vmem:[%s3514_s1 + $0x370] ss:$8 sps:$4 sm:$0xff]   ;;  %v2365_v10 = vld [vmem:[%s3514_s1 + $0x264] ss:$8 sps:$4 sm:$0xff]   ;;  %v2363_v12 = vld [vmem:[%s3514_s1 + $0x260] ss:$8 sps:$4 sm:$0xff]  }
  0x19   :  { %1675 = vmatprep.subr.bf16.mxu1 %v2295_v25  ;;  %v2368_v11 = vld [vmem:[%s3514_s1 + $0x364] ss:$8 sps:$4 sm:$0xff]   ;;  %v2366_v13 = vld [vmem:[%s3514_s1 + $0x360] ss:$8 sps:$4 sm:$0xff]   ;;  %v2371_v14 = vld [vmem:[%s3514_s1 + $0x254] ss:$8 sps:$4 sm:$0xff]  }
  0x1a   :  { %v2374_v15 = vld [vmem:[%s3514_s1 + $0x354] ss:$8 sps:$4 sm:$0xff]   ;;  %v2369_v16 = vld [vmem:[%s3514_s1 + $0x250] ss:$8 sps:$4 sm:$0xff]   ;;  %v2377_v18 = vld [vmem:[%s3514_s1 + $0x244] ss:$8 sps:$4 sm:$0xff]  }
  0x1b   :  { %1635 = vmatpush1.bf16.msra.mxu0 %v2297_v26  ;;  %v2372_v17 = vld [vmem:[%s3514_s1 + $0x350] ss:$8 sps:$4 sm:$0xff]   ;;  %v2380_v19 = vld [vmem:[%s3514_s1 + $0x344] ss:$8 sps:$4 sm:$0xff]   ;;  %v2375_v20 = vld [vmem:[%s3514_s1 + $0x240] ss:$8 sps:$4 sm:$0xff]  }
  0x1c   :  { %1676 = vmatpush1.bf16.msra.mxu1 %v2298_v27  ;;  %1636 = vmatprep.subr.bf16.mxu0 %v2299_v28  ;;  %v2378_v21 = vld [vmem:[%s3514_s1 + $0x340] ss:$8 sps:$4 sm:$0xff]   ;;  %v2383_v22 = vld [vmem:[%s3514_s1 + $0x234] ss:$8 sps:$4 sm:$0xff]   ;;  %v2381_v24 = vld [vmem:[%s3514_s1 + $0x230] ss:$8 sps:$4 sm:$0xff]  }
  0x1d   :  { %1677 = vmatprep.subr.bf16.mxu1 %v2301_v29  ;;  %v2386_v23 = vld [vmem:[%s3514_s1 + $0x334] ss:$8 sps:$4 sm:$0xff]   ;;  %v2384_v25 = vld [vmem:[%s3514_s1 + $0x330] ss:$8 sps:$4 sm:$0xff]   ;;  %v2389_v26 = vld [vmem:[%s3514_s1 + $0x224] ss:$8 sps:$4 sm:$0xff]  }
  0x1e   :  { %v2392_v27 = vld [vmem:[%s3514_s1 + $0x324] ss:$8 sps:$4 sm:$0xff]   ;;  %v2387_v28 = vld [vmem:[%s3514_s1 + $0x220] ss:$8 sps:$4 sm:$0xff]   ;;  %v2422_v51 = vld [vmem:[%s3514_s1 + $0x3d4] ss:$8 sps:$4 sm:$0xff]  }
  0x1f   :  { %1637 = vmatpush1.bf16.msra.mxu0 %v2303_v30  ;;  %v2390_v29 = vld [vmem:[%s3514_s1 + $0x320] ss:$8 sps:$4 sm:$0xff]   ;;  %v2395_v30 = vld [vmem:[%s3514_s1 + $0x214] ss:$8 sps:$4 sm:$0xff]   ;;  %v2413_v46 = vld [vmem:[%s3514_s1 + $0x2e4] ss:$8 sps:$4 sm:$0xff]  }
  0x20   :  { %1678 = vmatpush1.bf16.msra.mxu1 %v2304_v31  ;;  %1638 = vmatprep.subr.bf16.mxu0 %v2305_v32  ;;  %v2398_v31 = vld [vmem:[%s3514_s1 + $0x314] ss:$8 sps:$4 sm:$0xff]   ;;  %v2416_v47 = vld [vmem:[%s3514_s1 + $0x3e4] ss:$8 sps:$4 sm:$0xff]   ;;  %v2411_v48 = vld [vmem:[%s3514_s1 + $0x2e0] ss:$8 sps:$4 sm:$0xff]  }
  0x21   :  { %1679 = vmatprep.subr.bf16.mxu1 %v2307_v33  ;;  %v2956_v32 = vld [vmem:[%s3515_s0 + $0x10] sm:$0xff]  ;;  %v2961_v33 = vld [vmem:[%s3515_s0 + $0x18] sm:$0xff] }
  0x23   :  { %1639 = vmatpush2.bf16.msra.mxu0 %v2309_v34  ;;  %v2393_v34 = vld [vmem:[%s3514_s1 + $0x210] ss:$8 sps:$4 sm:$0xff]  }
  0x24   :  { %1680 = vmatpush2.bf16.msra.mxu1 %v2310_v35  ;;  %1640 = vmatprep.subr.bf16.mxu0 %v2311_v36  ;;  %v2396_v35 = vld [vmem:[%s3514_s1 + $0x310] ss:$8 sps:$4 sm:$0xff]   ;;  %v1990_v36 = vcombine.high %v2956_v32, %v2956_v32 }
  0x25   :  { %1681 = vmatprep.subr.bf16.mxu1 %v2313_v37  ;;  %v1992_v37 = vcombine.high %v2961_v33, %v2961_v33 }
  0x27   :  { %1641 = vmatpush2.bf16.msra.mxu0 %v2315_v38  ;;  %v2401_v38 = vld [vmem:[%s3514_s1 + $0x204] ss:$8 sps:$4 sm:$0xff]  }
  0x28   :  { %1682 = vmatpush2.bf16.msra.mxu1 %v2316_v39  ;;  %1642 = vmatprep.subr.bf16.mxu0 %v2317_v40  ;;  %v2404_v39 = vld [vmem:[%s3514_s1 + $0x304] ss:$8 sps:$4 sm:$0xff]   ;;  %v2399_v40 = vld [vmem:[%s3514_s1 + $0x200] ss:$8 sps:$4 sm:$0xff]  }
  0x29   :  { %1683 = vmatprep.subr.bf16.mxu1 %v2319_v41  ;;  %v2402_v41 = vld [vmem:[%s3514_s1 + $0x300] ss:$8 sps:$4 sm:$0xff]  }
  0x2b   :  { %1643 = vmatpush2.bf16.msra.mxu0 %v2321_v42  ;;  %v2407_v42 = vld [vmem:[%s3514_s1 + $0x2f4] ss:$8 sps:$4 sm:$0xff]  }
  0x2c   :  { %1684 = vmatpush2.bf16.msra.mxu1 %v2322_v43  ;;  %1644 = vmatprep.subr.bf16.mxu0 %v2323_v44  ;;  %v2410_v43 = vld [vmem:[%s3514_s1 + $0x3f4] ss:$8 sps:$4 sm:$0xff]   ;;  %v2405_v44 = vld [vmem:[%s3514_s1 + $0x2f0] ss:$8 sps:$4 sm:$0xff]  }
  0x2d   :  { %1685 = vmatprep.subr.bf16.mxu1 %v2325_v45  ;;  %v2408_v45 = vld [vmem:[%s3514_s1 + $0x3f0] ss:$8 sps:$4 sm:$0xff]  }
  0x2f   :  { %1645 = vmatpush2.bf16.msra.mxu0 %v2327_v49  ;;  %v2414_v49 = vld [vmem:[%s3514_s1 + $0x3e0] ss:$8 sps:$4 sm:$0xff]  }
  0x30   :  { %1686 = vmatpush2.bf16.msra.mxu1 %v2328_v50  ;;  %1646 = vmatprep.subr.bf16.mxu0 %v2329_v52  ;;  %v2419_v50 = vld [vmem:[%s3514_s1 + $0x2d4] ss:$8 sps:$4 sm:$0xff]   ;;  %v2417_v52 = vld [vmem:[%s3514_s1 + $0x2d0] ss:$8 sps:$4 sm:$0xff]  }
  0x31   :  { %1687 = vmatprep.subr.bf16.mxu1 %v2331_v53  ;;  %v2420_v53 = vld [vmem:[%s3514_s1 + $0x3d0] ss:$8 sps:$4 sm:$0xff]  }
  0x33   :  { %1647 = vmatpush2.bf16.msra.mxu0 %v2333_v54  ;;  %v2425_v54 = vld [vmem:[%s3514_s1 + $0x2c4] ss:$8 sps:$4 sm:$0xff]  }
  0x34   :  { %1688 = vmatpush2.bf16.msra.mxu1 %v2334_v55  ;;  %1648 = vmatprep.subr.bf16.mxu0 %v2335_v56  ;;  %v2428_v55 = vld [vmem:[%s3514_s1 + $0x3c4] ss:$8 sps:$4 sm:$0xff]   ;;  %v2423_v56 = vld [vmem:[%s3514_s1 + $0x2c0] ss:$8 sps:$4 sm:$0xff]  }
  0x35   :  { %1689 = vmatprep.subr.bf16.mxu1 %v2337_v57  ;;  %v2426_v57 = vld [vmem:[%s3514_s1 + $0x3c0] ss:$8 sps:$4 sm:$0xff]  }
  0x37   :  { %1649 = vmatpush2.bf16.msra.mxu0 %v2339_v58  ;;  %v2431_v58 = vld [vmem:[%s3514_s1 + $0x2b4] ss:$8 sps:$4 sm:$0xff]  }
  0x38   :  { %1690 = vmatpush2.bf16.msra.mxu1 %v2340_v59  ;;  %1650 = vmatprep.subr.bf16.mxu0 %v2341_v60  ;;  %v2434_v59 = vld [vmem:[%s3514_s1 + $0x3b4] ss:$8 sps:$4 sm:$0xff]   ;;  %v2429_v60 = vld [vmem:[%s3514_s1 + $0x2b0] ss:$8 sps:$4 sm:$0xff]  }
  0x39   :  { %1691 = vmatprep.subr.bf16.mxu1 %v2343_v61  ;;  %v2432_v61 = vld [vmem:[%s3514_s1 + $0x3b0] ss:$8 sps:$4 sm:$0xff]  }
  0x3b   :  { %1651 = vmatpush2.bf16.msra.mxu0 %v2345_v62  ;;  %v2437_v62 = vld [vmem:[%s3514_s1 + $0x2a4] ss:$8 sps:$4 sm:$0xff]  }
  0x3c   :  { %1692 = vmatpush2.bf16.msra.mxu1 %v2346_v63  ;;  %1652 = vmatprep.subr.bf16.mxu0 %v2347_v0  ;;  %v2440_v63 = vld [vmem:[%s3514_s1 + $0x3a4] ss:$8 sps:$4 sm:$0xff]   ;;  %v2435_v0 = vld [vmem:[%s3514_s1 + $0x2a0] ss:$8 sps:$4 sm:$0xff]  }
  0x3d   :  { %1693 = vmatprep.subr.bf16.mxu1 %v2349_v1  ;;  %v2438_v1 = vld [vmem:[%s3514_s1 + $0x3a0] ss:$8 sps:$4 sm:$0xff]  }
  0x3f   :  { %1653 = vmatpush2.bf16.msra.mxu0 %v2351_v2  ;;  %v2443_v2 = vld [vmem:[%s3514_s1 + $0x294] ss:$8 sps:$4 sm:$0xff]  }
  0x40   :  { %1694 = vmatpush2.bf16.msra.mxu1 %v2352_v3  ;;  %1704 = vmatprep.subr.bf16.mxu0 %v2359_v4  ;;  %v2446_v3 = vld [vmem:[%s3514_s1 + $0x394] ss:$8 sps:$4 sm:$0xff]   ;;  %v2441_v4 = vld [vmem:[%s3514_s1 + $0x290] ss:$8 sps:$4 sm:$0xff]  }
  0x41   :  { %1745 = vmatprep.subr.bf16.mxu1 %v2362_v5  ;;  %v2444_v5 = vld [vmem:[%s3514_s1 + $0x390] ss:$8 sps:$4 sm:$0xff]  }
  0x42   :  { %1655 = vmatmul.mubr.bf16.vlgmr.msra.gmra.mxu0 %v1985_v6  ;;  %v2449_v6 = vld [vmem:[%s3514_s1 + $0x284] ss:$8 sps:$4 sm:$0xff]  }
  0x43   :  { %1696 = vmatmul.mubr.bf16.vlgmr.msra.gmra.mxu1 %v1987_v7  ;;  %1705 = vmatpush1.bf16.msra.mxu0 %v2357_v8  ;;  %v2452_v7 = vld [vmem:[%s3514_s1 + $0x384] ss:$8 sps:$4 sm:$0xff]   ;;  %v2447_v8 = vld [vmem:[%s3514_s1 + $0x280] ss:$8 sps:$4 sm:$0xff]  }
  0x44   :  { %1746 = vmatpush1.bf16.msra.mxu1 %v2360_v9  ;;  %1706 = vmatprep.subr.bf16.mxu0 %v2365_v10  ;;  %v2450_v9 = vld [vmem:[%s3514_s1 + $0x380] ss:$8 sps:$4 sm:$0xff]   ;;  %v2459_v10 = vld [vmem:[%s3514_s1 + $0x474] ss:$8 sps:$4 sm:$0xff]  }
  0x45   :  { %1747 = vmatprep.subr.bf16.mxu1 %v2368_v11  ;;  %1736 = vmatprep.mubr.bf16.mxu0 %v1990_v36  ;;  %v2462_v11 = vld [vmem:[%s3514_s1 + $0x574] ss:$8 sps:$4 sm:$0xff]   ;;  %v2489_v36 = vld [vmem:[%s3514_s1 + $0x424] ss:$8 sps:$4 sm:$0xff]  }
  0x46   :  { %1777 = vmatprep.mubr.bf16.mxu1 %v1992_v37  ;;  %v2492_v37 = vld [vmem:[%s3514_s1 + $0x524] ss:$8 sps:$4 sm:$0xff]  }
  0x47   :  { %1707 = vmatpush1.bf16.msra.mxu0 %v2363_v12  ;;  %v1989_v12 = vcombine.low %v2956_v32, %v2956_v32  ;;  %v2483_v32 = vld [vmem:[%s3514_s1 + $0x434] ss:$8 sps:$4 sm:$0xff]  }
  0x48   :  { %1748 = vmatpush1.bf16.msra.mxu1 %v2366_v13  ;;  %1708 = vmatprep.subr.bf16.mxu0 %v2371_v14  ;;  %v1991_v13 = vcombine.low %v2961_v33, %v2961_v33  ;;  %v2457_v14 = vld [vmem:[%s3514_s1 + $0x470] ss:$8 sps:$4 sm:$0xff]   ;;  %v2486_v33 = vld [vmem:[%s3514_s1 + $0x534] ss:$8 sps:$4 sm:$0xff]  }
  0x49   :  { %1749 = vmatprep.subr.bf16.mxu1 %v2374_v15  ;;  %v2460_v15 = vld [vmem:[%s3514_s1 + $0x570] ss:$8 sps:$4 sm:$0xff]  }
  0x4b   :  { %1709 = vmatpush1.bf16.msra.mxu0 %v2369_v16  ;;  %v2465_v16 = vld [vmem:[%s3514_s1 + $0x464] ss:$8 sps:$4 sm:$0xff]  }
  0x4c   :  { %1750 = vmatpush1.bf16.msra.mxu1 %v2372_v17  ;;  %1710 = vmatprep.subr.bf16.mxu0 %v2377_v18  ;;  %v2468_v17 = vld [vmem:[%s3514_s1 + $0x564] ss:$8 sps:$4 sm:$0xff]  }
  0x4d   :  { %1751 = vmatprep.subr.bf16.mxu1 %v2380_v19  ;;  %v3106_v18 = vld [vmem:[%s3515_s0 + $0x20] sm:$0xff]  ;;  %v3111_v19 = vld [vmem:[%s3515_s0 + $0x28] sm:$0xff] }
  0x4f   :  { %1711 = vmatpush1.bf16.msra.mxu0 %v2375_v20  ;;  %v1994_v20 = vcombine.high %v3106_v18, %v3106_v18 }
  0x50   :  { %1752 = vmatpush1.bf16.msra.mxu1 %v2378_v21  ;;  %1712 = vmatprep.subr.bf16.mxu0 %v2383_v22  ;;  %v1996_v21 = vcombine.high %v3111_v19, %v3111_v19  ;;  %v2463_v22 = vld [vmem:[%s3514_s1 + $0x460] ss:$8 sps:$4 sm:$0xff]  }
  0x51   :  { %1753 = vmatprep.subr.bf16.mxu1 %v2386_v23  ;;  %v2466_v23 = vld [vmem:[%s3514_s1 + $0x560] ss:$8 sps:$4 sm:$0xff]  }
  0x53   :  { %1713 = vmatpush1.bf16.msra.mxu0 %v2381_v24  ;;  %v2471_v24 = vld [vmem:[%s3514_s1 + $0x454] ss:$8 sps:$4 sm:$0xff]  }
  0x54   :  { %1754 = vmatpush1.bf16.msra.mxu1 %v2384_v25  ;;  %1714 = vmatprep.subr.bf16.mxu0 %v2389_v26  ;;  %v2474_v25 = vld [vmem:[%s3514_s1 + $0x554] ss:$8 sps:$4 sm:$0xff]   ;;  %v2469_v26 = vld [vmem:[%s3514_s1 + $0x450] ss:$8 sps:$4 sm:$0xff]  }
  0x55   :  { %1755 = vmatprep.subr.bf16.mxu1 %v2392_v27  ;;  %v2472_v27 = vld [vmem:[%s3514_s1 + $0x550] ss:$8 sps:$4 sm:$0xff]  }
  0x57   :  { %1715 = vmatpush1.bf16.msra.mxu0 %v2387_v28  ;;  %v2477_v28 = vld [vmem:[%s3514_s1 + $0x444] ss:$8 sps:$4 sm:$0xff]  }
  0x58   :  { %1756 = vmatpush1.bf16.msra.mxu1 %v2390_v29  ;;  %1716 = vmatprep.subr.bf16.mxu0 %v2395_v30  ;;  %v2480_v29 = vld [vmem:[%s3514_s1 + $0x544] ss:$8 sps:$4 sm:$0xff]   ;;  %v2475_v30 = vld [vmem:[%s3514_s1 + $0x440] ss:$8 sps:$4 sm:$0xff]  }
  0x59   :  { %1757 = vmatprep.subr.bf16.mxu1 %v2398_v31  ;;  %v2478_v31 = vld [vmem:[%s3514_s1 + $0x540] ss:$8 sps:$4 sm:$0xff]  }
  0x5b   :  { %1717 = vmatpush1.bf16.msra.mxu0 %v2393_v34  ;;  %v2481_v34 = vld [vmem:[%s3514_s1 + $0x430] ss:$8 sps:$4 sm:$0xff]  }
  0x5c   :  { %1758 = vmatpush1.bf16.msra.mxu1 %v2396_v35  ;;  %1718 = vmatprep.subr.bf16.mxu0 %v2401_v38  ;;  %v2484_v35 = vld [vmem:[%s3514_s1 + $0x530] ss:$8 sps:$4 sm:$0xff]   ;;  %v2487_v38 = vld [vmem:[%s3514_s1 + $0x420] ss:$8 sps:$4 sm:$0xff]  }
  0x5d   :  { %1759 = vmatprep.subr.bf16.mxu1 %v2404_v39  ;;  %v2490_v39 = vld [vmem:[%s3514_s1 + $0x520] ss:$8 sps:$4 sm:$0xff]  }
  0x5f   :  { %1719 = vmatpush1.bf16.msra.mxu0 %v2399_v40  ;;  %v2495_v40 = vld [vmem:[%s3514_s1 + $0x414] ss:$8 sps:$4 sm:$0xff]  }
  0x60   :  { %1760 = vmatpush1.bf16.msra.mxu1 %v2402_v41  ;;  %1720 = vmatprep.subr.bf16.mxu0 %v2407_v42  ;;  %v2498_v41 = vld [vmem:[%s3514_s1 + $0x514] ss:$8 sps:$4 sm:$0xff]   ;;  %v2493_v42 = vld [vmem:[%s3514_s1 + $0x410] ss:$8 sps:$4 sm:$0xff]  }
  0x61   :  { %1761 = vmatprep.subr.bf16.mxu1 %v2410_v43  ;;  %v2496_v43 = vld [vmem:[%s3514_s1 + $0x510] ss:$8 sps:$4 sm:$0xff]  }
  0x63   :  { %1721 = vmatpush2.bf16.msra.mxu0 %v2405_v44  ;;  %v2501_v44 = vld [vmem:[%s3514_s1 + $0x404] ss:$8 sps:$4 sm:$0xff]  }
  0x64   :  { %1762 = vmatpush2.bf16.msra.mxu1 %v2408_v45  ;;  %1722 = vmatprep.subr.bf16.mxu0 %v2413_v46  ;;  %v2504_v45 = vld [vmem:[%s3514_s1 + $0x504] ss:$8 sps:$4 sm:$0xff]   ;;  %v2499_v46 = vld [vmem:[%s3514_s1 + $0x400] ss:$8 sps:$4 sm:$0xff]  }
  0x65   :  { %1763 = vmatprep.subr.bf16.mxu1 %v2416_v47  ;;  %v2502_v47 = vld [vmem:[%s3514_s1 + $0x500] ss:$8 sps:$4 sm:$0xff]  }
  0x67   :  { %1723 = vmatpush2.bf16.msra.mxu0 %v2411_v48  ;;  %v2507_v48 = vld [vmem:[%s3514_s1 + $0x4f4] ss:$8 sps:$4 sm:$0xff]  }
  0x68   :  { %1764 = vmatpush2.bf16.msra.mxu1 %v2414_v49  ;;  %1724 = vmatprep.subr.bf16.mxu0 %v2419_v50  ;;  %v2510_v49 = vld [vmem:[%s3514_s1 + $0x5f4] ss:$8 sps:$4 sm:$0xff]   ;;  %v2505_v50 = vld [vmem:[%s3514_s1 + $0x4f0] ss:$8 sps:$4 sm:$0xff]  }
  0x69   :  { %1765 = vmatprep.subr.bf16.mxu1 %v2422_v51  ;;  %v2508_v51 = vld [vmem:[%s3514_s1 + $0x5f0] ss:$8 sps:$4 sm:$0xff]  }
  0x6b   :  { %1725 = vmatpush2.bf16.msra.mxu0 %v2417_v52  ;;  %v2513_v52 = vld [vmem:[%s3514_s1 + $0x4e4] ss:$8 sps:$4 sm:$0xff]  }
  0x6c   :  { %1766 = vmatpush2.bf16.msra.mxu1 %v2420_v53  ;;  %1726 = vmatprep.subr.bf16.mxu0 %v2425_v54  ;;  %v2516_v53 = vld [vmem:[%s3514_s1 + $0x5e4] ss:$8 sps:$4 sm:$0xff]   ;;  %v2511_v54 = vld [vmem:[%s3514_s1 + $0x4e0] ss:$8 sps:$4 sm:$0xff]  }
  0x6d   :  { %1767 = vmatprep.subr.bf16.mxu1 %v2428_v55  ;;  %v2514_v55 = vld [vmem:[%s3514_s1 + $0x5e0] ss:$8 sps:$4 sm:$0xff]  }
  0x6f   :  { %1727 = vmatpush2.bf16.msra.mxu0 %v2423_v56  ;;  %v2519_v56 = vld [vmem:[%s3514_s1 + $0x4d4] ss:$8 sps:$4 sm:$0xff]  }
  0x70   :  { %1768 = vmatpush2.bf16.msra.mxu1 %v2426_v57  ;;  %1728 = vmatprep.subr.bf16.mxu0 %v2431_v58  ;;  %v2522_v57 = vld [vmem:[%s3514_s1 + $0x5d4] ss:$8 sps:$4 sm:$0xff]   ;;  %v2517_v58 = vld [vmem:[%s3514_s1 + $0x4d0] ss:$8 sps:$4 sm:$0xff]  }
  0x71   :  { %1769 = vmatprep.subr.bf16.mxu1 %v2434_v59  ;;  %v2520_v59 = vld [vmem:[%s3514_s1 + $0x5d0] ss:$8 sps:$4 sm:$0xff]  }
  0x73   :  { %1729 = vmatpush2.bf16.msra.mxu0 %v2429_v60  ;;  %v2525_v60 = vld [vmem:[%s3514_s1 + $0x4c4] ss:$8 sps:$4 sm:$0xff]  }
  0x74   :  { %1770 = vmatpush2.bf16.msra.mxu1 %v2432_v61  ;;  %1730 = vmatprep.subr.bf16.mxu0 %v2437_v62  ;;  %v2528_v61 = vld [vmem:[%s3514_s1 + $0x5c4] ss:$8 sps:$4 sm:$0xff]   ;;  %v2523_v62 = vld [vmem:[%s3514_s1 + $0x4c0] ss:$8 sps:$4 sm:$0xff]  }
  0x75   :  { %1771 = vmatprep.subr.bf16.mxu1 %v2440_v63  ;;  %v2526_v63 = vld [vmem:[%s3514_s1 + $0x5c0] ss:$8 sps:$4 sm:$0xff]  }
  0x77   :  { %1731 = vmatpush2.bf16.msra.mxu0 %v2435_v0  ;;  %v2531_v0 = vld [vmem:[%s3514_s1 + $0x4b4] ss:$8 sps:$4 sm:$0xff]  }
  0x78   :  { %1772 = vmatpush2.bf16.msra.mxu1 %v2438_v1  ;;  %1732 = vmatprep.subr.bf16.mxu0 %v2443_v2  ;;  %v2534_v1 = vld [vmem:[%s3514_s1 + $0x5b4] ss:$8 sps:$4 sm:$0xff]   ;;  %v2529_v2 = vld [vmem:[%s3514_s1 + $0x4b0] ss:$8 sps:$4 sm:$0xff]  }
  0x79   :  { %1773 = vmatprep.subr.bf16.mxu1 %v2446_v3  ;;  %v2532_v3 = vld [vmem:[%s3514_s1 + $0x5b0] ss:$8 sps:$4 sm:$0xff]  }
  0x7b   :  { %1733 = vmatpush2.bf16.msra.mxu0 %v2441_v4  ;;  %v2537_v4 = vld [vmem:[%s3514_s1 + $0x4a4] ss:$8 sps:$4 sm:$0xff]  }
  0x7c   :  { %1774 = vmatpush2.bf16.msra.mxu1 %v2444_v5  ;;  %1734 = vmatprep.subr.bf16.mxu0 %v2449_v6  ;;  %v2540_v5 = vld [vmem:[%s3514_s1 + $0x5a4] ss:$8 sps:$4 sm:$0xff]   ;;  %v2535_v6 = vld [vmem:[%s3514_s1 + $0x4a0] ss:$8 sps:$4 sm:$0xff]  }
  0x7d   :  { %1775 = vmatprep.subr.bf16.mxu1 %v2452_v7  ;;  %v2538_v7 = vld [vmem:[%s3514_s1 + $0x5a0] ss:$8 sps:$4 sm:$0xff]  }
  0x7f   :  { %1735 = vmatpush2.bf16.msra.mxu0 %v2447_v8  ;;  %v2543_v8 = vld [vmem:[%s3514_s1 + $0x494] ss:$8 sps:$4 sm:$0xff]  }
  0x80   :  { %1776 = vmatpush2.bf16.msra.mxu1 %v2450_v9  ;;  %1786 = vmatprep.subr.bf16.mxu0 %v2459_v10  ;;  %v2546_v9 = vld [vmem:[%s3514_s1 + $0x594] ss:$8 sps:$4 sm:$0xff]   ;;  %v2541_v10 = vld [vmem:[%s3514_s1 + $0x490] ss:$8 sps:$4 sm:$0xff]  }
  0x81   :  { %1827 = vmatprep.subr.bf16.mxu1 %v2462_v11  ;;  %v2544_v11 = vld [vmem:[%s3514_s1 + $0x590] ss:$8 sps:$4 sm:$0xff]  }
  0x82   :  { %1737 = vmatmul.mubr.bf16.vlgmr.msra.gmra.mxu0 %v1989_v12  ;;  %v2549_v12 = vld [vmem:[%s3514_s1 + $0x484] ss:$8 sps:$4 sm:$0xff]  }
  0x83   :  { %1778 = vmatmul.mubr.bf16.vlgmr.msra.gmra.mxu1 %v1991_v13  ;;  %1787 = vmatpush1.bf16.msra.mxu0 %v2457_v14  ;;  %v2552_v13 = vld [vmem:[%s3514_s1 + $0x584] ss:$8 sps:$4 sm:$0xff]   ;;  %v2547_v14 = vld [vmem:[%s3514_s1 + $0x480] ss:$8 sps:$4 sm:$0xff]  }
  0x84   :  { %1828 = vmatpush1.bf16.msra.mxu1 %v2460_v15  ;;  %1788 = vmatprep.subr.bf16.mxu0 %v2465_v16  ;;  %v2550_v15 = vld [vmem:[%s3514_s1 + $0x580] ss:$8 sps:$4 sm:$0xff]   ;;  %v2559_v16 = vld [vmem:[%s3514_s1 + $0x674] ss:$8 sps:$4 sm:$0xff]  }
  0x85   :  { %1829 = vmatprep.subr.bf16.mxu1 %v2468_v17  ;;  %1818 = vmatprep.mubr.bf16.mxu0 %v1994_v20  ;;  %v2562_v17 = vld [vmem:[%s3514_s1 + $0x774] ss:$8 sps:$4 sm:$0xff]   ;;  %v1993_v20 = vcombine.low %v3106_v18, %v3106_v18  ;;  %v2560_v18 = vld [vmem:[%s3514_s1 + $0x770] ss:$8 sps:$4 sm:$0xff]  }
  0x86   :  { %1859 = vmatprep.mubr.bf16.mxu1 %v1996_v21  ;;  %v1995_v21 = vcombine.low %v3111_v19, %v3111_v19  ;;  %v2565_v19 = vld [vmem:[%s3514_s1 + $0x664] ss:$8 sps:$4 sm:$0xff]  }
  0x87   :  { %1789 = vmatpush1.bf16.msra.mxu0 %v2463_v22  ;;  %v3304_v22 = vld [vmem:[%s3515_s0 + $0x30] sm:$0xff] }
  0x88   :  { %1830 = vmatpush1.bf16.msra.mxu1 %v2466_v23  ;;  %1790 = vmatprep.subr.bf16.mxu0 %v2471_v24  ;;  %v3309_v23 = vld [vmem:[%s3515_s0 + $0x38] sm:$0xff] }
  0x89   :  { %1831 = vmatprep.subr.bf16.mxu1 %v2474_v25  ;;  %v2557_v24 = vld [vmem:[%s3514_s1 + $0x670] ss:$8 sps:$4 sm:$0xff]   ;;  %v2568_v25 = vld [vmem:[%s3514_s1 + $0x764] ss:$8 sps:$4 sm:$0xff]  }
  0x8b   :  { %1791 = vmatpush1.bf16.msra.mxu0 %v2469_v26  ;;  %v1998_v26 = vcombine.high %v3304_v22, %v3304_v22 }
  0x8c   :  { %1832 = vmatpush1.bf16.msra.mxu1 %v2472_v27  ;;  %1792 = vmatprep.subr.bf16.mxu0 %v2477_v28  ;;  %v2000_v27 = vcombine.high %v3309_v23, %v3309_v23  ;;  %v2563_v28 = vld [vmem:[%s3514_s1 + $0x660] ss:$8 sps:$4 sm:$0xff]  }
  0x8d   :  { %1833 = vmatprep.subr.bf16.mxu1 %v2480_v29  ;;  %v2566_v29 = vld [vmem:[%s3514_s1 + $0x760] ss:$8 sps:$4 sm:$0xff]  }
  0x8f   :  { %1793 = vmatpush1.bf16.msra.mxu0 %v2475_v30  ;;  %v2571_v30 = vld [vmem:[%s3514_s1 + $0x654] ss:$8 sps:$4 sm:$0xff]  }
  0x90   :  { %1834 = vmatpush1.bf16.msra.mxu1 %v2478_v31  ;;  %1794 = vmatprep.subr.bf16.mxu0 %v2483_v32  ;;  %v2574_v31 = vld [vmem:[%s3514_s1 + $0x754] ss:$8 sps:$4 sm:$0xff]   ;;  %v2569_v32 = vld [vmem:[%s3514_s1 + $0x650] ss:$8 sps:$4 sm:$0xff]  }
  0x91   :  { %1835 = vmatprep.subr.bf16.mxu1 %v2486_v33  ;;  %v2572_v33 = vld [vmem:[%s3514_s1 + $0x750] ss:$8 sps:$4 sm:$0xff]  }
  0x93   :  { %1795 = vmatpush1.bf16.msra.mxu0 %v2481_v34  ;;  %v2577_v34 = vld [vmem:[%s3514_s1 + $0x644] ss:$8 sps:$4 sm:$0xff]  }
  0x94   :  { %1836 = vmatpush1.bf16.msra.mxu1 %v2484_v35  ;;  %1796 = vmatprep.subr.bf16.mxu0 %v2489_v36  ;;  %v2580_v35 = vld [vmem:[%s3514_s1 + $0x744] ss:$8 sps:$4 sm:$0xff]   ;;  %v2575_v36 = vld [vmem:[%s3514_s1 + $0x640] ss:$8 sps:$4 sm:$0xff]  }
  0x95   :  { %1837 = vmatprep.subr.bf16.mxu1 %v2492_v37  ;;  %v2578_v37 = vld [vmem:[%s3514_s1 + $0x740] ss:$8 sps:$4 sm:$0xff]  }
  0x97   :  { %1797 = vmatpush1.bf16.msra.mxu0 %v2487_v38  ;;  %v2583_v38 = vld [vmem:[%s3514_s1 + $0x634] ss:$8 sps:$4 sm:$0xff]  }
  0x98   :  { %1838 = vmatpush1.bf16.msra.mxu1 %v2490_v39  ;;  %1798 = vmatprep.subr.bf16.mxu0 %v2495_v40  ;;  %v2586_v39 = vld [vmem:[%s3514_s1 + $0x734] ss:$8 sps:$4 sm:$0xff]   ;;  %v2581_v40 = vld [vmem:[%s3514_s1 + $0x630] ss:$8 sps:$4 sm:$0xff]  }
  0x99   :  { %1839 = vmatprep.subr.bf16.mxu1 %v2498_v41  ;;  %v2584_v41 = vld [vmem:[%s3514_s1 + $0x730] ss:$8 sps:$4 sm:$0xff]  }
  0x9b   :  { %1799 = vmatpush1.bf16.msra.mxu0 %v2493_v42  ;;  %v2589_v42 = vld [vmem:[%s3514_s1 + $0x624] ss:$8 sps:$4 sm:$0xff]  }
  0x9c   :  { %1840 = vmatpush1.bf16.msra.mxu1 %v2496_v43  ;;  %1800 = vmatprep.subr.bf16.mxu0 %v2501_v44  ;;  %v2592_v43 = vld [vmem:[%s3514_s1 + $0x724] ss:$8 sps:$4 sm:$0xff]   ;;  %v2587_v44 = vld [vmem:[%s3514_s1 + $0x620] ss:$8 sps:$4 sm:$0xff]  }
  0x9d   :  { %1841 = vmatprep.subr.bf16.mxu1 %v2504_v45  ;;  %v2590_v45 = vld [vmem:[%s3514_s1 + $0x720] ss:$8 sps:$4 sm:$0xff]  }
  0x9f   :  { %1801 = vmatpush1.bf16.msra.mxu0 %v2499_v46  ;;  %v2595_v46 = vld [vmem:[%s3514_s1 + $0x614] ss:$8 sps:$4 sm:$0xff]  }
  0xa0   :  { %1842 = vmatpush1.bf16.msra.mxu1 %v2502_v47  ;;  %1802 = vmatprep.subr.bf16.mxu0 %v2507_v48  ;;  %v2598_v47 = vld [vmem:[%s3514_s1 + $0x714] ss:$8 sps:$4 sm:$0xff]   ;;  %v2593_v48 = vld [vmem:[%s3514_s1 + $0x610] ss:$8 sps:$4 sm:$0xff]  }
  0xa1   :  { %1843 = vmatprep.subr.bf16.mxu1 %v2510_v49  ;;  %v2596_v49 = vld [vmem:[%s3514_s1 + $0x710] ss:$8 sps:$4 sm:$0xff]  }
  0xa3   :  { %1803 = vmatpush2.bf16.msra.mxu0 %v2505_v50  ;;  %v2601_v50 = vld [vmem:[%s3514_s1 + $0x604] ss:$8 sps:$4 sm:$0xff]  }
  0xa4   :  { %1844 = vmatpush2.bf16.msra.mxu1 %v2508_v51  ;;  %1804 = vmatprep.subr.bf16.mxu0 %v2513_v52  ;;  %v2604_v51 = vld [vmem:[%s3514_s1 + $0x704] ss:$8 sps:$4 sm:$0xff]   ;;  %v2599_v52 = vld [vmem:[%s3514_s1 + $0x600] ss:$8 sps:$4 sm:$0xff]  }
  0xa5   :  { %1845 = vmatprep.subr.bf16.mxu1 %v2516_v53  ;;  %v2602_v53 = vld [vmem:[%s3514_s1 + $0x700] ss:$8 sps:$4 sm:$0xff]  }
  0xa7   :  { %1805 = vmatpush2.bf16.msra.mxu0 %v2511_v54  ;;  %v2607_v54 = vld [vmem:[%s3514_s1 + $0x6f4] ss:$8 sps:$4 sm:$0xff]  }
  0xa8   :  { %1846 = vmatpush2.bf16.msra.mxu1 %v2514_v55  ;;  %1806 = vmatprep.subr.bf16.mxu0 %v2519_v56  ;;  %v2610_v55 = vld [vmem:[%s3514_s1 + $0x7f4] ss:$8 sps:$4 sm:$0xff]   ;;  %v2605_v56 = vld [vmem:[%s3514_s1 + $0x6f0] ss:$8 sps:$4 sm:$0xff]  }
  0xa9   :  { %1847 = vmatprep.subr.bf16.mxu1 %v2522_v57  ;;  %v2608_v57 = vld [vmem:[%s3514_s1 + $0x7f0] ss:$8 sps:$4 sm:$0xff]  }
  0xab   :  { %1807 = vmatpush2.bf16.msra.mxu0 %v2517_v58  ;;  %v2613_v58 = vld [vmem:[%s3514_s1 + $0x6e4] ss:$8 sps:$4 sm:$0xff]  }
  0xac   :  { %1848 = vmatpush2.bf16.msra.mxu1 %v2520_v59  ;;  %1808 = vmatprep.subr.bf16.mxu0 %v2525_v60  ;;  %v2616_v59 = vld [vmem:[%s3514_s1 + $0x7e4] ss:$8 sps:$4 sm:$0xff]   ;;  %v2611_v60 = vld [vmem:[%s3514_s1 + $0x6e0] ss:$8 sps:$4 sm:$0xff]  }
  0xad   :  { %1849 = vmatprep.subr.bf16.mxu1 %v2528_v61  ;;  %v2614_v61 = vld [vmem:[%s3514_s1 + $0x7e0] ss:$8 sps:$4 sm:$0xff]  }
  0xaf   :  { %1809 = vmatpush2.bf16.msra.mxu0 %v2523_v62  ;;  %v2619_v62 = vld [vmem:[%s3514_s1 + $0x6d4] ss:$8 sps:$4 sm:$0xff]  }
  0xb0   :  { %1850 = vmatpush2.bf16.msra.mxu1 %v2526_v63  ;;  %1810 = vmatprep.subr.bf16.mxu0 %v2531_v0  ;;  %v2622_v63 = vld [vmem:[%s3514_s1 + $0x7d4] ss:$8 sps:$4 sm:$0xff]   ;;  %v2617_v0 = vld [vmem:[%s3514_s1 + $0x6d0] ss:$8 sps:$4 sm:$0xff]  }
  0xb1   :  { %1851 = vmatprep.subr.bf16.mxu1 %v2534_v1  ;;  %v2620_v1 = vld [vmem:[%s3514_s1 + $0x7d0] ss:$8 sps:$4 sm:$0xff]  }
  0xb3   :  { %1811 = vmatpush2.bf16.msra.mxu0 %v2529_v2  ;;  %v2625_v2 = vld [vmem:[%s3514_s1 + $0x6c4] ss:$8 sps:$4 sm:$0xff]  }
  0xb4   :  { %1852 = vmatpush2.bf16.msra.mxu1 %v2532_v3  ;;  %1812 = vmatprep.subr.bf16.mxu0 %v2537_v4  ;;  %v2628_v3 = vld [vmem:[%s3514_s1 + $0x7c4] ss:$8 sps:$4 sm:$0xff]   ;;  %v2623_v4 = vld [vmem:[%s3514_s1 + $0x6c0] ss:$8 sps:$4 sm:$0xff]  }
  0xb5   :  { %1853 = vmatprep.subr.bf16.mxu1 %v2540_v5  ;;  %v2626_v5 = vld [vmem:[%s3514_s1 + $0x7c0] ss:$8 sps:$4 sm:$0xff]  }
  0xb7   :  { %1813 = vmatpush2.bf16.msra.mxu0 %v2535_v6  ;;  %v2631_v6 = vld [vmem:[%s3514_s1 + $0x6b4] ss:$8 sps:$4 sm:$0xff]  }
  0xb8   :  { %1854 = vmatpush2.bf16.msra.mxu1 %v2538_v7  ;;  %1814 = vmatprep.subr.bf16.mxu0 %v2543_v8  ;;  %v2634_v7 = vld [vmem:[%s3514_s1 + $0x7b4] ss:$8 sps:$4 sm:$0xff]   ;;  %v2629_v8 = vld [vmem:[%s3514_s1 + $0x6b0] ss:$8 sps:$4 sm:$0xff]  }
  0xb9   :  { %1855 = vmatprep.subr.bf16.mxu1 %v2546_v9  ;;  %v2632_v9 = vld [vmem:[%s3514_s1 + $0x7b0] ss:$8 sps:$4 sm:$0xff]  }
  0xbb   :  { %1815 = vmatpush2.bf16.msra.mxu0 %v2541_v10  ;;  %v2637_v10 = vld [vmem:[%s3514_s1 + $0x6a4] ss:$8 sps:$4 sm:$0xff]  }
  0xbc   :  { %1856 = vmatpush2.bf16.msra.mxu1 %v2544_v11  ;;  %1816 = vmatprep.subr.bf16.mxu0 %v2549_v12  ;;  %v2640_v11 = vld [vmem:[%s3514_s1 + $0x7a4] ss:$8 sps:$4 sm:$0xff]   ;;  %v2635_v12 = vld [vmem:[%s3514_s1 + $0x6a0] ss:$8 sps:$4 sm:$0xff]  }
  0xbd   :  { %1857 = vmatprep.subr.bf16.mxu1 %v2552_v13  ;;  %v2638_v13 = vld [vmem:[%s3514_s1 + $0x7a0] ss:$8 sps:$4 sm:$0xff]  }
  0xbf   :  { %1817 = vmatpush2.bf16.msra.mxu0 %v2547_v14  ;;  %v2643_v14 = vld [vmem:[%s3514_s1 + $0x694] ss:$8 sps:$4 sm:$0xff]  }
  0xc0   :  { %1858 = vmatpush2.bf16.msra.mxu1 %v2550_v15  ;;  %1868 = vmatprep.subr.bf16.mxu0 %v2559_v16  ;;  %v2646_v15 = vld [vmem:[%s3514_s1 + $0x794] ss:$8 sps:$4 sm:$0xff]   ;;  %v2641_v16 = vld [vmem:[%s3514_s1 + $0x690] ss:$8 sps:$4 sm:$0xff]  }
  0xc1   :  { %1909 = vmatprep.subr.bf16.mxu1 %v2562_v17  ;;  %v2644_v17 = vld [vmem:[%s3514_s1 + $0x790] ss:$8 sps:$4 sm:$0xff]  }
  0xc2   :  { %1819 = vmatmul.mubr.bf16.vlgmr.msra.gmra.mxu0 %v1993_v20  ;;  %v2649_v20 = vld [vmem:[%s3514_s1 + $0x684] ss:$8 sps:$4 sm:$0xff]  }
  0xc3   :  { %1860 = vmatmul.mubr.bf16.vlgmr.msra.gmra.mxu1 %v1995_v21  ;;  %1869 = vmatpush1.bf16.msra.mxu0 %v2557_v24  ;;  %v2652_v21 = vld [vmem:[%s3514_s1 + $0x784] ss:$8 sps:$4 sm:$0xff]   ;;  %v2647_v24 = vld [vmem:[%s3514_s1 + $0x680] ss:$8 sps:$4 sm:$0xff]  }
  0xc4   :  { %1910 = vmatpush1.bf16.msra.mxu1 %v2560_v18  ;;  %1870 = vmatprep.subr.bf16.mxu0 %v2565_v19  ;;  %v2650_v18 = vld [vmem:[%s3514_s1 + $0x780] ss:$8 sps:$4 sm:$0xff]   ;;  %v1997_v19 = vcombine.low %v3304_v22, %v3304_v22 }
  0xc5   :  { %1911 = vmatprep.subr.bf16.mxu1 %v2568_v25  ;;  %1900 = vmatprep.mubr.bf16.mxu0 %v1998_v26  ;;  %v1999_v25 = vcombine.low %v3309_v23, %v3309_v23 }
  0xc6   :  { %1941 = vmatprep.mubr.bf16.mxu1 %v2000_v27 }
  0xc7   :  { %1871 = vmatpush1.bf16.msra.mxu0 %v2563_v28 }
  0xc8   :  { %1912 = vmatpush1.bf16.msra.mxu1 %v2566_v29  ;;  %1872 = vmatprep.subr.bf16.mxu0 %v2571_v30 }
  0xc9   :  { %1913 = vmatprep.subr.bf16.mxu1 %v2574_v31 }
  0xcb   :  { %1873 = vmatpush1.bf16.msra.mxu0 %v2569_v32 }
  0xcc   :  { %1914 = vmatpush1.bf16.msra.mxu1 %v2572_v33  ;;  %1874 = vmatprep.subr.bf16.mxu0 %v2577_v34 }
  0xcd   :  { %1915 = vmatprep.subr.bf16.mxu1 %v2580_v35 }
  0xcf   :  { %1875 = vmatpush1.bf16.msra.mxu0 %v2575_v36 }
  0xd0   :  { %1916 = vmatpush1.bf16.msra.mxu1 %v2578_v37  ;;  %1876 = vmatprep.subr.bf16.mxu0 %v2583_v38 }
  0xd1   :  { %1917 = vmatprep.subr.bf16.mxu1 %v2586_v39 }
  0xd3   :  { %1877 = vmatpush1.bf16.msra.mxu0 %v2581_v40 }
  0xd4   :  { %1918 = vmatpush1.bf16.msra.mxu1 %v2584_v41  ;;  %1878 = vmatprep.subr.bf16.mxu0 %v2589_v42 }
  0xd5   :  { %1919 = vmatprep.subr.bf16.mxu1 %v2592_v43 }
  0xd7   :  { %1879 = vmatpush1.bf16.msra.mxu0 %v2587_v44 }
  0xd8   :  { %1920 = vmatpush1.bf16.msra.mxu1 %v2590_v45  ;;  %1880 = vmatprep.subr.bf16.mxu0 %v2595_v46 }
  0xd9   :  { %1921 = vmatprep.subr.bf16.mxu1 %v2598_v47 }
  0xdb   :  { %1881 = vmatpush1.bf16.msra.mxu0 %v2593_v48 }
  0xdc   :  { %1922 = vmatpush1.bf16.msra.mxu1 %v2596_v49  ;;  %1882 = vmatprep.subr.bf16.mxu0 %v2601_v50 }
  0xdd   :  { %1923 = vmatprep.subr.bf16.mxu1 %v2604_v51 }
  0xdf   :  { %1883 = vmatpush1.bf16.msra.mxu0 %v2599_v52 }
  0xe0   :  { %1924 = vmatpush1.bf16.msra.mxu1 %v2602_v53  ;;  %1884 = vmatprep.subr.bf16.mxu0 %v2607_v54  ;;  %v1961_v54 = vlaneseq }
  0xe1   :  { %1925 = vmatprep.subr.bf16.mxu1 %v2610_v55 }
  0xe2   :  { %v1962_v55 = vshrl.u32 %v1961_v54, 7 }
  0xe3   :  { %1885 = vmatpush2.bf16.msra.mxu0 %v2605_v56 }
  0xe4   :  { %1926 = vmatpush2.bf16.msra.mxu1 %v2608_v57  ;;  %1886 = vmatprep.subr.bf16.mxu0 %v2613_v58  ;;  %v1963_v58 = vsub.s32 0, %v1962_v55 }
  0xe5   :  { %1927 = vmatprep.subr.bf16.mxu1 %v2616_v59  ;;  %v1959_v59 = vld [vmem:[%s3516_s2] sm:$0x3] }
  0xe7   :  { %1887 = vmatpush2.bf16.msra.mxu0 %v2611_v60 }
  0xe8   :  { %1928 = vmatpush2.bf16.msra.mxu1 %v2614_v61  ;;  %1888 = vmatprep.subr.bf16.mxu0 %v2619_v62  ;;  %v1967_v61 = vsub.s32 1, %v1962_v55 }
  0xe9   :  { %1929 = vmatprep.subr.bf16.mxu1 %v2622_v63 }
  0xeb   :  { %1889 = vmatpush2.bf16.msra.mxu0 %v2617_v0 }
  0xec   :  { %1930 = vmatpush2.bf16.msra.mxu1 %v2620_v1  ;;  %1890 = vmatprep.subr.bf16.mxu0 %v2625_v2  ;;  %v1964_v2 = vrot.slane %v1959_v59, %v1963_v58 }
  0xed   :  { %1931 = vmatprep.subr.bf16.mxu1 %v2628_v3 }
  0xef   :  { %1891 = vmatpush2.bf16.msra.mxu0 %v2623_v4 }
  0xf0   :  { %1932 = vmatpush2.bf16.msra.mxu1 %v2626_v5  ;;  %1892 = vmatprep.subr.bf16.mxu0 %v2631_v6 }
  0xf1   :  { %1933 = vmatprep.subr.bf16.mxu1 %v2634_v7  ;;  %v1968_v7 = vrot.slane %v1959_v59, %v1967_v61 }
  0xf3   :  { %1893 = vmatpush2.bf16.msra.mxu0 %v2629_v8 }
  0xf4   :  { %1934 = vmatpush2.bf16.msra.mxu1 %v2632_v9  ;;  %1894 = vmatprep.subr.bf16.mxu0 %v2637_v10 }
  0xf5   :  { %1935 = vmatprep.subr.bf16.mxu1 %v2640_v11 }
  0xf7   :  { %1895 = vmatpush2.bf16.msra.mxu0 %v2635_v12 }
  0xf8   :  { %1936 = vmatpush2.bf16.msra.mxu1 %v2638_v13  ;;  %1896 = vmatprep.subr.bf16.mxu0 %v2643_v14 }
  0xf9   :  { %1937 = vmatprep.subr.bf16.mxu1 %v2646_v15 }
  0xfb   :  { %1897 = vmatpush2.bf16.msra.mxu0 %v2641_v16 }
  0xfc   :  { %1938 = vmatpush2.bf16.msra.mxu1 %v2644_v17  ;;  %1898 = vmatprep.subr.bf16.mxu0 %v2649_v20 }
  0xfd   :  { %1939 = vmatprep.subr.bf16.mxu1 %v2652_v21 }
  0xff   :  { %1899 = vmatpush2.bf16.msra.mxu0 %v2647_v24 }
 0x100   :  { %1940 = vmatpush2.bf16.msra.mxu1 %v2650_v18 }
 0x102   :  { %v1656_v26 = vpop.f32.mrf.mxu0  ;;  %1901 = vmatmul.mubr.bf16.vlgmr.msra.gmra.mxu0 %v1997_v19 }
 0x103   :  { %v1697_v27 = vpop.f32.mrf.mxu1  ;;  %1942 = vmatmul.mubr.bf16.vlgmr.msra.gmra.mxu1 %v1999_v25 }
 0x104   :  { %v1698_v28 = vadd.f32 %v1697_v27, %v1656_v26  ;;  %v1658_v29 = vpop.f32.mrf.mxu0 }
 0x105   :  { %v1699_v30 = vpop.f32.mrf.mxu1 }
 0x106   :  { %v1700_v31 = vadd.f32 %v1699_v30, %v1658_v29  ;;  %v1660_v32 = vpop.f32.mrf.mxu0 }
 0x107   :  { %v1701_v33 = vpop.f32.mrf.mxu1 }
 0x108   :  { %v1661_v34 = vpop.f32.mrf.mxu0 }
 0x109   :  { %v1702_v35 = vpop.f32.mrf.mxu1 }
 0x142   :  { %v1738_v36 = vpop.f32.mrf.mxu0 }
 0x143   :  { %v1779_v37 = vpop.f32.mrf.mxu1  ;;  %v1739_v22 = vadd.f32 %v1738_v36, %v1698_v28 }
 0x144   :  { %v1740_v38 = vpop.f32.mrf.mxu0 }
 0x145   :  { %v1781_v39 = vpop.f32.mrf.mxu1  ;;  %v1780_v23 = vadd.f32 %v1779_v37, %v1739_v22  ;;  %v1741_v40 = vadd.f32 %v1740_v38, %v1700_v31 }
 0x146   :  { %v1742_v41 = vpop.f32.mrf.mxu0 }
 0x147   :  { %v1783_v42 = vpop.f32.mrf.mxu1  ;;  %v1782_v43 = vadd.f32 %v1781_v39, %v1741_v40 }
 0x148   :  { %v1743_v44 = vpop.f32.mrf.mxu0 }
 0x149   :  { %v1784_v45 = vpop.f32.mrf.mxu1 }
 0x182   :  { %v1820_v46 = vpop.f32.mrf.mxu0 }
 0x183   :  { %v1861_v47 = vpop.f32.mrf.mxu1  ;;  %v1821_v56 = vadd.f32 %v1820_v46, %v1780_v23 }
 0x184   :  { %v1822_v48 = vpop.f32.mrf.mxu0 }
 0x185   :  { %v1863_v49 = vpop.f32.mrf.mxu1  ;;  %v1823_v57 = vadd.f32 %v1822_v48, %v1782_v43  ;;  %v1862_v60 = vadd.f32 %v1861_v47, %v1821_v56 }
 0x186   :  { %v1824_v50 = vpop.f32.mrf.mxu0 }
 0x187   :  { %v1865_v51 = vpop.f32.mrf.mxu1  ;;  %v1864_v0 = vadd.f32 %v1863_v49, %v1823_v57 }
 0x188   :  { %v1825_v52 = vpop.f32.mrf.mxu0 }
 0x189   :  { %v1866_v53 = vpop.f32.mrf.mxu1 }
 0x1c2   :  { %v1902_v62 = vpop.f32.mrf.mxu0 }
 0x1c3   :  { %v1943_v63 = vpop.f32.mrf.mxu1  ;;  %v1903_v1 = vadd.f32 %v1902_v62, %v1862_v60 }
 0x1c4   :  { %v1904_v3 = vpop.f32.mrf.mxu0 }
 0x1c5   :  { %v1945_v4 = vpop.f32.mrf.mxu1  ;;  %v1944_v5 = vadd.f32 %v1943_v63, %v1903_v1  ;;  %v1905_v6 = vadd.f32 %v1904_v3, %v1864_v0 }
 0x1c6   :  { %v1906_v8 = vpop.f32.mrf.mxu0 }
 0x1c7   :  { %v1947_v9 = vpop.f32.mrf.mxu1  ;;  %v1971_v10 = vadd.f32 %v1964_v2, %v1944_v5  ;;  %v1946_v11 = vadd.f32 %v1945_v4, %v1905_v6 }
 0x1c8   :  { %v1907_v12 = vpop.f32.mrf.mxu0 }
 0x1c9   :  { %v1948_v13 = vpop.f32.mrf.mxu1  ;;  %vm1973_vm0 = vcmp.ge.f32.partialorder %v1971_v10, 0.0  ;;  %v1975_v14 = vmul.f32 0.2, %v1971_v10  ;;  %v1972_v15 = vadd.f32 %v1968_v7, %v1946_v11 }
 0x1cb   :  { %v1977_v16 = vsel %vm1973_vm0, %v1971_v10, %v1975_v14  ;;  %vm1974_vm1 = vcmp.ge.f32.partialorder %v1972_v15, 0.0  ;;  %v1976_v17 = vmul.f32 0.2, %v1972_v15 }
 0x1cc   :  { %1979 = vst [vmem:[%s3517_s3] sm:$0xff] %v1977_v16 }
 0x1cd   :  { %v1978_v20 = vsel %vm1974_vm1, %v1972_v15, %v1976_v17 }
 0x1ce   :  { %1980 = vst [vmem:[%s3517_s3 + $0x8] sm:$0xff] %v1978_v20 }

// kernel: critic_forward.8
= control target key start
LH: loop header
LB: loop body
LE: loop exit
PB: predicated region body
PF: predicated region fallthrough
CT: control target
= control target key end

     0   :  { %s4237_s12 = smov 0   ;;  %s4239_s13 = smov 0   ;;  %s5167_s0 = inlined_call_operand.vmem [shape: bf16[8,4096], index: 0, kind: input, shape index: {}]   ;;  %s5168_s1 = inlined_call_operand.vmem [shape: bf16[4096,512], index: 1, kind: input, shape index: {}]   ;;  %s5169_s2 = inlined_call_operand.vmem [shape: f32[1,512], index: 2, kind: input, shape index: {}]   ;;  %s5170_s3 = inlined_call_operand.vmem [shape: f32[8,512], index: 3, kind: output, shape index: {}]  }
   0x1   :  { %s4241_s14 = smov 0   ;;  %s4243_s15 = smov 0  }
   0x2   :  { %s4245_s16 = smov 0   ;;  %s4247_s17 = smov 0  }
   0x3   :  { %s4249_s18 = smov 0  }
   0x4 LB: > { %s25_s19 = sadd.s32 1, %s4206_s16  ;;  %s28_s20 = sadd.s32 1, %s4210_s17  ;;  %s4214_s18 = sphi %s4249_s18, %s13_s18   ;;  %s4210_s17 = sphi %s4247_s17, %s5176_s17   ;;  %s4206_s16 = sphi %s4245_s16, %s5175_s16   ;;  %s4202_s15 = sphi %s4243_s15, %s5174_s15   ;;  %s4198_s14 = sphi %s4241_s14, %s5173_s14   ;;  %s4194_s13 = sphi %s4239_s13, %s5172_s13   ;;  %s4190_s12 = sphi %s4237_s12, %s5171_s12  }
   0x5   : > { %p26_p0 = scmp.ge.s32.totalorder %s25_s19, 2  ;;  %p76_p1 = scmp.ne.s32.totalorder %s4194_s13, %s4190_s12 }
   0x6   : > { %p77_p2 = scmp.eq.s32.totalorder %s4214_s18, 0  ;;  %s69_s24 = sadd.s32 1, %s4194_s13 }
   0x7   : > { %s5178_s19 = smov (%p26_p0, %s25_s19), 0  ;;  %s5180_s20 = smov (!%p26_p0, %s28_s20), %s4210_s17 }
   0x8   : > { %p78_p3 = por %p77_p2, %p76_p1  ;;  %p30_p4 = scmp.ge.s32.totalorder %s5180_s20, 2 }
   0x9   : > { %s64_s21 = ssub.s32 %s4206_s16, %s5178_s19  ;;  %p3413_p6 = scmp.ge.s32.totalorder %s4214_s18, 4 }
   0xa   : > { %s5182_s20 = smov (%p30_p4, %s5180_s20), 0 }
   0xb   : > { %s65_s22 = ssub.s32 %s4210_s17, %s5182_s20  ;;  %156 = sbr.rel (%p3413_p6) target bundleno = 151 (0x97), region = 16 }
   0xc   : > { %s66_s23 = sor.u32 %s65_s22, %s64_s21 }
   0xd   : > { %p67_p5 = scmp.eq.s32.totalorder %s66_s23, 0 }
   0xf   : > { %s4288_s25 = scalar_select %p67_p5, %s4194_s13, %s69_s24  }
  0x10   : > { %172 = sbr.rel (!%p78_p3) target bundleno = 151 (0x97), region = 24  ;;  %s174_s26 = sand.u32 (%p78_p3), 1, %s4194_s13  }
  0x11   : > { %s3416_s27 = sshll.u32 (%p78_p3), %s4210_s17, 1  ;;  %s3414_s28 = sshll.u32 (%p78_p3), %s174_s26, 11 }
  0x12   : > { %s3702_s29 = sshll.u32 (%p78_p3), %s4206_s16, 10  ;;  %s4302_s8 = scalar_lea.vmem (%p78_p3), [#allocation3], %s3414_s28 }
  0x13   : > { %s180_s30 = sadd.s32 (%p78_p3), %s3702_s29, %s3416_s27 }
  0x14   : > { %s3418_s4 = sshll.u32 (%p78_p3), %s180_s30, 2 }
  0x15   : > { %s4297_s7 = scalar_lea.vmem %s5168_s1, %s3418_s4 }
  0x16   : > { %v721_v0 = vld [vmem:[%s4297_s7] sm:$0xff]  ;;  %v723_v1 = vld [vmem:[%s4297_s7 + $0x10] sm:$0xff] }
  0x17   : > { %v725_v2 = vld [vmem:[%s4297_s7 + $0x20] sm:$0xff]  ;;  %722 = vst [vmem:[%s4302_s8] sm:$0xff] %v721_v0  ;;  %724 = vst [vmem:[%s4302_s8 + $0x8] sm:$0xff] %v723_v1  ;;  %v727_v3 = vld [vmem:[%s4297_s7 + $0x30] sm:$0xff] }
  0x18   : > { %726 = vst [vmem:[%s4302_s8 + $0x10] sm:$0xff] %v725_v2  ;;  %v729_v4 = vld [vmem:[%s4297_s7 + $0x40] sm:$0xff]  ;;  %v731_v5 = vld [vmem:[%s4297_s7 + $0x50] sm:$0xff]  ;;  %728 = vst [vmem:[%s4302_s8 + $0x18] sm:$0xff] %v727_v3 }
  0x19   : > { %730 = vst [vmem:[%s4302_s8 + $0x20] sm:$0xff] %v729_v4  ;;  %732 = vst [vmem:[%s4302_s8 + $0x28] sm:$0xff] %v731_v5  ;;  %v733_v6 = vld [vmem:[%s4297_s7 + $0x60] sm:$0xff]  ;;  %v735_v7 = vld [vmem:[%s4297_s7 + $0x70] sm:$0xff] }
  0x1a   : > { %v737_v8 = vld [vmem:[%s4297_s7 + $0x80] sm:$0xff]  ;;  %734 = vst [vmem:[%s4302_s8 + $0x30] sm:$0xff] %v733_v6  ;;  %736 = vst [vmem:[%s4302_s8 + $0x38] sm:$0xff] %v735_v7  ;;  %v739_v9 = vld [vmem:[%s4297_s7 + $0x90] sm:$0xff] }
  0x1b   : > { %738 = vst [vmem:[%s4302_s8 + $0x40] sm:$0xff] %v737_v8  ;;  %v741_v10 = vld [vmem:[%s4297_s7 + $0xa0] sm:$0xff]  ;;  %v743_v11 = vld [vmem:[%s4297_s7 + $0xb0] sm:$0xff]  ;;  %740 = vst [vmem:[%s4302_s8 + $0x48] sm:$0xff] %v739_v9 }
  0x1c   : > { %742 = vst [vmem:[%s4302_s8 + $0x50] sm:$0xff] %v741_v10  ;;  %744 = vst [vmem:[%s4302_s8 + $0x58] sm:$0xff] %v743_v11  ;;  %v745_v12 = vld [vmem:[%s4297_s7 + $0xc0] sm:$0xff]  ;;  %v747_v13 = vld [vmem:[%s4297_s7 + $0xd0] sm:$0xff] }
  0x1d   : > { %v749_v14 = vld [vmem:[%s4297_s7 + $0xe0] sm:$0xff]  ;;  %746 = vst [vmem:[%s4302_s8 + $0x60] sm:$0xff] %v745_v12  ;;  %748 = vst [vmem:[%s4302_s8 + $0x68] sm:$0xff] %v747_v13  ;;  %v751_v15 = vld [vmem:[%s4297_s7 + $0xf0] sm:$0xff] }
  0x1e   : > { %750 = vst [vmem:[%s4302_s8 + $0x70] sm:$0xff] %v749_v14  ;;  %v753_v16 = vld [vmem:[%s4297_s7 + $0x100] sm:$0xff]  ;;  %v755_v17 = vld [vmem:[%s4297_s7 + $0x110] sm:$0xff]  ;;  %752 = vst [vmem:[%s4302_s8 + $0x78] sm:$0xff] %v751_v15 }
  0x1f   : > { %754 = vst [vmem:[%s4302_s8 + $0x80] sm:$0xff] %v753_v16  ;;  %756 = vst [vmem:[%s4302_s8 + $0x88] sm:$0xff] %v755_v17  ;;  %v757_v18 = vld [vmem:[%s4297_s7 + $0x120] sm:$0xff]  ;;  %v759_v19 = vld [vmem:[%s4297_s7 + $0x130] sm:$0xff] }
  0x20   : > { %v761_v20 = vld [vmem:[%s4297_s7 + $0x140] sm:$0xff]  ;;  %758 = vst [vmem:[%s4302_s8 + $0x90] sm:$0xff] %v757_v18  ;;  %760 = vst [vmem:[%s4302_s8 + $0x98] sm:$0xff] %v759_v19  ;;  %v763_v21 = vld [vmem:[%s4297_s7 + $0x150] sm:$0xff] }
  0x21   : > { %762 = vst [vmem:[%s4302_s8 + $0xa0] sm:$0xff] %v761_v20  ;;  %v765_v22 = vld [vmem:[%s4297_s7 + $0x160] sm:$0xff]  ;;  %v767_v23 = vld [vmem:[%s4297_s7 + $0x170] sm:$0xff]  ;;  %764 = vst [vmem:[%s4302_s8 + $0xa8] sm:$0xff] %v763_v21 }
  0x22   : > { %766 = vst [vmem:[%s4302_s8 + $0xb0] sm:$0xff] %v765_v22  ;;  %768 = vst [vmem:[%s4302_s8 + $0xb8] sm:$0xff] %v767_v23  ;;  %v769_v24 = vld [vmem:[%s4297_s7 + $0x180] sm:$0xff]  ;;  %v771_v25 = vld [vmem:[%s4297_s7 + $0x190] sm:$0xff] }
  0x23   : > { %v773_v26 = vld [vmem:[%s4297_s7 + $0x1a0] sm:$0xff]  ;;  %770 = vst [vmem:[%s4302_s8 + $0xc0] sm:$0xff] %v769_v24  ;;  %772 = vst [vmem:[%s4302_s8 + $0xc8] sm:$0xff] %v771_v25  ;;  %v775_v27 = vld [vmem:[%s4297_s7 + $0x1b0] sm:$0xff] }
  0x24   : > { %774 = vst [vmem:[%s4302_s8 + $0xd0] sm:$0xff] %v773_v26  ;;  %v777_v28 = vld [vmem:[%s4297_s7 + $0x1c0] sm:$0xff]  ;;  %v779_v29 = vld [vmem:[%s4297_s7 + $0x1d0] sm:$0xff]  ;;  %776 = vst [vmem:[%s4302_s8 + $0xd8] sm:$0xff] %v775_v27 }
  0x25   : > { %778 = vst [vmem:[%s4302_s8 + $0xe0] sm:$0xff] %v777_v28  ;;  %780 = vst [vmem:[%s4302_s8 + $0xe8] sm:$0xff] %v779_v29  ;;  %v781_v30 = vld [vmem:[%s4297_s7 + $0x1e0] sm:$0xff]  ;;  %v783_v31 = vld [vmem:[%s4297_s7 + $0x1f0] sm:$0xff] }
  0x26   : > { %v785_v32 = vld [vmem:[%s4297_s7 + $0x200] sm:$0xff]  ;;  %782 = vst [vmem:[%s4302_s8 + $0xf0] sm:$0xff] %v781_v30  ;;  %784 = vst [vmem:[%s4302_s8 + $0xf8] sm:$0xff] %v783_v31  ;;  %v787_v33 = vld [vmem:[%s4297_s7 + $0x210] sm:$0xff] }
  0x27   : > { %786 = vst [vmem:[%s4302_s8 + $0x100] sm:$0xff] %v785_v32  ;;  %v789_v34 = vld [vmem:[%s4297_s7 + $0x220] sm:$0xff]  ;;  %v791_v35 = vld [vmem:[%s4297_s7 + $0x230] sm:$0xff]  ;;  %788 = vst [vmem:[%s4302_s8 + $0x108] sm:$0xff] %v787_v33 }
  0x28   : > { %790 = vst [vmem:[%s4302_s8 + $0x110] sm:$0xff] %v789_v34  ;;  %792 = vst [vmem:[%s4302_s8 + $0x118] sm:$0xff] %v791_v35  ;;  %v793_v36 = vld [vmem:[%s4297_s7 + $0x240] sm:$0xff]  ;;  %v795_v37 = vld [vmem:[%s4297_s7 + $0x250] sm:$0xff] }
  0x29   : > { %v797_v38 = vld [vmem:[%s4297_s7 + $0x260] sm:$0xff]  ;;  %794 = vst [vmem:[%s4302_s8 + $0x120] sm:$0xff] %v793_v36  ;;  %796 = vst [vmem:[%s4302_s8 + $0x128] sm:$0xff] %v795_v37  ;;  %v799_v39 = vld [vmem:[%s4297_s7 + $0x270] sm:$0xff] }
  0x2a   : > { %798 = vst [vmem:[%s4302_s8 + $0x130] sm:$0xff] %v797_v38  ;;  %v801_v40 = vld [vmem:[%s4297_s7 + $0x280] sm:$0xff]  ;;  %v803_v41 = vld [vmem:[%s4297_s7 + $0x290] sm:$0xff]  ;;  %800 = vst [vmem:[%s4302_s8 + $0x138] sm:$0xff] %v799_v39 }
  0x2b   : > { %802 = vst [vmem:[%s4302_s8 + $0x140] sm:$0xff] %v801_v40  ;;  %804 = vst [vmem:[%s4302_s8 + $0x148] sm:$0xff] %v803_v41  ;;  %v805_v42 = vld [vmem:[%s4297_s7 + $0x2a0] sm:$0xff]  ;;  %v807_v43 = vld [vmem:[%s4297_s7 + $0x2b0] sm:$0xff] }
  0x2c   : > { %v809_v44 = vld [vmem:[%s4297_s7 + $0x2c0] sm:$0xff]  ;;  %806 = vst [vmem:[%s4302_s8 + $0x150] sm:$0xff] %v805_v42  ;;  %808 = vst [vmem:[%s4302_s8 + $0x158] sm:$0xff] %v807_v43  ;;  %v811_v45 = vld [vmem:[%s4297_s7 + $0x2d0] sm:$0xff] }
  0x2d   : > { %810 = vst [vmem:[%s4302_s8 + $0x160] sm:$0xff] %v809_v44  ;;  %v813_v46 = vld [vmem:[%s4297_s7 + $0x2e0] sm:$0xff]  ;;  %v815_v47 = vld [vmem:[%s4297_s7 + $0x2f0] sm:$0xff]  ;;  %812 = vst [vmem:[%s4302_s8 + $0x168] sm:$0xff] %v811_v45 }
  0x2e   : > { %814 = vst [vmem:[%s4302_s8 + $0x170] sm:$0xff] %v813_v46  ;;  %816 = vst [vmem:[%s4302_s8 + $0x178] sm:$0xff] %v815_v47  ;;  %v817_v48 = vld [vmem:[%s4297_s7 + $0x300] sm:$0xff]  ;;  %v819_v49 = vld [vmem:[%s4297_s7 + $0x310] sm:$0xff] }
  0x2f   : > { %v821_v50 = vld [vmem:[%s4297_s7 + $0x320] sm:$0xff]  ;;  %818 = vst [vmem:[%s4302_s8 + $0x180] sm:$0xff] %v817_v48  ;;  %820 = vst [vmem:[%s4302_s8 + $0x188] sm:$0xff] %v819_v49  ;;  %v823_v51 = vld [vmem:[%s4297_s7 + $0x330] sm:$0xff] }
  0x30   : > { %822 = vst [vmem:[%s4302_s8 + $0x190] sm:$0xff] %v821_v50  ;;  %v825_v52 = vld [vmem:[%s4297_s7 + $0x340] sm:$0xff]  ;;  %v827_v53 = vld [vmem:[%s4297_s7 + $0x350] sm:$0xff]  ;;  %824 = vst [vmem:[%s4302_s8 + $0x198] sm:$0xff] %v823_v51 }
  0x31   : > { %826 = vst [vmem:[%s4302_s8 + $0x1a0] sm:$0xff] %v825_v52  ;;  %828 = vst [vmem:[%s4302_s8 + $0x1a8] sm:$0xff] %v827_v53  ;;  %v829_v54 = vld [vmem:[%s4297_s7 + $0x360] sm:$0xff]  ;;  %v831_v55 = vld [vmem:[%s4297_s7 + $0x370] sm:$0xff] }
  0x32   : > { %v833_v56 = vld [vmem:[%s4297_s7 + $0x380] sm:$0xff]  ;;  %830 = vst [vmem:[%s4302_s8 + $0x1b0] sm:$0xff] %v829_v54  ;;  %832 = vst [vmem:[%s4302_s8 + $0x1b8] sm:$0xff] %v831_v55  ;;  %v835_v57 = vld [vmem:[%s4297_s7 + $0x390] sm:$0xff] }
  0x33   : > { %834 = vst [vmem:[%s4302_s8 + $0x1c0] sm:$0xff] %v833_v56  ;;  %v837_v58 = vld [vmem:[%s4297_s7 + $0x3a0] sm:$0xff]  ;;  %v839_v59 = vld [vmem:[%s4297_s7 + $0x3b0] sm:$0xff]  ;;  %836 = vst [vmem:[%s4302_s8 + $0x1c8] sm:$0xff] %v835_v57 }
  0x34   : > { %838 = vst [vmem:[%s4302_s8 + $0x1d0] sm:$0xff] %v837_v58  ;;  %840 = vst [vmem:[%s4302_s8 + $0x1d8] sm:$0xff] %v839_v59  ;;  %v841_v60 = vld [vmem:[%s4297_s7 + $0x3c0] sm:$0xff]  ;;  %v843_v61 = vld [vmem:[%s4297_s7 + $0x3d0] sm:$0xff] }
  0x35   : > { %v845_v62 = vld [vmem:[%s4297_s7 + $0x3e0] sm:$0xff]  ;;  %842 = vst [vmem:[%s4302_s8 + $0x1e0] sm:$0xff] %v841_v60  ;;  %844 = vst [vmem:[%s4302_s8 + $0x1e8] sm:$0xff] %v843_v61  ;;  %v847_v63 = vld [vmem:[%s4297_s7 + $0x3f0] sm:$0xff] }
  0x36   : > { %846 = vst [vmem:[%s4302_s8 + $0x1f0] sm:$0xff] %v845_v62  ;;  %v849_v0 = vld [vmem:[%s4297_s7 + $0x400] sm:$0xff]  ;;  %v851_v1 = vld [vmem:[%s4297_s7 + $0x410] sm:$0xff]  ;;  %848 = vst [vmem:[%s4302_s8 + $0x1f8] sm:$0xff] %v847_v63 }
  0x37   : > { %850 = vst [vmem:[%s4302_s8 + $0x200] sm:$0xff] %v849_v0  ;;  %852 = vst [vmem:[%s4302_s8 + $0x208] sm:$0xff] %v851_v1  ;;  %v853_v2 = vld [vmem:[%s4297_s7 + $0x420] sm:$0xff]  ;;  %v855_v3 = vld [vmem:[%s4297_s7 + $0x430] sm:$0xff] }
  0x38   : > { %v857_v4 = vld [vmem:[%s4297_s7 + $0x440] sm:$0xff]  ;;  %854 = vst [vmem:[%s4302_s8 + $0x210] sm:$0xff] %v853_v2  ;;  %856 = vst [vmem:[%s4302_s8 + $0x218] sm:$0xff] %v855_v3  ;;  %v859_v5 = vld [vmem:[%s4297_s7 + $0x450] sm:$0xff] }
  0x39   : > { %858 = vst [vmem:[%s4302_s8 + $0x220] sm:$0xff] %v857_v4  ;;  %v861_v6 = vld [vmem:[%s4297_s7 + $0x460] sm:$0xff]  ;;  %v863_v7 = vld [vmem:[%s4297_s7 + $0x470] sm:$0xff]  ;;  %860 = vst [vmem:[%s4302_s8 + $0x228] sm:$0xff] %v859_v5 }
  0x3a   : > { %862 = vst [vmem:[%s4302_s8 + $0x230] sm:$0xff] %v861_v6  ;;  %864 = vst [vmem:[%s4302_s8 + $0x238] sm:$0xff] %v863_v7  ;;  %v865_v8 = vld [vmem:[%s4297_s7 + $0x480] sm:$0xff]  ;;  %v867_v9 = vld [vmem:[%s4297_s7 + $0x490] sm:$0xff] }
  0x3b   : > { %v869_v10 = vld [vmem:[%s4297_s7 + $0x4a0] sm:$0xff]  ;;  %866 = vst [vmem:[%s4302_s8 + $0x240] sm:$0xff] %v865_v8  ;;  %868 = vst [vmem:[%s4302_s8 + $0x248] sm:$0xff] %v867_v9  ;;  %v871_v11 = vld [vmem:[%s4297_s7 + $0x4b0] sm:$0xff] }
  0x3c   : > { %870 = vst [vmem:[%s4302_s8 + $0x250] sm:$0xff] %v869_v10  ;;  %v873_v12 = vld [vmem:[%s4297_s7 + $0x4c0] sm:$0xff]  ;;  %v875_v13 = vld [vmem:[%s4297_s7 + $0x4d0] sm:$0xff]  ;;  %872 = vst [vmem:[%s4302_s8 + $0x258] sm:$0xff] %v871_v11 }
  0x3d   : > { %874 = vst [vmem:[%s4302_s8 + $0x260] sm:$0xff] %v873_v12  ;;  %876 = vst [vmem:[%s4302_s8 + $0x268] sm:$0xff] %v875_v13  ;;  %v877_v14 = vld [vmem:[%s4297_s7 + $0x4e0] sm:$0xff]  ;;  %v879_v15 = vld [vmem:[%s4297_s7 + $0x4f0] sm:$0xff] }
  0x3e   : > { %v881_v16 = vld [vmem:[%s4297_s7 + $0x500] sm:$0xff]  ;;  %878 = vst [vmem:[%s4302_s8 + $0x270] sm:$0xff] %v877_v14  ;;  %880 = vst [vmem:[%s4302_s8 + $0x278] sm:$0xff] %v879_v15  ;;  %v883_v17 = vld [vmem:[%s4297_s7 + $0x510] sm:$0xff] }
  0x3f   : > { %882 = vst [vmem:[%s4302_s8 + $0x280] sm:$0xff] %v881_v16  ;;  %v885_v18 = vld [vmem:[%s4297_s7 + $0x520] sm:$0xff]  ;;  %v887_v19 = vld [vmem:[%s4297_s7 + $0x530] sm:$0xff]  ;;  %884 = vst [vmem:[%s4302_s8 + $0x288] sm:$0xff] %v883_v17 }
  0x40   : > { %886 = vst [vmem:[%s4302_s8 + $0x290] sm:$0xff] %v885_v18  ;;  %888 = vst [vmem:[%s4302_s8 + $0x298] sm:$0xff] %v887_v19  ;;  %v889_v20 = vld [vmem:[%s4297_s7 + $0x540] sm:$0xff]  ;;  %v891_v21 = vld [vmem:[%s4297_s7 + $0x550] sm:$0xff] }
  0x41   : > { %v893_v22 = vld [vmem:[%s4297_s7 + $0x560] sm:$0xff]  ;;  %890 = vst [vmem:[%s4302_s8 + $0x2a0] sm:$0xff] %v889_v20  ;;  %892 = vst [vmem:[%s4302_s8 + $0x2a8] sm:$0xff] %v891_v21  ;;  %v895_v23 = vld [vmem:[%s4297_s7 + $0x570] sm:$0xff] }
  0x42   : > { %894 = vst [vmem:[%s4302_s8 + $0x2b0] sm:$0xff] %v893_v22  ;;  %v897_v24 = vld [vmem:[%s4297_s7 + $0x580] sm:$0xff]  ;;  %v899_v25 = vld [vmem:[%s4297_s7 + $0x590] sm:$0xff]  ;;  %896 = vst [vmem:[%s4302_s8 + $0x2b8] sm:$0xff] %v895_v23 }
  0x43   : > { %898 = vst [vmem:[%s4302_s8 + $0x2c0] sm:$0xff] %v897_v24  ;;  %900 = vst [vmem:[%s4302_s8 + $0x2c8] sm:$0xff] %v899_v25  ;;  %v901_v26 = vld [vmem:[%s4297_s7 + $0x5a0] sm:$0xff]  ;;  %v903_v27 = vld [vmem:[%s4297_s7 + $0x5b0] sm:$0xff] }
  0x44   : > { %v905_v28 = vld [vmem:[%s4297_s7 + $0x5c0] sm:$0xff]  ;;  %902 = vst [vmem:[%s4302_s8 + $0x2d0] sm:$0xff] %v901_v26  ;;  %904 = vst [vmem:[%s4302_s8 + $0x2d8] sm:$0xff] %v903_v27  ;;  %v907_v29 = vld [vmem:[%s4297_s7 + $0x5d0] sm:$0xff] }
  0x45   : > { %906 = vst [vmem:[%s4302_s8 + $0x2e0] sm:$0xff] %v905_v28  ;;  %v909_v30 = vld [vmem:[%s4297_s7 + $0x5e0] sm:$0xff]  ;;  %v911_v31 = vld [vmem:[%s4297_s7 + $0x5f0] sm:$0xff]  ;;  %908 = vst [vmem:[%s4302_s8 + $0x2e8] sm:$0xff] %v907_v29 }
  0x46   : > { %910 = vst [vmem:[%s4302_s8 + $0x2f0] sm:$0xff] %v909_v30  ;;  %912 = vst [vmem:[%s4302_s8 + $0x2f8] sm:$0xff] %v911_v31  ;;  %v913_v32 = vld [vmem:[%s4297_s7 + $0x600] sm:$0xff]  ;;  %v915_v33 = vld [vmem:[%s4297_s7 + $0x610] sm:$0xff] }
  0x47   : > { %v917_v34 = vld [vmem:[%s4297_s7 + $0x620] sm:$0xff]  ;;  %914 = vst [vmem:[%s4302_s8 + $0x300] sm:$0xff] %v913_v32  ;;  %916 = vst [vmem:[%s4302_s8 + $0x308] sm:$0xff] %v915_v33  ;;  %v919_v35 = vld [vmem:[%s4297_s7 + $0x630] sm:$0xff] }
  0x48   : > { %918 = vst [vmem:[%s4302_s8 + $0x310] sm:$0xff] %v917_v34  ;;  %v921_v36 = vld [vmem:[%s4297_s7 + $0x640] sm:$0xff]  ;;  %v923_v37 = vld [vmem:[%s4297_s7 + $0x650] sm:$0xff]  ;;  %920 = vst [vmem:[%s4302_s8 + $0x318] sm:$0xff] %v919_v35 }
  0x49   : > { %922 = vst [vmem:[%s4302_s8 + $0x320] sm:$0xff] %v921_v36  ;;  %924 = vst [vmem:[%s4302_s8 + $0x328] sm:$0xff] %v923_v37  ;;  %v925_v38 = vld [vmem:[%s4297_s7 + $0x660] sm:$0xff]  ;;  %v927_v39 = vld [vmem:[%s4297_s7 + $0x670] sm:$0xff] }
  0x4a   : > { %v929_v40 = vld [vmem:[%s4297_s7 + $0x680] sm:$0xff]  ;;  %926 = vst [vmem:[%s4302_s8 + $0x330] sm:$0xff] %v925_v38  ;;  %928 = vst [vmem:[%s4302_s8 + $0x338] sm:$0xff] %v927_v39  ;;  %v931_v41 = vld [vmem:[%s4297_s7 + $0x690] sm:$0xff] }
  0x4b   : > { %930 = vst [vmem:[%s4302_s8 + $0x340] sm:$0xff] %v929_v40  ;;  %v933_v42 = vld [vmem:[%s4297_s7 + $0x6a0] sm:$0xff]  ;;  %v935_v43 = vld [vmem:[%s4297_s7 + $0x6b0] sm:$0xff]  ;;  %932 = vst [vmem:[%s4302_s8 + $0x348] sm:$0xff] %v931_v41 }
  0x4c   : > { %934 = vst [vmem:[%s4302_s8 + $0x350] sm:$0xff] %v933_v42  ;;  %936 = vst [vmem:[%s4302_s8 + $0x358] sm:$0xff] %v935_v43  ;;  %v937_v44 = vld [vmem:[%s4297_s7 + $0x6c0] sm:$0xff]  ;;  %v939_v45 = vld [vmem:[%s4297_s7 + $0x6d0] sm:$0xff] }
  0x4d   : > { %v941_v46 = vld [vmem:[%s4297_s7 + $0x6e0] sm:$0xff]  ;;  %938 = vst [vmem:[%s4302_s8 + $0x360] sm:$0xff] %v937_v44  ;;  %940 = vst [vmem:[%s4302_s8 + $0x368] sm:$0xff] %v939_v45  ;;  %v943_v47 = vld [vmem:[%s4297_s7 + $0x6f0] sm:$0xff] }
  0x4e   : > { %942 = vst [vmem:[%s4302_s8 + $0x370] sm:$0xff] %v941_v46  ;;  %v945_v48 = vld [vmem:[%s4297_s7 + $0x700] sm:$0xff]  ;;  %v947_v49 = vld [vmem:[%s4297_s7 + $0x710] sm:$0xff]  ;;  %944 = vst [vmem:[%s4302_s8 + $0x378] sm:$0xff] %v943_v47 }
  0x4f   : > { %946 = vst [vmem:[%s4302_s8 + $0x380] sm:$0xff] %v945_v48  ;;  %948 = vst [vmem:[%s4302_s8 + $0x388] sm:$0xff] %v947_v49  ;;  %v949_v50 = vld [vmem:[%s4297_s7 + $0x720] sm:$0xff]  ;;  %v951_v51 = vld [vmem:[%s4297_s7 + $0x730] sm:$0xff] }
  0x50   : > { %v953_v52 = vld [vmem:[%s4297_s7 + $0x740] sm:$0xff]  ;;  %950 = vst [vmem:[%s4302_s8 + $0x390] sm:$0xff] %v949_v50  ;;  %952 = vst [vmem:[%s4302_s8 + $0x398] sm:$0xff] %v951_v51  ;;  %v955_v53 = vld [vmem:[%s4297_s7 + $0x750] sm:$0xff] }
  0x51   : > { %954 = vst [vmem:[%s4302_s8 + $0x3a0] sm:$0xff] %v953_v52  ;;  %v957_v54 = vld [vmem:[%s4297_s7 + $0x760] sm:$0xff]  ;;  %v959_v55 = vld [vmem:[%s4297_s7 + $0x770] sm:$0xff]  ;;  %956 = vst [vmem:[%s4302_s8 + $0x3a8] sm:$0xff] %v955_v53 }
  0x52   : > { %958 = vst [vmem:[%s4302_s8 + $0x3b0] sm:$0xff] %v957_v54  ;;  %960 = vst [vmem:[%s4302_s8 + $0x3b8] sm:$0xff] %v959_v55  ;;  %v961_v56 = vld [vmem:[%s4297_s7 + $0x780] sm:$0xff]  ;;  %v963_v57 = vld [vmem:[%s4297_s7 + $0x790] sm:$0xff] }
  0x53   : > { %v965_v58 = vld [vmem:[%s4297_s7 + $0x7a0] sm:$0xff]  ;;  %962 = vst [vmem:[%s4302_s8 + $0x3c0] sm:$0xff] %v961_v56  ;;  %964 = vst [vmem:[%s4302_s8 + $0x3c8] sm:$0xff] %v963_v57  ;;  %v967_v59 = vld [vmem:[%s4297_s7 + $0x7b0] sm:$0xff] }
  0x54   : > { %966 = vst [vmem:[%s4302_s8 + $0x3d0] sm:$0xff] %v965_v58  ;;  %v969_v60 = vld [vmem:[%s4297_s7 + $0x7c0] sm:$0xff]  ;;  %v971_v61 = vld [vmem:[%s4297_s7 + $0x7d0] sm:$0xff]  ;;  %968 = vst [vmem:[%s4302_s8 + $0x3d8] sm:$0xff] %v967_v59 }
  0x55   : > { %970 = vst [vmem:[%s4302_s8 + $0x3e0] sm:$0xff] %v969_v60  ;;  %972 = vst [vmem:[%s4302_s8 + $0x3e8] sm:$0xff] %v971_v61  ;;  %v973_v62 = vld [vmem:[%s4297_s7 + $0x7e0] sm:$0xff]  ;;  %v975_v63 = vld [vmem:[%s4297_s7 + $0x7f0] sm:$0xff] }
  0x56   : > { %v977_v0 = vld [vmem:[%s4297_s7 + $0x800] sm:$0xff]  ;;  %974 = vst [vmem:[%s4302_s8 + $0x3f0] sm:$0xff] %v973_v62  ;;  %976 = vst [vmem:[%s4302_s8 + $0x3f8] sm:$0xff] %v975_v63  ;;  %v979_v1 = vld [vmem:[%s4297_s7 + $0x810] sm:$0xff] }
  0x57   : > { %978 = vst [vmem:[%s4302_s8 + $0x400] sm:$0xff] %v977_v0  ;;  %v981_v2 = vld [vmem:[%s4297_s7 + $0x820] sm:$0xff]  ;;  %v983_v3 = vld [vmem:[%s4297_s7 + $0x830] sm:$0xff]  ;;  %980 = vst [vmem:[%s4302_s8 + $0x408] sm:$0xff] %v979_v1 }
  0x58   : > { %982 = vst [vmem:[%s4302_s8 + $0x410] sm:$0xff] %v981_v2  ;;  %984 = vst [vmem:[%s4302_s8 + $0x418] sm:$0xff] %v983_v3  ;;  %v985_v4 = vld [vmem:[%s4297_s7 + $0x840] sm:$0xff]  ;;  %v987_v5 = vld [vmem:[%s4297_s7 + $0x850] sm:$0xff] }
  0x59   : > { %v989_v6 = vld [vmem:[%s4297_s7 + $0x860] sm:$0xff]  ;;  %986 = vst [vmem:[%s4302_s8 + $0x420] sm:$0xff] %v985_v4  ;;  %988 = vst [vmem:[%s4302_s8 + $0x428] sm:$0xff] %v987_v5  ;;  %v991_v7 = vld [vmem:[%s4297_s7 + $0x870] sm:$0xff] }
  0x5a   : > { %990 = vst [vmem:[%s4302_s8 + $0x430] sm:$0xff] %v989_v6  ;;  %v993_v8 = vld [vmem:[%s4297_s7 + $0x880] sm:$0xff]  ;;  %v995_v9 = vld [vmem:[%s4297_s7 + $0x890] sm:$0xff]  ;;  %992 = vst [vmem:[%s4302_s8 + $0x438] sm:$0xff] %v991_v7 }
  0x5b   : > { %994 = vst [vmem:[%s4302_s8 + $0x440] sm:$0xff] %v993_v8  ;;  %996 = vst [vmem:[%s4302_s8 + $0x448] sm:$0xff] %v995_v9  ;;  %v997_v10 = vld [vmem:[%s4297_s7 + $0x8a0] sm:$0xff]  ;;  %v999_v11 = vld [vmem:[%s4297_s7 + $0x8b0] sm:$0xff] }
  0x5c   : > { %v1001_v12 = vld [vmem:[%s4297_s7 + $0x8c0] sm:$0xff]  ;;  %998 = vst [vmem:[%s4302_s8 + $0x450] sm:$0xff] %v997_v10  ;;  %1000 = vst [vmem:[%s4302_s8 + $0x458] sm:$0xff] %v999_v11  ;;  %v1003_v13 = vld [vmem:[%s4297_s7 + $0x8d0] sm:$0xff] }
  0x5d   : > { %1002 = vst [vmem:[%s4302_s8 + $0x460] sm:$0xff] %v1001_v12  ;;  %v1005_v14 = vld [vmem:[%s4297_s7 + $0x8e0] sm:$0xff]  ;;  %v1007_v15 = vld [vmem:[%s4297_s7 + $0x8f0] sm:$0xff]  ;;  %1004 = vst [vmem:[%s4302_s8 + $0x468] sm:$0xff] %v1003_v13 }
  0x5e   : > { %1006 = vst [vmem:[%s4302_s8 + $0x470] sm:$0xff] %v1005_v14  ;;  %1008 = vst [vmem:[%s4302_s8 + $0x478] sm:$0xff] %v1007_v15  ;;  %v1009_v16 = vld [vmem:[%s4297_s7 + $0x900] sm:$0xff]  ;;  %v1011_v17 = vld [vmem:[%s4297_s7 + $0x910] sm:$0xff] }
  0x5f   : > { %v1013_v18 = vld [vmem:[%s4297_s7 + $0x920] sm:$0xff]  ;;  %1010 = vst [vmem:[%s4302_s8 + $0x480] sm:$0xff] %v1009_v16  ;;  %1012 = vst [vmem:[%s4302_s8 + $0x488] sm:$0xff] %v1011_v17  ;;  %v1015_v19 = vld [vmem:[%s4297_s7 + $0x930] sm:$0xff] }
  0x60   : > { %1014 = vst [vmem:[%s4302_s8 + $0x490] sm:$0xff] %v1013_v18  ;;  %v1017_v20 = vld [vmem:[%s4297_s7 + $0x940] sm:$0xff]  ;;  %v1019_v21 = vld [vmem:[%s4297_s7 + $0x950] sm:$0xff]  ;;  %1016 = vst [vmem:[%s4302_s8 + $0x498] sm:$0xff] %v1015_v19 }
  0x61   : > { %1018 = vst [vmem:[%s4302_s8 + $0x4a0] sm:$0xff] %v1017_v20  ;;  %1020 = vst [vmem:[%s4302_s8 + $0x4a8] sm:$0xff] %v1019_v21  ;;  %v1021_v22 = vld [vmem:[%s4297_s7 + $0x960] sm:$0xff]  ;;  %v1023_v23 = vld [vmem:[%s4297_s7 + $0x970] sm:$0xff] }
  0x62   : > { %v1025_v24 = vld [vmem:[%s4297_s7 + $0x980] sm:$0xff]  ;;  %1022 = vst [vmem:[%s4302_s8 + $0x4b0] sm:$0xff] %v1021_v22  ;;  %1024 = vst [vmem:[%s4302_s8 + $0x4b8] sm:$0xff] %v1023_v23  ;;  %v1027_v25 = vld [vmem:[%s4297_s7 + $0x990] sm:$0xff] }
  0x63   : > { %1026 = vst [vmem:[%s4302_s8 + $0x4c0] sm:$0xff] %v1025_v24  ;;  %v1029_v26 = vld [vmem:[%s4297_s7 + $0x9a0] sm:$0xff]  ;;  %v1031_v27 = vld [vmem:[%s4297_s7 + $0x9b0] sm:$0xff]  ;;  %1028 = vst [vmem:[%s4302_s8 + $0x4c8] sm:$0xff] %v1027_v25 }
  0x64   : > { %1030 = vst [vmem:[%s4302_s8 + $0x4d0] sm:$0xff] %v1029_v26  ;;  %1032 = vst [vmem:[%s4302_s8 + $0x4d8] sm:$0xff] %v1031_v27  ;;  %v1033_v28 = vld [vmem:[%s4297_s7 + $0x9c0] sm:$0xff]  ;;  %v1035_v29 = vld [vmem:[%s4297_s7 + $0x9d0] sm:$0xff] }
  0x65   : > { %v1037_v30 = vld [vmem:[%s4297_s7 + $0x9e0] sm:$0xff]  ;;  %1034 = vst [vmem:[%s4302_s8 + $0x4e0] sm:$0xff] %v1033_v28  ;;  %1036 = vst [vmem:[%s4302_s8 + $0x4e8] sm:$0xff] %v1035_v29  ;;  %v1039_v31 = vld [vmem:[%s4297_s7 + $0x9f0] sm:$0xff] }
  0x66   : > { %1038 = vst [vmem:[%s4302_s8 + $0x4f0] sm:$0xff] %v1037_v30  ;;  %v1041_v32 = vld [vmem:[%s4297_s7 + $0xa00] sm:$0xff]  ;;  %v1043_v33 = vld [vmem:[%s4297_s7 + $0xa10] sm:$0xff]  ;;  %1040 = vst [vmem:[%s4302_s8 + $0x4f8] sm:$0xff] %v1039_v31 }
  0x67   : > { %1042 = vst [vmem:[%s4302_s8 + $0x500] sm:$0xff] %v1041_v32  ;;  %1044 = vst [vmem:[%s4302_s8 + $0x508] sm:$0xff] %v1043_v33  ;;  %v1045_v34 = vld [vmem:[%s4297_s7 + $0xa20] sm:$0xff]  ;;  %v1047_v35 = vld [vmem:[%s4297_s7 + $0xa30] sm:$0xff] }
  0x68   : > { %v1049_v36 = vld [vmem:[%s4297_s7 + $0xa40] sm:$0xff]  ;;  %1046 = vst [vmem:[%s4302_s8 + $0x510] sm:$0xff] %v1045_v34  ;;  %1048 = vst [vmem:[%s4302_s8 + $0x518] sm:$0xff] %v1047_v35  ;;  %v1051_v37 = vld [vmem:[%s4297_s7 + $0xa50] sm:$0xff] }
  0x69   : > { %1050 = vst [vmem:[%s4302_s8 + $0x520] sm:$0xff] %v1049_v36  ;;  %v1053_v38 = vld [vmem:[%s4297_s7 + $0xa60] sm:$0xff]  ;;  %v1055_v39 = vld [vmem:[%s4297_s7 + $0xa70] sm:$0xff]  ;;  %1052 = vst [vmem:[%s4302_s8 + $0x528] sm:$0xff] %v1051_v37 }
  0x6a   : > { %1054 = vst [vmem:[%s4302_s8 + $0x530] sm:$0xff] %v1053_v38  ;;  %1056 = vst [vmem:[%s4302_s8 + $0x538] sm:$0xff] %v1055_v39  ;;  %v1057_v40 = vld [vmem:[%s4297_s7 + $0xa80] sm:$0xff]  ;;  %v1059_v41 = vld [vmem:[%s4297_s7 + $0xa90] sm:$0xff] }
  0x6b   : > { %v1061_v42 = vld [vmem:[%s4297_s7 + $0xaa0] sm:$0xff]  ;;  %1058 = vst [vmem:[%s4302_s8 + $0x540] sm:$0xff] %v1057_v40  ;;  %1060 = vst [vmem:[%s4302_s8 + $0x548] sm:$0xff] %v1059_v41  ;;  %v1063_v43 = vld [vmem:[%s4297_s7 + $0xab0] sm:$0xff] }
  0x6c   : > { %1062 = vst [vmem:[%s4302_s8 + $0x550] sm:$0xff] %v1061_v42  ;;  %v1065_v44 = vld [vmem:[%s4297_s7 + $0xac0] sm:$0xff]  ;;  %v1067_v45 = vld [vmem:[%s4297_s7 + $0xad0] sm:$0xff]  ;;  %1064 = vst [vmem:[%s4302_s8 + $0x558] sm:$0xff] %v1063_v43 }
  0x6d   : > { %1066 = vst [vmem:[%s4302_s8 + $0x560] sm:$0xff] %v1065_v44  ;;  %1068 = vst [vmem:[%s4302_s8 + $0x568] sm:$0xff] %v1067_v45  ;;  %v1069_v46 = vld [vmem:[%s4297_s7 + $0xae0] sm:$0xff]  ;;  %v1071_v47 = vld [vmem:[%s4297_s7 + $0xaf0] sm:$0xff] }
  0x6e   : > { %v1073_v48 = vld [vmem:[%s4297_s7 + $0xb00] sm:$0xff]  ;;  %1070 = vst [vmem:[%s4302_s8 + $0x570] sm:$0xff] %v1069_v46  ;;  %1072 = vst [vmem:[%s4302_s8 + $0x578] sm:$0xff] %v1071_v47  ;;  %v1075_v49 = vld [vmem:[%s4297_s7 + $0xb10] sm:$0xff] }
  0x6f   : > { %1074 = vst [vmem:[%s4302_s8 + $0x580] sm:$0xff] %v1073_v48  ;;  %v1077_v50 = vld [vmem:[%s4297_s7 + $0xb20] sm:$0xff]  ;;  %v1079_v51 = vld [vmem:[%s4297_s7 + $0xb30] sm:$0xff]  ;;  %1076 = vst [vmem:[%s4302_s8 + $0x588] sm:$0xff] %v1075_v49 }
  0x70   : > { %1078 = vst [vmem:[%s4302_s8 + $0x590] sm:$0xff] %v1077_v50  ;;  %1080 = vst [vmem:[%s4302_s8 + $0x598] sm:$0xff] %v1079_v51  ;;  %v1081_v52 = vld [vmem:[%s4297_s7 + $0xb40] sm:$0xff]  ;;  %v1083_v53 = vld [vmem:[%s4297_s7 + $0xb50] sm:$0xff] }
  0x71   : > { %v1085_v54 = vld [vmem:[%s4297_s7 + $0xb60] sm:$0xff]  ;;  %1082 = vst [vmem:[%s4302_s8 + $0x5a0] sm:$0xff] %v1081_v52  ;;  %1084 = vst [vmem:[%s4302_s8 + $0x5a8] sm:$0xff] %v1083_v53  ;;  %v1087_v55 = vld [vmem:[%s4297_s7 + $0xb70] sm:$0xff] }
  0x72   : > { %1086 = vst [vmem:[%s4302_s8 + $0x5b0] sm:$0xff] %v1085_v54  ;;  %v1089_v56 = vld [vmem:[%s4297_s7 + $0xb80] sm:$0xff]  ;;  %v1091_v57 = vld [vmem:[%s4297_s7 + $0xb90] sm:$0xff]  ;;  %1088 = vst [vmem:[%s4302_s8 + $0x5b8] sm:$0xff] %v1087_v55 }
  0x73   : > { %1090 = vst [vmem:[%s4302_s8 + $0x5c0] sm:$0xff] %v1089_v56  ;;  %1092 = vst [vmem:[%s4302_s8 + $0x5c8] sm:$0xff] %v1091_v57  ;;  %v1093_v58 = vld [vmem:[%s4297_s7 + $0xba0] sm:$0xff]  ;;  %v1095_v59 = vld [vmem:[%s4297_s7 + $0xbb0] sm:$0xff] }
  0x74   : > { %v1097_v60 = vld [vmem:[%s4297_s7 + $0xbc0] sm:$0xff]  ;;  %1094 = vst [vmem:[%s4302_s8 + $0x5d0] sm:$0xff] %v1093_v58  ;;  %1096 = vst [vmem:[%s4302_s8 + $0x5d8] sm:$0xff] %v1095_v59  ;;  %v1099_v61 = vld [vmem:[%s4297_s7 + $0xbd0] sm:$0xff] }
  0x75   : > { %1098 = vst [vmem:[%s4302_s8 + $0x5e0] sm:$0xff] %v1097_v60  ;;  %v1101_v62 = vld [vmem:[%s4297_s7 + $0xbe0] sm:$0xff]  ;;  %v1103_v63 = vld [vmem:[%s4297_s7 + $0xbf0] sm:$0xff]  ;;  %1100 = vst [vmem:[%s4302_s8 + $0x5e8] sm:$0xff] %v1099_v61 }
  0x76   : > { %1102 = vst [vmem:[%s4302_s8 + $0x5f0] sm:$0xff] %v1101_v62  ;;  %1104 = vst [vmem:[%s4302_s8 + $0x5f8] sm:$0xff] %v1103_v63  ;;  %v1105_v0 = vld [vmem:[%s4297_s7 + $0xc00] sm:$0xff]  ;;  %v1107_v1 = vld [vmem:[%s4297_s7 + $0xc10] sm:$0xff] }
  0x77   : > { %v1109_v2 = vld [vmem:[%s4297_s7 + $0xc20] sm:$0xff]  ;;  %1106 = vst [vmem:[%s4302_s8 + $0x600] sm:$0xff] %v1105_v0  ;;  %1108 = vst [vmem:[%s4302_s8 + $0x608] sm:$0xff] %v1107_v1  ;;  %v1111_v3 = vld [vmem:[%s4297_s7 + $0xc30] sm:$0xff] }
  0x78   : > { %1110 = vst [vmem:[%s4302_s8 + $0x610] sm:$0xff] %v1109_v2  ;;  %v1113_v4 = vld [vmem:[%s4297_s7 + $0xc40] sm:$0xff]  ;;  %v1115_v5 = vld [vmem:[%s4297_s7 + $0xc50] sm:$0xff]  ;;  %1112 = vst [vmem:[%s4302_s8 + $0x618] sm:$0xff] %v1111_v3 }
  0x79   : > { %1114 = vst [vmem:[%s4302_s8 + $0x620] sm:$0xff] %v1113_v4  ;;  %1116 = vst [vmem:[%s4302_s8 + $0x628] sm:$0xff] %v1115_v5  ;;  %v1117_v6 = vld [vmem:[%s4297_s7 + $0xc60] sm:$0xff]  ;;  %v1119_v7 = vld [vmem:[%s4297_s7 + $0xc70] sm:$0xff] }
  0x7a   : > { %v1121_v8 = vld [vmem:[%s4297_s7 + $0xc80] sm:$0xff]  ;;  %1118 = vst [vmem:[%s4302_s8 + $0x630] sm:$0xff] %v1117_v6  ;;  %1120 = vst [vmem:[%s4302_s8 + $0x638] sm:$0xff] %v1119_v7  ;;  %v1123_v9 = vld [vmem:[%s4297_s7 + $0xc90] sm:$0xff] }
  0x7b   : > { %1122 = vst [vmem:[%s4302_s8 + $0x640] sm:$0xff] %v1121_v8  ;;  %v1125_v10 = vld [vmem:[%s4297_s7 + $0xca0] sm:$0xff]  ;;  %v1127_v11 = vld [vmem:[%s4297_s7 + $0xcb0] sm:$0xff]  ;;  %1124 = vst [vmem:[%s4302_s8 + $0x648] sm:$0xff] %v1123_v9 }
  0x7c   : > { %1126 = vst [vmem:[%s4302_s8 + $0x650] sm:$0xff] %v1125_v10  ;;  %1128 = vst [vmem:[%s4302_s8 + $0x658] sm:$0xff] %v1127_v11  ;;  %v1129_v12 = vld [vmem:[%s4297_s7 + $0xcc0] sm:$0xff]  ;;  %v1131_v13 = vld [vmem:[%s4297_s7 + $0xcd0] sm:$0xff] }
  0x7d   : > { %v1133_v14 = vld [vmem:[%s4297_s7 + $0xce0] sm:$0xff]  ;;  %1130 = vst [vmem:[%s4302_s8 + $0x660] sm:$0xff] %v1129_v12  ;;  %1132 = vst [vmem:[%s4302_s8 + $0x668] sm:$0xff] %v1131_v13  ;;  %v1135_v15 = vld [vmem:[%s4297_s7 + $0xcf0] sm:$0xff] }
  0x7e   : > { %1134 = vst [vmem:[%s4302_s8 + $0x670] sm:$0xff] %v1133_v14  ;;  %v1137_v16 = vld [vmem:[%s4297_s7 + $0xd00] sm:$0xff]  ;;  %v1139_v17 = vld [vmem:[%s4297_s7 + $0xd10] sm:$0xff]  ;;  %1136 = vst [vmem:[%s4302_s8 + $0x678] sm:$0xff] %v1135_v15 }
  0x7f   : > { %1138 = vst [vmem:[%s4302_s8 + $0x680] sm:$0xff] %v1137_v16  ;;  %1140 = vst [vmem:[%s4302_s8 + $0x688] sm:$0xff] %v1139_v17  ;;  %v1141_v18 = vld [vmem:[%s4297_s7 + $0xd20] sm:$0xff]  ;;  %v1143_v19 = vld [vmem:[%s4297_s7 + $0xd30] sm:$0xff] }
  0x80   : > { %v1145_v20 = vld [vmem:[%s4297_s7 + $0xd40] sm:$0xff]  ;;  %1142 = vst [vmem:[%s4302_s8 + $0x690] sm:$0xff] %v1141_v18  ;;  %1144 = vst [vmem:[%s4302_s8 + $0x698] sm:$0xff] %v1143_v19  ;;  %v1147_v21 = vld [vmem:[%s4297_s7 + $0xd50] sm:$0xff] }
  0x81   : > { %1146 = vst [vmem:[%s4302_s8 + $0x6a0] sm:$0xff] %v1145_v20  ;;  %v1149_v22 = vld [vmem:[%s4297_s7 + $0xd60] sm:$0xff]  ;;  %v1151_v23 = vld [vmem:[%s4297_s7 + $0xd70] sm:$0xff]  ;;  %1148 = vst [vmem:[%s4302_s8 + $0x6a8] sm:$0xff] %v1147_v21 }
  0x82   : > { %1150 = vst [vmem:[%s4302_s8 + $0x6b0] sm:$0xff] %v1149_v22  ;;  %1152 = vst [vmem:[%s4302_s8 + $0x6b8] sm:$0xff] %v1151_v23  ;;  %v1153_v24 = vld [vmem:[%s4297_s7 + $0xd80] sm:$0xff]  ;;  %v1155_v25 = vld [vmem:[%s4297_s7 + $0xd90] sm:$0xff] }
  0x83   : > { %v1157_v26 = vld [vmem:[%s4297_s7 + $0xda0] sm:$0xff]  ;;  %1154 = vst [vmem:[%s4302_s8 + $0x6c0] sm:$0xff] %v1153_v24  ;;  %1156 = vst [vmem:[%s4302_s8 + $0x6c8] sm:$0xff] %v1155_v25  ;;  %v1159_v27 = vld [vmem:[%s4297_s7 + $0xdb0] sm:$0xff] }
  0x84   : > { %1158 = vst [vmem:[%s4302_s8 + $0x6d0] sm:$0xff] %v1157_v26  ;;  %v1161_v28 = vld [vmem:[%s4297_s7 + $0xdc0] sm:$0xff]  ;;  %v1163_v29 = vld [vmem:[%s4297_s7 + $0xdd0] sm:$0xff]  ;;  %1160 = vst [vmem:[%s4302_s8 + $0x6d8] sm:$0xff] %v1159_v27 }
  0x85   : > { %1162 = vst [vmem:[%s4302_s8 + $0x6e0] sm:$0xff] %v1161_v28  ;;  %1164 = vst [vmem:[%s4302_s8 + $0x6e8] sm:$0xff] %v1163_v29  ;;  %v1165_v30 = vld [vmem:[%s4297_s7 + $0xde0] sm:$0xff]  ;;  %v1167_v31 = vld [vmem:[%s4297_s7 + $0xdf0] sm:$0xff] }
  0x86   : > { %v1169_v32 = vld [vmem:[%s4297_s7 + $0xe00] sm:$0xff]  ;;  %1166 = vst [vmem:[%s4302_s8 + $0x6f0] sm:$0xff] %v1165_v30  ;;  %1168 = vst [vmem:[%s4302_s8 + $0x6f8] sm:$0xff] %v1167_v31  ;;  %v1171_v33 = vld [vmem:[%s4297_s7 + $0xe10] sm:$0xff] }
  0x87   : > { %1170 = vst [vmem:[%s4302_s8 + $0x700] sm:$0xff] %v1169_v32  ;;  %v1173_v34 = vld [vmem:[%s4297_s7 + $0xe20] sm:$0xff]  ;;  %v1175_v35 = vld [vmem:[%s4297_s7 + $0xe30] sm:$0xff]  ;;  %1172 = vst [vmem:[%s4302_s8 + $0x708] sm:$0xff] %v1171_v33 }
  0x88   : > { %1174 = vst [vmem:[%s4302_s8 + $0x710] sm:$0xff] %v1173_v34  ;;  %1176 = vst [vmem:[%s4302_s8 + $0x718] sm:$0xff] %v1175_v35  ;;  %v1177_v36 = vld [vmem:[%s4297_s7 + $0xe40] sm:$0xff]  ;;  %v1179_v37 = vld [vmem:[%s4297_s7 + $0xe50] sm:$0xff] }
  0x89   : > { %v1181_v38 = vld [vmem:[%s4297_s7 + $0xe60] sm:$0xff]  ;;  %1178 = vst [vmem:[%s4302_s8 + $0x720] sm:$0xff] %v1177_v36  ;;  %1180 = vst [vmem:[%s4302_s8 + $0x728] sm:$0xff] %v1179_v37  ;;  %v1183_v39 = vld [vmem:[%s4297_s7 + $0xe70] sm:$0xff] }
  0x8a   : > { %1182 = vst [vmem:[%s4302_s8 + $0x730] sm:$0xff] %v1181_v38  ;;  %v1185_v40 = vld [vmem:[%s4297_s7 + $0xe80] sm:$0xff]  ;;  %v1187_v41 = vld [vmem:[%s4297_s7 + $0xe90] sm:$0xff]  ;;  %1184 = vst [vmem:[%s4302_s8 + $0x738] sm:$0xff] %v1183_v39 }
  0x8b   : > { %1186 = vst [vmem:[%s4302_s8 + $0x740] sm:$0xff] %v1185_v40  ;;  %1188 = vst [vmem:[%s4302_s8 + $0x748] sm:$0xff] %v1187_v41  ;;  %v1189_v42 = vld [vmem:[%s4297_s7 + $0xea0] sm:$0xff]  ;;  %v1191_v43 = vld [vmem:[%s4297_s7 + $0xeb0] sm:$0xff] }
  0x8c   : > { %v1193_v44 = vld [vmem:[%s4297_s7 + $0xec0] sm:$0xff]  ;;  %1190 = vst [vmem:[%s4302_s8 + $0x750] sm:$0xff] %v1189_v42  ;;  %1192 = vst [vmem:[%s4302_s8 + $0x758] sm:$0xff] %v1191_v43  ;;  %v1195_v45 = vld [vmem:[%s4297_s7 + $0xed0] sm:$0xff] }
  0x8d   : > { %1194 = vst [vmem:[%s4302_s8 + $0x760] sm:$0xff] %v1193_v44  ;;  %v1197_v46 = vld [vmem:[%s4297_s7 + $0xee0] sm:$0xff]  ;;  %v1199_v47 = vld [vmem:[%s4297_s7 + $0xef0] sm:$0xff]  ;;  %1196 = vst [vmem:[%s4302_s8 + $0x768] sm:$0xff] %v1195_v45 }
  0x8e   : > { %1198 = vst [vmem:[%s4302_s8 + $0x770] sm:$0xff] %v1197_v46  ;;  %1200 = vst [vmem:[%s4302_s8 + $0x778] sm:$0xff] %v1199_v47  ;;  %v1201_v48 = vld [vmem:[%s4297_s7 + $0xf00] sm:$0xff]  ;;  %v1203_v49 = vld [vmem:[%s4297_s7 + $0xf10] sm:$0xff] }
  0x8f   : > { %v1205_v50 = vld [vmem:[%s4297_s7 + $0xf20] sm:$0xff]  ;;  %1202 = vst [vmem:[%s4302_s8 + $0x780] sm:$0xff] %v1201_v48  ;;  %1204 = vst [vmem:[%s4302_s8 + $0x788] sm:$0xff] %v1203_v49  ;;  %v1207_v51 = vld [vmem:[%s4297_s7 + $0xf30] sm:$0xff] }
  0x90   : > { %1206 = vst [vmem:[%s4302_s8 + $0x790] sm:$0xff] %v1205_v50  ;;  %v1209_v52 = vld [vmem:[%s4297_s7 + $0xf40] sm:$0xff]  ;;  %v1211_v53 = vld [vmem:[%s4297_s7 + $0xf50] sm:$0xff]  ;;  %1208 = vst [vmem:[%s4302_s8 + $0x798] sm:$0xff] %v1207_v51 }
  0x91   : > { %1210 = vst [vmem:[%s4302_s8 + $0x7a0] sm:$0xff] %v1209_v52  ;;  %1212 = vst [vmem:[%s4302_s8 + $0x7a8] sm:$0xff] %v1211_v53  ;;  %v1213_v54 = vld [vmem:[%s4297_s7 + $0xf60] sm:$0xff]  ;;  %v1215_v55 = vld [vmem:[%s4297_s7 + $0xf70] sm:$0xff] }
  0x92   : > { %v1217_v56 = vld [vmem:[%s4297_s7 + $0xf80] sm:$0xff]  ;;  %1214 = vst [vmem:[%s4302_s8 + $0x7b0] sm:$0xff] %v1213_v54  ;;  %1216 = vst [vmem:[%s4302_s8 + $0x7b8] sm:$0xff] %v1215_v55  ;;  %v1219_v57 = vld [vmem:[%s4297_s7 + $0xf90] sm:$0xff] }
  0x93   : > { %1218 = vst [vmem:[%s4302_s8 + $0x7c0] sm:$0xff] %v1217_v56  ;;  %v1221_v58 = vld [vmem:[%s4297_s7 + $0xfa0] sm:$0xff]  ;;  %v1223_v59 = vld [vmem:[%s4297_s7 + $0xfb0] sm:$0xff]  ;;  %1220 = vst [vmem:[%s4302_s8 + $0x7c8] sm:$0xff] %v1219_v57 }
  0x94   : > { %1222 = vst [vmem:[%s4302_s8 + $0x7d0] sm:$0xff] %v1221_v58  ;;  %1224 = vst [vmem:[%s4302_s8 + $0x7d8] sm:$0xff] %v1223_v59  ;;  %v1225_v60 = vld [vmem:[%s4297_s7 + $0xfc0] sm:$0xff]  ;;  %v1227_v61 = vld [vmem:[%s4297_s7 + $0xfd0] sm:$0xff] }
  0x95   : > { %v1229_v62 = vld [vmem:[%s4297_s7 + $0xfe0] sm:$0xff]  ;;  %1226 = vst [vmem:[%s4302_s8 + $0x7e0] sm:$0xff] %v1225_v60  ;;  %1228 = vst [vmem:[%s4302_s8 + $0x7e8] sm:$0xff] %v1227_v61  ;;  %v1231_v63 = vld [vmem:[%s4297_s7 + $0xff0] sm:$0xff] }
  0x96   : > { %1230 = vst [vmem:[%s4302_s8 + $0x7f0] sm:$0xff] %v1229_v62  ;;  %1232 = vst [vmem:[%s4302_s8 + $0x7f8] sm:$0xff] %v1231_v63 }
  0x97 PF: > { %p3419_p7 = scmp.ge.s32.totalorder %s4214_s18, 1  ;;  %p1245_p8 = scmp.lt.s32.totalorder %s4214_s18, 5 }
  0x99   : > { %p1246_p9 = pnand %p3419_p7, %p1245_p8 }
  0x9a   : > { %s1252_s9 = sand.u32 (!%p1246_p9), 1, %s4190_s12   ;;  %s3421_s10 = sshll.u32 (!%p1246_p9), %s4198_s14, 4 }
  0x9b   : > { %1249 = sbr.rel (%p1246_p9) target bundleno = 643 (0x283), region = 66  ;;  %s3420_s11 = sshll.u32 (!%p1246_p9), %s1252_s9, 11 }
  0x9c   : > { %p1295_p10 = scmp.lt.s32.totalorder (!%p1246_p9), %s3421_s10, 31  ;;  %s3423_s21 = sshll.u32 (!%p1246_p9), %s4202_s15, 1 }
  0x9d   : > { %p1305_p11 = scmp.lt.s32.totalorder (!%p1246_p9), %s3423_s21, 3  ;;  %s4835_s5 = scalar_lea.vmem (!%p1246_p9), [#allocation3], %s3420_s11 }
  0x9e   : > { %p3426_p12 = scmp.ne.s32.totalorder (!%p1246_p9), %s4198_s14, 0 }
  0xa0   : > { %s5184_s10 = smov (!%p1295_p10, %s3421_s10), 31  ;;  %s5186_s21 = smov (!%p1305_p11, %s3423_s21), 3 }
  0xa1   : > { %s3422_s22 = sshll.u32 %s5184_s10, 2  ;;  %s1307_s12 = scalar_lea.vmem %s5169_s2, %s5186_s21 }
  0xa2   : > { %s4821_s26 = scalar_lea.vmem %s5167_s0, %s3422_s22  ;;  %s3425_s29 = sshll.u32 %s5186_s21, 3 }
  0xa3   : > { %s4833_s15 = scalar_lea.vmem %s5170_s3, %s3425_s29  ;;  %1322 = sbr.rel (%p3426_p12) target bundleno = 170 (0xaa), region = 74 }
  0xa8   : > { %v4216_v0 = vmov 0.0  }
  0xa9   : > { %1323 = vst [vmem:[#allocation2] sm:$0xff] %v4216_v0  ;;  %1324 = vst [vmem:[#allocation2 + $0x8] sm:$0xff] %v4216_v0 }
  0xaa PF: > { %v3760_v1 = vld [vmem:[%s4835_s5 + $0x74] ss:$8 sps:$4 sm:$0xff]   ;;  %v3764_v3 = vld [vmem:[%s4835_s5 + $0x70] ss:$8 sps:$4 sm:$0xff]   ;;  %v3766_v5 = vld [vmem:[%s4835_s5 + $0x64] ss:$8 sps:$4 sm:$0xff]  }
  0xab   : > { %v3762_v2 = vld [vmem:[%s4835_s5 + $0x174] ss:$8 sps:$4 sm:$0xff]   ;;  %2927 = vmatprep.subr.bf16.mxu0 %v3760_v1  ;;  %v3765_v4 = vld [vmem:[%s4835_s5 + $0x170] ss:$8 sps:$4 sm:$0xff]   ;;  %v3768_v6 = vld [vmem:[%s4835_s5 + $0x164] ss:$8 sps:$4 sm:$0xff]  }
  0xac   : > { %2968 = vmatprep.subr.bf16.mxu1 %v3762_v2  ;;  %2928 = vmatpush1.bf16.msra.mxu0 %v3764_v3  ;;  %v3770_v7 = vld [vmem:[%s4835_s5 + $0x60] ss:$8 sps:$4 sm:$0xff]   ;;  %v3772_v9 = vld [vmem:[%s4835_s5 + $0x54] ss:$8 sps:$4 sm:$0xff]   ;;  %v3776_v11 = vld [vmem:[%s4835_s5 + $0x50] ss:$8 sps:$4 sm:$0xff]  }
  0xad   : > { %2969 = vmatpush1.bf16.msra.mxu1 %v3765_v4  ;;  %2929 = vmatprep.subr.bf16.mxu0 %v3766_v5  ;;  %v3771_v8 = vld [vmem:[%s4835_s5 + $0x160] ss:$8 sps:$4 sm:$0xff]   ;;  %v3774_v10 = vld [vmem:[%s4835_s5 + $0x154] ss:$8 sps:$4 sm:$0xff]   ;;  %v3777_v12 = vld [vmem:[%s4835_s5 + $0x150] ss:$8 sps:$4 sm:$0xff]  }
  0xae   : > { %2970 = vmatprep.subr.bf16.mxu1 %v3768_v6  ;;  %v3778_v13 = vld [vmem:[%s4835_s5 + $0x44] ss:$8 sps:$4 sm:$0xff]   ;;  %v3782_v15 = vld [vmem:[%s4835_s5 + $0x40] ss:$8 sps:$4 sm:$0xff]   ;;  %v3784_v17 = vld [vmem:[%s4835_s5 + $0x34] ss:$8 sps:$4 sm:$0xff]  }
  0xaf   : > { %v3780_v14 = vld [vmem:[%s4835_s5 + $0x144] ss:$8 sps:$4 sm:$0xff]   ;;  %v3783_v16 = vld [vmem:[%s4835_s5 + $0x140] ss:$8 sps:$4 sm:$0xff]   ;;  %v3786_v18 = vld [vmem:[%s4835_s5 + $0x134] ss:$8 sps:$4 sm:$0xff]  }
  0xb0   : > { %2930 = vmatpush1.bf16.msra.mxu0 %v3770_v7  ;;  %v3788_v19 = vld [vmem:[%s4835_s5 + $0x30] ss:$8 sps:$4 sm:$0xff]   ;;  %v3790_v21 = vld [vmem:[%s4835_s5 + $0x24] ss:$8 sps:$4 sm:$0xff]   ;;  %v3794_v23 = vld [vmem:[%s4835_s5 + $0x20] ss:$8 sps:$4 sm:$0xff]  }
  0xb1   : > { %2971 = vmatpush1.bf16.msra.mxu1 %v3771_v8  ;;  %2931 = vmatprep.subr.bf16.mxu0 %v3772_v9  ;;  %v3789_v20 = vld [vmem:[%s4835_s5 + $0x130] ss:$8 sps:$4 sm:$0xff]   ;;  %v3792_v22 = vld [vmem:[%s4835_s5 + $0x124] ss:$8 sps:$4 sm:$0xff]   ;;  %v3795_v24 = vld [vmem:[%s4835_s5 + $0x120] ss:$8 sps:$4 sm:$0xff]  }
  0xb2   : > { %2972 = vmatprep.subr.bf16.mxu1 %v3774_v10  ;;  %v3796_v25 = vld [vmem:[%s4835_s5 + $0x14] ss:$8 sps:$4 sm:$0xff]   ;;  %v3800_v27 = vld [vmem:[%s4835_s5 + $0x10] ss:$8 sps:$4 sm:$0xff]   ;;  %v3802_v29 = vld [vmem:[%s4835_s5 + $0x4] ss:$8 sps:$4 sm:$0xff]  }
  0xb3   : > { %v3798_v26 = vld [vmem:[%s4835_s5 + $0x114] ss:$8 sps:$4 sm:$0xff]   ;;  %v3801_v28 = vld [vmem:[%s4835_s5 + $0x110] ss:$8 sps:$4 sm:$0xff]   ;;  %v3804_v30 = vld [vmem:[%s4835_s5 + $0x104] ss:$8 sps:$4 sm:$0xff]  }
  0xb4   : > { %2932 = vmatpush1.bf16.msra.mxu0 %v3776_v11  ;;  %v3806_v31 = vld [vmem:[%s4835_s5] ss:$8 sps:$4 sm:$0xff]   ;;  %v3808_v33 = vld [vmem:[%s4835_s5 + $0xf4] ss:$8 sps:$4 sm:$0xff]   ;;  %v3812_v35 = vld [vmem:[%s4835_s5 + $0xf0] ss:$8 sps:$4 sm:$0xff]  }
  0xb5   : > { %2973 = vmatpush1.bf16.msra.mxu1 %v3777_v12  ;;  %2933 = vmatprep.subr.bf16.mxu0 %v3778_v13  ;;  %v3807_v32 = vld [vmem:[%s4835_s5 + $0x100] ss:$8 sps:$4 sm:$0xff]   ;;  %v3810_v34 = vld [vmem:[%s4835_s5 + $0x1f4] ss:$8 sps:$4 sm:$0xff]   ;;  %v3813_v36 = vld [vmem:[%s4835_s5 + $0x1f0] ss:$8 sps:$4 sm:$0xff]  }
  0xb6   : > { %2974 = vmatprep.subr.bf16.mxu1 %v3780_v14  ;;  %v3814_v37 = vld [vmem:[%s4835_s5 + $0xe4] ss:$8 sps:$4 sm:$0xff]   ;;  %v3818_v39 = vld [vmem:[%s4835_s5 + $0xe0] ss:$8 sps:$4 sm:$0xff]   ;;  %v3820_v41 = vld [vmem:[%s4835_s5 + $0xd4] ss:$8 sps:$4 sm:$0xff]  }
  0xb7   : > { %v3816_v38 = vld [vmem:[%s4835_s5 + $0x1e4] ss:$8 sps:$4 sm:$0xff]   ;;  %v3819_v40 = vld [vmem:[%s4835_s5 + $0x1e0] ss:$8 sps:$4 sm:$0xff]   ;;  %v3822_v42 = vld [vmem:[%s4835_s5 + $0x1d4] ss:$8 sps:$4 sm:$0xff]  }
  0xb8   : > { %2934 = vmatpush1.bf16.msra.mxu0 %v3782_v15  ;;  %v3824_v43 = vld [vmem:[%s4835_s5 + $0xd0] ss:$8 sps:$4 sm:$0xff]   ;;  %v3826_v45 = vld [vmem:[%s4835_s5 + $0xc4] ss:$8 sps:$4 sm:$0xff]   ;;  %v3830_v50 = vld [vmem:[%s4835_s5 + $0xc0] ss:$8 sps:$4 sm:$0xff]  }
  0xb9   : > { %2975 = vmatpush1.bf16.msra.mxu1 %v3783_v16  ;;  %2935 = vmatprep.subr.bf16.mxu0 %v3784_v17  ;;  %v3825_v44 = vld [vmem:[%s4835_s5 + $0x1d0] ss:$8 sps:$4 sm:$0xff]   ;;  %v3828_v46 = vld [vmem:[%s4835_s5 + $0x1c4] ss:$8 sps:$4 sm:$0xff]   ;;  %v3831_v51 = vld [vmem:[%s4835_s5 + $0x1c0] ss:$8 sps:$4 sm:$0xff]  }
  0xba   : > { %2976 = vmatprep.subr.bf16.mxu1 %v3786_v18  ;;  %v1327_v47 = vld [vmem:[%s4821_s26] sm:$0xff]  ;;  %v1328_v49 = vld [vmem:[%s4821_s26 + $0x8] sm:$0xff]  ;;  %v3838_v57 = vld [vmem:[%s4835_s5 + $0xa4] ss:$8 sps:$4 sm:$0xff]   ;;  %p3699_p13 = scmp.ne.s32.totalorder %s4198_s14, 1 }
  0xbb   : > { %v3428_v48 = vcombine.high %v1327_v47, %v1327_v47  ;;  %v3430_v52 = vcombine.high %v1328_v49, %v1328_v49  ;;  %v3832_v53 = vld [vmem:[%s4835_s5 + $0xb4] ss:$8 sps:$4 sm:$0xff]   ;;  %v3836_v55 = vld [vmem:[%s4835_s5 + $0xb0] ss:$8 sps:$4 sm:$0xff]   ;;  %v3840_v58 = vld [vmem:[%s4835_s5 + $0x1a4] ss:$8 sps:$4 sm:$0xff]   ;;  %v3427_v7 = vcombine.low %v1327_v47, %v1327_v47  ;;  %v3429_v8 = vcombine.low %v1328_v49, %v1328_v49 }
  0xbc   : > { %2936 = vmatpush1.bf16.msra.mxu0 %v3788_v19  ;;  %v3834_v54 = vld [vmem:[%s4835_s5 + $0x1b4] ss:$8 sps:$4 sm:$0xff]   ;;  %v3837_v56 = vld [vmem:[%s4835_s5 + $0x1b0] ss:$8 sps:$4 sm:$0xff]   ;;  %v3842_v59 = vld [vmem:[%s4835_s5 + $0xa0] ss:$8 sps:$4 sm:$0xff]  }
  0xbd   : > { %2977 = vmatpush1.bf16.msra.mxu1 %v3789_v20  ;;  %2937 = vmatprep.subr.bf16.mxu0 %v3790_v21  ;;  %v3843_v60 = vld [vmem:[%s4835_s5 + $0x1a0] ss:$8 sps:$4 sm:$0xff]   ;;  %v3844_v61 = vld [vmem:[%s4835_s5 + $0x94] ss:$8 sps:$4 sm:$0xff]   ;;  %v3848_v63 = vld [vmem:[%s4835_s5 + $0x90] ss:$8 sps:$4 sm:$0xff]  }
  0xbe   : > { %2978 = vmatprep.subr.bf16.mxu1 %v3792_v22  ;;  %2959 = vmatprep.mubr.bf16.mxu0 %v3428_v48  ;;  %v3846_v62 = vld [vmem:[%s4835_s5 + $0x194] ss:$8 sps:$4 sm:$0xff]   ;;  %v3849_v0 = vld [vmem:[%s4835_s5 + $0x190] ss:$8 sps:$4 sm:$0xff]   ;;  %v3850_v1 = vld [vmem:[%s4835_s5 + $0x84] ss:$8 sps:$4 sm:$0xff]  }
  0xbf   : > { %3000 = vmatprep.mubr.bf16.mxu1 %v3430_v52  ;;  %v3852_v2 = vld [vmem:[%s4835_s5 + $0x184] ss:$8 sps:$4 sm:$0xff]   ;;  %v3854_v3 = vld [vmem:[%s4835_s5 + $0x80] ss:$8 sps:$4 sm:$0xff]   ;;  %v3862_v5 = vld [vmem:[%s4835_s5 + $0x274] ss:$8 sps:$4 sm:$0xff]  }
  0xc0   : > { %2938 = vmatpush1.bf16.msra.mxu0 %v3794_v23  ;;  %v3855_v4 = vld [vmem:[%s4835_s5 + $0x180] ss:$8 sps:$4 sm:$0xff]   ;;  %v3865_v6 = vld [vmem:[%s4835_s5 + $0x374] ss:$8 sps:$4 sm:$0xff]   ;;  %v3860_v9 = vld [vmem:[%s4835_s5 + $0x270] ss:$8 sps:$4 sm:$0xff]  }
  0xc1   : > { %2979 = vmatpush1.bf16.msra.mxu1 %v3795_v24  ;;  %2939 = vmatprep.subr.bf16.mxu0 %v3796_v25  ;;  %v3863_v10 = vld [vmem:[%s4835_s5 + $0x370] ss:$8 sps:$4 sm:$0xff]   ;;  %v3868_v11 = vld [vmem:[%s4835_s5 + $0x264] ss:$8 sps:$4 sm:$0xff]   ;;  %v3866_v13 = vld [vmem:[%s4835_s5 + $0x260] ss:$8 sps:$4 sm:$0xff]  }
  0xc2   : > { %2980 = vmatprep.subr.bf16.mxu1 %v3798_v26  ;;  %v3871_v12 = vld [vmem:[%s4835_s5 + $0x364] ss:$8 sps:$4 sm:$0xff]   ;;  %v3869_v14 = vld [vmem:[%s4835_s5 + $0x360] ss:$8 sps:$4 sm:$0xff]   ;;  %v3874_v15 = vld [vmem:[%s4835_s5 + $0x254] ss:$8 sps:$4 sm:$0xff]  }
  0xc3   : > { %v3877_v16 = vld [vmem:[%s4835_s5 + $0x354] ss:$8 sps:$4 sm:$0xff]   ;;  %v3872_v17 = vld [vmem:[%s4835_s5 + $0x250] ss:$8 sps:$4 sm:$0xff]   ;;  %v3880_v19 = vld [vmem:[%s4835_s5 + $0x244] ss:$8 sps:$4 sm:$0xff]  }
  0xc4   : > { %2940 = vmatpush1.bf16.msra.mxu0 %v3800_v27  ;;  %v3875_v18 = vld [vmem:[%s4835_s5 + $0x350] ss:$8 sps:$4 sm:$0xff]   ;;  %v3883_v20 = vld [vmem:[%s4835_s5 + $0x344] ss:$8 sps:$4 sm:$0xff]   ;;  %v3878_v21 = vld [vmem:[%s4835_s5 + $0x240] ss:$8 sps:$4 sm:$0xff]  }
  0xc5   : > { %2981 = vmatpush1.bf16.msra.mxu1 %v3801_v28  ;;  %2941 = vmatprep.subr.bf16.mxu0 %v3802_v29  ;;  %v3881_v22 = vld [vmem:[%s4835_s5 + $0x340] ss:$8 sps:$4 sm:$0xff]   ;;  %v3886_v23 = vld [vmem:[%s4835_s5 + $0x234] ss:$8 sps:$4 sm:$0xff]   ;;  %v3884_v25 = vld [vmem:[%s4835_s5 + $0x230] ss:$8 sps:$4 sm:$0xff]  }
  0xc6   : > { %2982 = vmatprep.subr.bf16.mxu1 %v3804_v30  ;;  %v3889_v24 = vld [vmem:[%s4835_s5 + $0x334] ss:$8 sps:$4 sm:$0xff]   ;;  %v3887_v26 = vld [vmem:[%s4835_s5 + $0x330] ss:$8 sps:$4 sm:$0xff]   ;;  %v3892_v27 = vld [vmem:[%s4835_s5 + $0x224] ss:$8 sps:$4 sm:$0xff]  }
  0xc7   : > { %v3895_v28 = vld [vmem:[%s4835_s5 + $0x324] ss:$8 sps:$4 sm:$0xff]   ;;  %v3890_v29 = vld [vmem:[%s4835_s5 + $0x220] ss:$8 sps:$4 sm:$0xff]   ;;  %v3925_v52 = vld [vmem:[%s4835_s5 + $0x3d4] ss:$8 sps:$4 sm:$0xff]  }
  0xc8   : > { %2942 = vmatpush1.bf16.msra.mxu0 %v3806_v31  ;;  %v3893_v30 = vld [vmem:[%s4835_s5 + $0x320] ss:$8 sps:$4 sm:$0xff]   ;;  %v3898_v31 = vld [vmem:[%s4835_s5 + $0x214] ss:$8 sps:$4 sm:$0xff]   ;;  %v3916_v47 = vld [vmem:[%s4835_s5 + $0x2e4] ss:$8 sps:$4 sm:$0xff]  }
  0xc9   : > { %2983 = vmatpush1.bf16.msra.mxu1 %v3807_v32  ;;  %2943 = vmatprep.subr.bf16.mxu0 %v3808_v33  ;;  %v3901_v32 = vld [vmem:[%s4835_s5 + $0x314] ss:$8 sps:$4 sm:$0xff]   ;;  %v4931_v33 = vld [vmem:[%s4821_s26 + $0x10] sm:$0xff] }
  0xca   : > { %2984 = vmatprep.subr.bf16.mxu1 %v3810_v34  ;;  %v4934_v34 = vld [vmem:[%s4821_s26 + $0x18] sm:$0xff] }
  0xcb   : > { %v3919_v48 = vld [vmem:[%s4835_s5 + $0x3e4] ss:$8 sps:$4 sm:$0xff]   ;;  %v3914_v49 = vld [vmem:[%s4835_s5 + $0x2e0] ss:$8 sps:$4 sm:$0xff]  }
  0xcc   : > { %2944 = vmatpush2.bf16.msra.mxu0 %v3812_v35  ;;  %v3896_v35 = vld [vmem:[%s4835_s5 + $0x210] ss:$8 sps:$4 sm:$0xff]  }
  0xcd   : > { %2985 = vmatpush2.bf16.msra.mxu1 %v3813_v36  ;;  %2945 = vmatprep.subr.bf16.mxu0 %v3814_v37  ;;  %v3899_v36 = vld [vmem:[%s4835_s5 + $0x310] ss:$8 sps:$4 sm:$0xff]   ;;  %v3432_v37 = vcombine.high %v4931_v33, %v4931_v33 }
  0xce   : > { %2986 = vmatprep.subr.bf16.mxu1 %v3816_v38  ;;  %v3434_v38 = vcombine.high %v4934_v34, %v4934_v34 }
  0xd0   : > { %2946 = vmatpush2.bf16.msra.mxu0 %v3818_v39  ;;  %v3904_v39 = vld [vmem:[%s4835_s5 + $0x204] ss:$8 sps:$4 sm:$0xff]  }
  0xd1   : > { %2987 = vmatpush2.bf16.msra.mxu1 %v3819_v40  ;;  %2947 = vmatprep.subr.bf16.mxu0 %v3820_v41  ;;  %v3907_v40 = vld [vmem:[%s4835_s5 + $0x304] ss:$8 sps:$4 sm:$0xff]   ;;  %v3902_v41 = vld [vmem:[%s4835_s5 + $0x200] ss:$8 sps:$4 sm:$0xff]  }
  0xd2   : > { %2988 = vmatprep.subr.bf16.mxu1 %v3822_v42  ;;  %v3905_v42 = vld [vmem:[%s4835_s5 + $0x300] ss:$8 sps:$4 sm:$0xff]  }
  0xd4   : > { %2948 = vmatpush2.bf16.msra.mxu0 %v3824_v43  ;;  %v3910_v43 = vld [vmem:[%s4835_s5 + $0x2f4] ss:$8 sps:$4 sm:$0xff]  }
  0xd5   : > { %2989 = vmatpush2.bf16.msra.mxu1 %v3825_v44  ;;  %2949 = vmatprep.subr.bf16.mxu0 %v3826_v45  ;;  %v3913_v44 = vld [vmem:[%s4835_s5 + $0x3f4] ss:$8 sps:$4 sm:$0xff]   ;;  %v3908_v45 = vld [vmem:[%s4835_s5 + $0x2f0] ss:$8 sps:$4 sm:$0xff]  }
  0xd6   : > { %2990 = vmatprep.subr.bf16.mxu1 %v3828_v46  ;;  %v3911_v46 = vld [vmem:[%s4835_s5 + $0x3f0] ss:$8 sps:$4 sm:$0xff]  }
  0xd8   : > { %2950 = vmatpush2.bf16.msra.mxu0 %v3830_v50  ;;  %v3917_v50 = vld [vmem:[%s4835_s5 + $0x3e0] ss:$8 sps:$4 sm:$0xff]  }
  0xd9   : > { %2991 = vmatpush2.bf16.msra.mxu1 %v3831_v51  ;;  %2951 = vmatprep.subr.bf16.mxu0 %v3832_v53  ;;  %v3922_v51 = vld [vmem:[%s4835_s5 + $0x2d4] ss:$8 sps:$4 sm:$0xff]   ;;  %v3920_v53 = vld [vmem:[%s4835_s5 + $0x2d0] ss:$8 sps:$4 sm:$0xff]  }
  0xda   : > { %2992 = vmatprep.subr.bf16.mxu1 %v3834_v54  ;;  %v3923_v54 = vld [vmem:[%s4835_s5 + $0x3d0] ss:$8 sps:$4 sm:$0xff]  }
  0xdc   : > { %2952 = vmatpush2.bf16.msra.mxu0 %v3836_v55  ;;  %v3928_v55 = vld [vmem:[%s4835_s5 + $0x2c4] ss:$8 sps:$4 sm:$0xff]  }
  0xdd   : > { %2993 = vmatpush2.bf16.msra.mxu1 %v3837_v56  ;;  %2953 = vmatprep.subr.bf16.mxu0 %v3838_v57  ;;  %v3931_v56 = vld [vmem:[%s4835_s5 + $0x3c4] ss:$8 sps:$4 sm:$0xff]   ;;  %v3926_v57 = vld [vmem:[%s4835_s5 + $0x2c0] ss:$8 sps:$4 sm:$0xff]  }
  0xde   : > { %2994 = vmatprep.subr.bf16.mxu1 %v3840_v58  ;;  %v3929_v58 = vld [vmem:[%s4835_s5 + $0x3c0] ss:$8 sps:$4 sm:$0xff]  }
  0xe0   : > { %2954 = vmatpush2.bf16.msra.mxu0 %v3842_v59  ;;  %v3934_v59 = vld [vmem:[%s4835_s5 + $0x2b4] ss:$8 sps:$4 sm:$0xff]  }
  0xe1   : > { %2995 = vmatpush2.bf16.msra.mxu1 %v3843_v60  ;;  %2955 = vmatprep.subr.bf16.mxu0 %v3844_v61  ;;  %v3937_v60 = vld [vmem:[%s4835_s5 + $0x3b4] ss:$8 sps:$4 sm:$0xff]   ;;  %v3932_v61 = vld [vmem:[%s4835_s5 + $0x2b0] ss:$8 sps:$4 sm:$0xff]  }
  0xe2   : > { %2996 = vmatprep.subr.bf16.mxu1 %v3846_v62  ;;  %v3935_v62 = vld [vmem:[%s4835_s5 + $0x3b0] ss:$8 sps:$4 sm:$0xff]  }
  0xe4   : > { %2956 = vmatpush2.bf16.msra.mxu0 %v3848_v63  ;;  %v3940_v63 = vld [vmem:[%s4835_s5 + $0x2a4] ss:$8 sps:$4 sm:$0xff]  }
  0xe5   : > { %2997 = vmatpush2.bf16.msra.mxu1 %v3849_v0  ;;  %2957 = vmatprep.subr.bf16.mxu0 %v3850_v1  ;;  %v3943_v0 = vld [vmem:[%s4835_s5 + $0x3a4] ss:$8 sps:$4 sm:$0xff]   ;;  %v3938_v1 = vld [vmem:[%s4835_s5 + $0x2a0] ss:$8 sps:$4 sm:$0xff]  }
  0xe6   : > { %2998 = vmatprep.subr.bf16.mxu1 %v3852_v2  ;;  %v3941_v2 = vld [vmem:[%s4835_s5 + $0x3a0] ss:$8 sps:$4 sm:$0xff]  }
  0xe8   : > { %2958 = vmatpush2.bf16.msra.mxu0 %v3854_v3  ;;  %v3946_v3 = vld [vmem:[%s4835_s5 + $0x294] ss:$8 sps:$4 sm:$0xff]  }
  0xe9   : > { %2999 = vmatpush2.bf16.msra.mxu1 %v3855_v4  ;;  %3009 = vmatprep.subr.bf16.mxu0 %v3862_v5  ;;  %v3949_v4 = vld [vmem:[%s4835_s5 + $0x394] ss:$8 sps:$4 sm:$0xff]   ;;  %v3944_v5 = vld [vmem:[%s4835_s5 + $0x290] ss:$8 sps:$4 sm:$0xff]  }
  0xea   : > { %3050 = vmatprep.subr.bf16.mxu1 %v3865_v6  ;;  %v3947_v6 = vld [vmem:[%s4835_s5 + $0x390] ss:$8 sps:$4 sm:$0xff]  }
  0xeb   : > { %2960 = vmatmul.mubr.bf16.vlgmr.msra.gmra.mxu0 %v3427_v7  ;;  %v3952_v7 = vld [vmem:[%s4835_s5 + $0x284] ss:$8 sps:$4 sm:$0xff]  }
  0xec   : > { %3001 = vmatmul.mubr.bf16.vlgmr.msra.gmra.mxu1 %v3429_v8  ;;  %3010 = vmatpush1.bf16.msra.mxu0 %v3860_v9  ;;  %v3955_v8 = vld [vmem:[%s4835_s5 + $0x384] ss:$8 sps:$4 sm:$0xff]   ;;  %v3950_v9 = vld [vmem:[%s4835_s5 + $0x280] ss:$8 sps:$4 sm:$0xff]  }
  0xed   : > { %3051 = vmatpush1.bf16.msra.mxu1 %v3863_v10  ;;  %3011 = vmatprep.subr.bf16.mxu0 %v3868_v11  ;;  %v3953_v10 = vld [vmem:[%s4835_s5 + $0x380] ss:$8 sps:$4 sm:$0xff]   ;;  %v3962_v11 = vld [vmem:[%s4835_s5 + $0x474] ss:$8 sps:$4 sm:$0xff]  }
  0xee   : > { %3052 = vmatprep.subr.bf16.mxu1 %v3871_v12  ;;  %3041 = vmatprep.mubr.bf16.mxu0 %v3432_v37  ;;  %v3965_v12 = vld [vmem:[%s4835_s5 + $0x574] ss:$8 sps:$4 sm:$0xff]   ;;  %v3992_v37 = vld [vmem:[%s4835_s5 + $0x424] ss:$8 sps:$4 sm:$0xff]  }
  0xef   : > { %3082 = vmatprep.mubr.bf16.mxu1 %v3434_v38  ;;  %v3995_v38 = vld [vmem:[%s4835_s5 + $0x524] ss:$8 sps:$4 sm:$0xff]  }
  0xf0   : > { %3012 = vmatpush1.bf16.msra.mxu0 %v3866_v13  ;;  %v3431_v13 = vcombine.low %v4931_v33, %v4931_v33  ;;  %v3986_v33 = vld [vmem:[%s4835_s5 + $0x434] ss:$8 sps:$4 sm:$0xff]  }
  0xf1   : > { %3053 = vmatpush1.bf16.msra.mxu1 %v3869_v14  ;;  %3013 = vmatprep.subr.bf16.mxu0 %v3874_v15  ;;  %v3433_v14 = vcombine.low %v4934_v34, %v4934_v34  ;;  %v3960_v15 = vld [vmem:[%s4835_s5 + $0x470] ss:$8 sps:$4 sm:$0xff]   ;;  %v3989_v34 = vld [vmem:[%s4835_s5 + $0x534] ss:$8 sps:$4 sm:$0xff]  }
  0xf2   : > { %3054 = vmatprep.subr.bf16.mxu1 %v3877_v16  ;;  %v3963_v16 = vld [vmem:[%s4835_s5 + $0x570] ss:$8 sps:$4 sm:$0xff]  }
  0xf4   : > { %3014 = vmatpush1.bf16.msra.mxu0 %v3872_v17  ;;  %v3968_v17 = vld [vmem:[%s4835_s5 + $0x464] ss:$8 sps:$4 sm:$0xff]  }
  0xf5   : > { %3055 = vmatpush1.bf16.msra.mxu1 %v3875_v18  ;;  %3015 = vmatprep.subr.bf16.mxu0 %v3880_v19  ;;  %v3971_v18 = vld [vmem:[%s4835_s5 + $0x564] ss:$8 sps:$4 sm:$0xff]   ;;  %v4989_v19 = vld [vmem:[%s4821_s26 + $0x20] sm:$0xff] }
  0xf6   : > { %3056 = vmatprep.subr.bf16.mxu1 %v3883_v20  ;;  %v4992_v20 = vld [vmem:[%s4821_s26 + $0x28] sm:$0xff] }
  0xf8   : > { %3016 = vmatpush1.bf16.msra.mxu0 %v3878_v21  ;;  %v3436_v21 = vcombine.high %v4989_v19, %v4989_v19 }
  0xf9   : > { %3057 = vmatpush1.bf16.msra.mxu1 %v3881_v22  ;;  %3017 = vmatprep.subr.bf16.mxu0 %v3886_v23  ;;  %v3438_v22 = vcombine.high %v4992_v20, %v4992_v20  ;;  %v3966_v23 = vld [vmem:[%s4835_s5 + $0x460] ss:$8 sps:$4 sm:$0xff]  }
  0xfa   : > { %3058 = vmatprep.subr.bf16.mxu1 %v3889_v24  ;;  %v3969_v24 = vld [vmem:[%s4835_s5 + $0x560] ss:$8 sps:$4 sm:$0xff]  }
  0xfc   : > { %3018 = vmatpush1.bf16.msra.mxu0 %v3884_v25  ;;  %v3974_v25 = vld [vmem:[%s4835_s5 + $0x454] ss:$8 sps:$4 sm:$0xff]  }
  0xfd   : > { %3059 = vmatpush1.bf16.msra.mxu1 %v3887_v26  ;;  %3019 = vmatprep.subr.bf16.mxu0 %v3892_v27  ;;  %v3977_v26 = vld [vmem:[%s4835_s5 + $0x554] ss:$8 sps:$4 sm:$0xff]   ;;  %v3972_v27 = vld [vmem:[%s4835_s5 + $0x450] ss:$8 sps:$4 sm:$0xff]  }
  0xfe   : > { %3060 = vmatprep.subr.bf16.mxu1 %v3895_v28  ;;  %v3975_v28 = vld [vmem:[%s4835_s5 + $0x550] ss:$8 sps:$4 sm:$0xff]  }
 0x100   : > { %3020 = vmatpush1.bf16.msra.mxu0 %v3890_v29  ;;  %v3980_v29 = vld [vmem:[%s4835_s5 + $0x444] ss:$8 sps:$4 sm:$0xff]  }
 0x101   : > { %3061 = vmatpush1.bf16.msra.mxu1 %v3893_v30  ;;  %3021 = vmatprep.subr.bf16.mxu0 %v3898_v31  ;;  %v3983_v30 = vld [vmem:[%s4835_s5 + $0x544] ss:$8 sps:$4 sm:$0xff]   ;;  %v3978_v31 = vld [vmem:[%s4835_s5 + $0x440] ss:$8 sps:$4 sm:$0xff]  }
 0x102   : > { %3062 = vmatprep.subr.bf16.mxu1 %v3901_v32  ;;  %v3981_v32 = vld [vmem:[%s4835_s5 + $0x540] ss:$8 sps:$4 sm:$0xff]  }
 0x104   : > { %3022 = vmatpush1.bf16.msra.mxu0 %v3896_v35  ;;  %v3984_v35 = vld [vmem:[%s4835_s5 + $0x430] ss:$8 sps:$4 sm:$0xff]  }
 0x105   : > { %3063 = vmatpush1.bf16.msra.mxu1 %v3899_v36  ;;  %3023 = vmatprep.subr.bf16.mxu0 %v3904_v39  ;;  %v3987_v36 = vld [vmem:[%s4835_s5 + $0x530] ss:$8 sps:$4 sm:$0xff]   ;;  %v3990_v39 = vld [vmem:[%s4835_s5 + $0x420] ss:$8 sps:$4 sm:$0xff]  }
 0x106   : > { %3064 = vmatprep.subr.bf16.mxu1 %v3907_v40  ;;  %v3993_v40 = vld [vmem:[%s4835_s5 + $0x520] ss:$8 sps:$4 sm:$0xff]  }
 0x108   : > { %3024 = vmatpush1.bf16.msra.mxu0 %v3902_v41  ;;  %v3998_v41 = vld [vmem:[%s4835_s5 + $0x414] ss:$8 sps:$4 sm:$0xff]  }
 0x109   : > { %3065 = vmatpush1.bf16.msra.mxu1 %v3905_v42  ;;  %3025 = vmatprep.subr.bf16.mxu0 %v3910_v43  ;;  %v4001_v42 = vld [vmem:[%s4835_s5 + $0x514] ss:$8 sps:$4 sm:$0xff]   ;;  %v3996_v43 = vld [vmem:[%s4835_s5 + $0x410] ss:$8 sps:$4 sm:$0xff]  }
 0x10a   : > { %3066 = vmatprep.subr.bf16.mxu1 %v3913_v44  ;;  %v3999_v44 = vld [vmem:[%s4835_s5 + $0x510] ss:$8 sps:$4 sm:$0xff]  }
 0x10c   : > { %3026 = vmatpush2.bf16.msra.mxu0 %v3908_v45  ;;  %v4004_v45 = vld [vmem:[%s4835_s5 + $0x404] ss:$8 sps:$4 sm:$0xff]  }
 0x10d   : > { %3067 = vmatpush2.bf16.msra.mxu1 %v3911_v46  ;;  %3027 = vmatprep.subr.bf16.mxu0 %v3916_v47  ;;  %v4007_v46 = vld [vmem:[%s4835_s5 + $0x504] ss:$8 sps:$4 sm:$0xff]   ;;  %v4002_v47 = vld [vmem:[%s4835_s5 + $0x400] ss:$8 sps:$4 sm:$0xff]  }
 0x10e   : > { %3068 = vmatprep.subr.bf16.mxu1 %v3919_v48  ;;  %v4005_v48 = vld [vmem:[%s4835_s5 + $0x500] ss:$8 sps:$4 sm:$0xff]  }
 0x110   : > { %3028 = vmatpush2.bf16.msra.mxu0 %v3914_v49  ;;  %v4010_v49 = vld [vmem:[%s4835_s5 + $0x4f4] ss:$8 sps:$4 sm:$0xff]  }
 0x111   : > { %3069 = vmatpush2.bf16.msra.mxu1 %v3917_v50  ;;  %3029 = vmatprep.subr.bf16.mxu0 %v3922_v51  ;;  %v4013_v50 = vld [vmem:[%s4835_s5 + $0x5f4] ss:$8 sps:$4 sm:$0xff]   ;;  %v4008_v51 = vld [vmem:[%s4835_s5 + $0x4f0] ss:$8 sps:$4 sm:$0xff]  }
 0x112   : > { %3070 = vmatprep.subr.bf16.mxu1 %v3925_v52  ;;  %v4011_v52 = vld [vmem:[%s4835_s5 + $0x5f0] ss:$8 sps:$4 sm:$0xff]  }
 0x114   : > { %3030 = vmatpush2.bf16.msra.mxu0 %v3920_v53  ;;  %v4016_v53 = vld [vmem:[%s4835_s5 + $0x4e4] ss:$8 sps:$4 sm:$0xff]  }
 0x115   : > { %3071 = vmatpush2.bf16.msra.mxu1 %v3923_v54  ;;  %3031 = vmatprep.subr.bf16.mxu0 %v3928_v55  ;;  %v4019_v54 = vld [vmem:[%s4835_s5 + $0x5e4] ss:$8 sps:$4 sm:$0xff]   ;;  %v4014_v55 = vld [vmem:[%s4835_s5 + $0x4e0] ss:$8 sps:$4 sm:$0xff]  }
 0x116   : > { %3072 = vmatprep.subr.bf16.mxu1 %v3931_v56  ;;  %v4017_v56 = vld [vmem:[%s4835_s5 + $0x5e0] ss:$8 sps:$4 sm:$0xff]  }
 0x118   : > { %3032 = vmatpush2.bf16.msra.mxu0 %v3926_v57  ;;  %v4022_v57 = vld [vmem:[%s4835_s5 + $0x4d4] ss:$8 sps:$4 sm:$0xff]  }
 0x119   : > { %3073 = vmatpush2.bf16.msra.mxu1 %v3929_v58  ;;  %3033 = vmatprep.subr.bf16.mxu0 %v3934_v59  ;;  %v4025_v58 = vld [vmem:[%s4835_s5 + $0x5d4] ss:$8 sps:$4 sm:$0xff]   ;;  %v4020_v59 = vld [vmem:[%s4835_s5 + $0x4d0] ss:$8 sps:$4 sm:$0xff]  }
 0x11a   : > { %3074 = vmatprep.subr.bf16.mxu1 %v3937_v60  ;;  %v4023_v60 = vld [vmem:[%s4835_s5 + $0x5d0] ss:$8 sps:$4 sm:$0xff]  }
 0x11c   : > { %3034 = vmatpush2.bf16.msra.mxu0 %v3932_v61  ;;  %v4028_v61 = vld [vmem:[%s4835_s5 + $0x4c4] ss:$8 sps:$4 sm:$0xff]  }
 0x11d   : > { %3075 = vmatpush2.bf16.msra.mxu1 %v3935_v62  ;;  %3035 = vmatprep.subr.bf16.mxu0 %v3940_v63  ;;  %v4031_v62 = vld [vmem:[%s4835_s5 + $0x5c4] ss:$8 sps:$4 sm:$0xff]   ;;  %v4026_v63 = vld [vmem:[%s4835_s5 + $0x4c0] ss:$8 sps:$4 sm:$0xff]  }
 0x11e   : > { %3076 = vmatprep.subr.bf16.mxu1 %v3943_v0  ;;  %v4029_v0 = vld [vmem:[%s4835_s5 + $0x5c0] ss:$8 sps:$4 sm:$0xff]  }
 0x120   : > { %3036 = vmatpush2.bf16.msra.mxu0 %v3938_v1  ;;  %v4034_v1 = vld [vmem:[%s4835_s5 + $0x4b4] ss:$8 sps:$4 sm:$0xff]  }
 0x121   : > { %3077 = vmatpush2.bf16.msra.mxu1 %v3941_v2  ;;  %3037 = vmatprep.subr.bf16.mxu0 %v3946_v3  ;;  %v4037_v2 = vld [vmem:[%s4835_s5 + $0x5b4] ss:$8 sps:$4 sm:$0xff]   ;;  %v4032_v3 = vld [vmem:[%s4835_s5 + $0x4b0] ss:$8 sps:$4 sm:$0xff]  }
 0x122   : > { %3078 = vmatprep.subr.bf16.mxu1 %v3949_v4  ;;  %v4035_v4 = vld [vmem:[%s4835_s5 + $0x5b0] ss:$8 sps:$4 sm:$0xff]  }
 0x124   : > { %3038 = vmatpush2.bf16.msra.mxu0 %v3944_v5  ;;  %v4040_v5 = vld [vmem:[%s4835_s5 + $0x4a4] ss:$8 sps:$4 sm:$0xff]  }
 0x125   : > { %3079 = vmatpush2.bf16.msra.mxu1 %v3947_v6  ;;  %3039 = vmatprep.subr.bf16.mxu0 %v3952_v7  ;;  %v4043_v6 = vld [vmem:[%s4835_s5 + $0x5a4] ss:$8 sps:$4 sm:$0xff]   ;;  %v4038_v7 = vld [vmem:[%s4835_s5 + $0x4a0] ss:$8 sps:$4 sm:$0xff]  }
 0x126   : > { %3080 = vmatprep.subr.bf16.mxu1 %v3955_v8  ;;  %v4041_v8 = vld [vmem:[%s4835_s5 + $0x5a0] ss:$8 sps:$4 sm:$0xff]  }
 0x128   : > { %3040 = vmatpush2.bf16.msra.mxu0 %v3950_v9  ;;  %v4046_v9 = vld [vmem:[%s4835_s5 + $0x494] ss:$8 sps:$4 sm:$0xff]  }
 0x129   : > { %3081 = vmatpush2.bf16.msra.mxu1 %v3953_v10  ;;  %3091 = vmatprep.subr.bf16.mxu0 %v3962_v11  ;;  %v4049_v10 = vld [vmem:[%s4835_s5 + $0x594] ss:$8 sps:$4 sm:$0xff]   ;;  %v4044_v11 = vld [vmem:[%s4835_s5 + $0x490] ss:$8 sps:$4 sm:$0xff]  }
 0x12a   : > { %3132 = vmatprep.subr.bf16.mxu1 %v3965_v12  ;;  %v4047_v12 = vld [vmem:[%s4835_s5 + $0x590] ss:$8 sps:$4 sm:$0xff]  }
 0x12b   : > { %3042 = vmatmul.mubr.bf16.vlgmr.msra.gmra.mxu0 %v3431_v13  ;;  %v4052_v13 = vld [vmem:[%s4835_s5 + $0x484] ss:$8 sps:$4 sm:$0xff]  }
 0x12c   : > { %3083 = vmatmul.mubr.bf16.vlgmr.msra.gmra.mxu1 %v3433_v14  ;;  %3092 = vmatpush1.bf16.msra.mxu0 %v3960_v15  ;;  %v4055_v14 = vld [vmem:[%s4835_s5 + $0x584] ss:$8 sps:$4 sm:$0xff]   ;;  %v4050_v15 = vld [vmem:[%s4835_s5 + $0x480] ss:$8 sps:$4 sm:$0xff]  }
 0x12d   : > { %3133 = vmatpush1.bf16.msra.mxu1 %v3963_v16  ;;  %3093 = vmatprep.subr.bf16.mxu0 %v3968_v17  ;;  %v4053_v16 = vld [vmem:[%s4835_s5 + $0x580] ss:$8 sps:$4 sm:$0xff]   ;;  %v4062_v17 = vld [vmem:[%s4835_s5 + $0x674] ss:$8 sps:$4 sm:$0xff]  }
 0x12e   : > { %3134 = vmatprep.subr.bf16.mxu1 %v3971_v18  ;;  %3123 = vmatprep.mubr.bf16.mxu0 %v3436_v21  ;;  %v4065_v18 = vld [vmem:[%s4835_s5 + $0x774] ss:$8 sps:$4 sm:$0xff]   ;;  %v3435_v21 = vcombine.low %v4989_v19, %v4989_v19 }
 0x12f   : > { %3164 = vmatprep.mubr.bf16.mxu1 %v3438_v22  ;;  %v3437_v22 = vcombine.low %v4992_v20, %v4992_v20 }
 0x130   : > { %3094 = vmatpush1.bf16.msra.mxu0 %v3966_v23  ;;  %v5063_v23 = vld [vmem:[%s4821_s26 + $0x30] sm:$0xff] }
 0x131   : > { %3135 = vmatpush1.bf16.msra.mxu1 %v3969_v24  ;;  %3095 = vmatprep.subr.bf16.mxu0 %v3974_v25  ;;  %v5066_v24 = vld [vmem:[%s4821_s26 + $0x38] sm:$0xff]  ;;  %v4060_v25 = vld [vmem:[%s4835_s5 + $0x670] ss:$8 sps:$4 sm:$0xff]   ;;  %v3440_v19 = vcombine.high %v5063_v23, %v5063_v23 }
 0x132   : > { %3136 = vmatprep.subr.bf16.mxu1 %v3977_v26  ;;  %v4063_v26 = vld [vmem:[%s4835_s5 + $0x770] ss:$8 sps:$4 sm:$0xff]   ;;  %v3442_v20 = vcombine.high %v5066_v24, %v5066_v24 }
 0x134   : > { %3096 = vmatpush1.bf16.msra.mxu0 %v3972_v27  ;;  %v4068_v27 = vld [vmem:[%s4835_s5 + $0x664] ss:$8 sps:$4 sm:$0xff]  }
 0x135   : > { %3137 = vmatpush1.bf16.msra.mxu1 %v3975_v28  ;;  %3097 = vmatprep.subr.bf16.mxu0 %v3980_v29  ;;  %v4071_v28 = vld [vmem:[%s4835_s5 + $0x764] ss:$8 sps:$4 sm:$0xff]   ;;  %v4066_v29 = vld [vmem:[%s4835_s5 + $0x660] ss:$8 sps:$4 sm:$0xff]  }
 0x136   : > { %3138 = vmatprep.subr.bf16.mxu1 %v3983_v30  ;;  %v4069_v30 = vld [vmem:[%s4835_s5 + $0x760] ss:$8 sps:$4 sm:$0xff]  }
 0x138   : > { %3098 = vmatpush1.bf16.msra.mxu0 %v3978_v31  ;;  %v4074_v31 = vld [vmem:[%s4835_s5 + $0x654] ss:$8 sps:$4 sm:$0xff]  }
 0x139   : > { %3139 = vmatpush1.bf16.msra.mxu1 %v3981_v32  ;;  %3099 = vmatprep.subr.bf16.mxu0 %v3986_v33  ;;  %v4077_v32 = vld [vmem:[%s4835_s5 + $0x754] ss:$8 sps:$4 sm:$0xff]   ;;  %v4072_v33 = vld [vmem:[%s4835_s5 + $0x650] ss:$8 sps:$4 sm:$0xff]  }
 0x13a   : > { %3140 = vmatprep.subr.bf16.mxu1 %v3989_v34  ;;  %v4075_v34 = vld [vmem:[%s4835_s5 + $0x750] ss:$8 sps:$4 sm:$0xff]  }
 0x13c   : > { %3100 = vmatpush1.bf16.msra.mxu0 %v3984_v35  ;;  %v4080_v35 = vld [vmem:[%s4835_s5 + $0x644] ss:$8 sps:$4 sm:$0xff]  }
 0x13d   : > { %3141 = vmatpush1.bf16.msra.mxu1 %v3987_v36  ;;  %3101 = vmatprep.subr.bf16.mxu0 %v3992_v37  ;;  %v4083_v36 = vld [vmem:[%s4835_s5 + $0x744] ss:$8 sps:$4 sm:$0xff]   ;;  %v4078_v37 = vld [vmem:[%s4835_s5 + $0x640] ss:$8 sps:$4 sm:$0xff]  }
 0x13e   : > { %3142 = vmatprep.subr.bf16.mxu1 %v3995_v38  ;;  %v4081_v38 = vld [vmem:[%s4835_s5 + $0x740] ss:$8 sps:$4 sm:$0xff]  }
 0x140   : > { %3102 = vmatpush1.bf16.msra.mxu0 %v3990_v39  ;;  %v4086_v39 = vld [vmem:[%s4835_s5 + $0x634] ss:$8 sps:$4 sm:$0xff]  }
 0x141   : > { %3143 = vmatpush1.bf16.msra.mxu1 %v3993_v40  ;;  %3103 = vmatprep.subr.bf16.mxu0 %v3998_v41  ;;  %v4089_v40 = vld [vmem:[%s4835_s5 + $0x734] ss:$8 sps:$4 sm:$0xff]   ;;  %v4084_v41 = vld [vmem:[%s4835_s5 + $0x630] ss:$8 sps:$4 sm:$0xff]  }
 0x142   : > { %3144 = vmatprep.subr.bf16.mxu1 %v4001_v42  ;;  %v4087_v42 = vld [vmem:[%s4835_s5 + $0x730] ss:$8 sps:$4 sm:$0xff]  }
 0x144   : > { %3104 = vmatpush1.bf16.msra.mxu0 %v3996_v43  ;;  %v4092_v43 = vld [vmem:[%s4835_s5 + $0x624] ss:$8 sps:$4 sm:$0xff]  }
 0x145   : > { %3145 = vmatpush1.bf16.msra.mxu1 %v3999_v44  ;;  %3105 = vmatprep.subr.bf16.mxu0 %v4004_v45  ;;  %v4095_v44 = vld [vmem:[%s4835_s5 + $0x724] ss:$8 sps:$4 sm:$0xff]   ;;  %v4090_v45 = vld [vmem:[%s4835_s5 + $0x620] ss:$8 sps:$4 sm:$0xff]  }
 0x146   : > { %3146 = vmatprep.subr.bf16.mxu1 %v4007_v46  ;;  %v4093_v46 = vld [vmem:[%s4835_s5 + $0x720] ss:$8 sps:$4 sm:$0xff]  }
 0x148   : > { %3106 = vmatpush1.bf16.msra.mxu0 %v4002_v47  ;;  %v4098_v47 = vld [vmem:[%s4835_s5 + $0x614] ss:$8 sps:$4 sm:$0xff]  }
 0x149   : > { %3147 = vmatpush1.bf16.msra.mxu1 %v4005_v48  ;;  %3107 = vmatprep.subr.bf16.mxu0 %v4010_v49  ;;  %v4101_v48 = vld [vmem:[%s4835_s5 + $0x714] ss:$8 sps:$4 sm:$0xff]   ;;  %v4096_v49 = vld [vmem:[%s4835_s5 + $0x610] ss:$8 sps:$4 sm:$0xff]  }
 0x14a   : > { %3148 = vmatprep.subr.bf16.mxu1 %v4013_v50  ;;  %v4099_v50 = vld [vmem:[%s4835_s5 + $0x710] ss:$8 sps:$4 sm:$0xff]  }
 0x14c   : > { %3108 = vmatpush2.bf16.msra.mxu0 %v4008_v51  ;;  %v4104_v51 = vld [vmem:[%s4835_s5 + $0x604] ss:$8 sps:$4 sm:$0xff]  }
 0x14d   : > { %3149 = vmatpush2.bf16.msra.mxu1 %v4011_v52  ;;  %3109 = vmatprep.subr.bf16.mxu0 %v4016_v53  ;;  %v4107_v52 = vld [vmem:[%s4835_s5 + $0x704] ss:$8 sps:$4 sm:$0xff]   ;;  %v4102_v53 = vld [vmem:[%s4835_s5 + $0x600] ss:$8 sps:$4 sm:$0xff]  }
 0x14e   : > { %3150 = vmatprep.subr.bf16.mxu1 %v4019_v54  ;;  %v4105_v54 = vld [vmem:[%s4835_s5 + $0x700] ss:$8 sps:$4 sm:$0xff]  }
 0x150   : > { %3110 = vmatpush2.bf16.msra.mxu0 %v4014_v55  ;;  %v4110_v55 = vld [vmem:[%s4835_s5 + $0x6f4] ss:$8 sps:$4 sm:$0xff]  }
 0x151   : > { %3151 = vmatpush2.bf16.msra.mxu1 %v4017_v56  ;;  %3111 = vmatprep.subr.bf16.mxu0 %v4022_v57  ;;  %v4113_v56 = vld [vmem:[%s4835_s5 + $0x7f4] ss:$8 sps:$4 sm:$0xff]   ;;  %v4108_v57 = vld [vmem:[%s4835_s5 + $0x6f0] ss:$8 sps:$4 sm:$0xff]  }
 0x152   : > { %3152 = vmatprep.subr.bf16.mxu1 %v4025_v58  ;;  %v4111_v58 = vld [vmem:[%s4835_s5 + $0x7f0] ss:$8 sps:$4 sm:$0xff]  }
 0x154   : > { %3112 = vmatpush2.bf16.msra.mxu0 %v4020_v59  ;;  %v4116_v59 = vld [vmem:[%s4835_s5 + $0x6e4] ss:$8 sps:$4 sm:$0xff]  }
 0x155   : > { %3153 = vmatpush2.bf16.msra.mxu1 %v4023_v60  ;;  %3113 = vmatprep.subr.bf16.mxu0 %v4028_v61  ;;  %v4119_v60 = vld [vmem:[%s4835_s5 + $0x7e4] ss:$8 sps:$4 sm:$0xff]   ;;  %v4114_v61 = vld [vmem:[%s4835_s5 + $0x6e0] ss:$8 sps:$4 sm:$0xff]  }
 0x156   : > { %3154 = vmatprep.subr.bf16.mxu1 %v4031_v62  ;;  %v4117_v62 = vld [vmem:[%s4835_s5 + $0x7e0] ss:$8 sps:$4 sm:$0xff]  }
 0x158   : > { %3114 = vmatpush2.bf16.msra.mxu0 %v4026_v63  ;;  %v4122_v63 = vld [vmem:[%s4835_s5 + $0x6d4] ss:$8 sps:$4 sm:$0xff]  }
 0x159   : > { %3155 = vmatpush2.bf16.msra.mxu1 %v4029_v0  ;;  %3115 = vmatprep.subr.bf16.mxu0 %v4034_v1  ;;  %v4125_v0 = vld [vmem:[%s4835_s5 + $0x7d4] ss:$8 sps:$4 sm:$0xff]   ;;  %v4120_v1 = vld [vmem:[%s4835_s5 + $0x6d0] ss:$8 sps:$4 sm:$0xff]  }
 0x15a   : > { %3156 = vmatprep.subr.bf16.mxu1 %v4037_v2  ;;  %v4123_v2 = vld [vmem:[%s4835_s5 + $0x7d0] ss:$8 sps:$4 sm:$0xff]  }
 0x15c   : > { %3116 = vmatpush2.bf16.msra.mxu0 %v4032_v3  ;;  %v4128_v3 = vld [vmem:[%s4835_s5 + $0x6c4] ss:$8 sps:$4 sm:$0xff]  }
 0x15d   : > { %3157 = vmatpush2.bf16.msra.mxu1 %v4035_v4  ;;  %3117 = vmatprep.subr.bf16.mxu0 %v4040_v5  ;;  %v4131_v4 = vld [vmem:[%s4835_s5 + $0x7c4] ss:$8 sps:$4 sm:$0xff]   ;;  %v4126_v5 = vld [vmem:[%s4835_s5 + $0x6c0] ss:$8 sps:$4 sm:$0xff]  }
 0x15e   : > { %3158 = vmatprep.subr.bf16.mxu1 %v4043_v6  ;;  %v4129_v6 = vld [vmem:[%s4835_s5 + $0x7c0] ss:$8 sps:$4 sm:$0xff]  }
 0x160   : > { %3118 = vmatpush2.bf16.msra.mxu0 %v4038_v7  ;;  %v4134_v7 = vld [vmem:[%s4835_s5 + $0x6b4] ss:$8 sps:$4 sm:$0xff]  }
 0x161   : > { %3159 = vmatpush2.bf16.msra.mxu1 %v4041_v8  ;;  %3119 = vmatprep.subr.bf16.mxu0 %v4046_v9  ;;  %v4137_v8 = vld [vmem:[%s4835_s5 + $0x7b4] ss:$8 sps:$4 sm:$0xff]   ;;  %v4132_v9 = vld [vmem:[%s4835_s5 + $0x6b0] ss:$8 sps:$4 sm:$0xff]  }
 0x162   : > { %3160 = vmatprep.subr.bf16.mxu1 %v4049_v10  ;;  %v4135_v10 = vld [vmem:[%s4835_s5 + $0x7b0] ss:$8 sps:$4 sm:$0xff]  }
 0x164   : > { %3120 = vmatpush2.bf16.msra.mxu0 %v4044_v11  ;;  %v4140_v11 = vld [vmem:[%s4835_s5 + $0x6a4] ss:$8 sps:$4 sm:$0xff]  }
 0x165   : > { %3161 = vmatpush2.bf16.msra.mxu1 %v4047_v12  ;;  %3121 = vmatprep.subr.bf16.mxu0 %v4052_v13  ;;  %v4143_v12 = vld [vmem:[%s4835_s5 + $0x7a4] ss:$8 sps:$4 sm:$0xff]   ;;  %v4138_v13 = vld [vmem:[%s4835_s5 + $0x6a0] ss:$8 sps:$4 sm:$0xff]  }
 0x166   : > { %3162 = vmatprep.subr.bf16.mxu1 %v4055_v14  ;;  %v4141_v14 = vld [vmem:[%s4835_s5 + $0x7a0] ss:$8 sps:$4 sm:$0xff]  }
 0x168   : > { %3122 = vmatpush2.bf16.msra.mxu0 %v4050_v15  ;;  %v4146_v15 = vld [vmem:[%s4835_s5 + $0x694] ss:$8 sps:$4 sm:$0xff]  }
 0x169   : > { %3163 = vmatpush2.bf16.msra.mxu1 %v4053_v16  ;;  %3173 = vmatprep.subr.bf16.mxu0 %v4062_v17  ;;  %v4149_v16 = vld [vmem:[%s4835_s5 + $0x794] ss:$8 sps:$4 sm:$0xff]   ;;  %v4144_v17 = vld [vmem:[%s4835_s5 + $0x690] ss:$8 sps:$4 sm:$0xff]  }
 0x16a   : > { %3214 = vmatprep.subr.bf16.mxu1 %v4065_v18  ;;  %v4147_v18 = vld [vmem:[%s4835_s5 + $0x790] ss:$8 sps:$4 sm:$0xff]  }
 0x16b   : > { %3124 = vmatmul.mubr.bf16.vlgmr.msra.gmra.mxu0 %v3435_v21  ;;  %v4152_v21 = vld [vmem:[%s4835_s5 + $0x684] ss:$8 sps:$4 sm:$0xff]  }
 0x16c   : > { %3165 = vmatmul.mubr.bf16.vlgmr.msra.gmra.mxu1 %v3437_v22  ;;  %3174 = vmatpush1.bf16.msra.mxu0 %v4060_v25  ;;  %v4155_v22 = vld [vmem:[%s4835_s5 + $0x784] ss:$8 sps:$4 sm:$0xff]   ;;  %v4150_v25 = vld [vmem:[%s4835_s5 + $0x680] ss:$8 sps:$4 sm:$0xff]  }
 0x16d   : > { %3215 = vmatpush1.bf16.msra.mxu1 %v4063_v26  ;;  %3175 = vmatprep.subr.bf16.mxu0 %v4068_v27  ;;  %v4153_v26 = vld [vmem:[%s4835_s5 + $0x780] ss:$8 sps:$4 sm:$0xff]   ;;  %v3439_v27 = vcombine.low %v5063_v23, %v5063_v23 }
 0x16e   : > { %3216 = vmatprep.subr.bf16.mxu1 %v4071_v28  ;;  %3205 = vmatprep.mubr.bf16.mxu0 %v3440_v19  ;;  %v3441_v28 = vcombine.low %v5066_v24, %v5066_v24 }
 0x16f   : > { %3246 = vmatprep.mubr.bf16.mxu1 %v3442_v20 }
 0x170   : > { %3176 = vmatpush1.bf16.msra.mxu0 %v4066_v29 }
 0x171   : > { %3217 = vmatpush1.bf16.msra.mxu1 %v4069_v30  ;;  %3177 = vmatprep.subr.bf16.mxu0 %v4074_v31 }
 0x172   : > { %3218 = vmatprep.subr.bf16.mxu1 %v4077_v32 }
 0x174   : > { %3178 = vmatpush1.bf16.msra.mxu0 %v4072_v33 }
 0x175   : > { %3219 = vmatpush1.bf16.msra.mxu1 %v4075_v34  ;;  %3179 = vmatprep.subr.bf16.mxu0 %v4080_v35 }
 0x176   : > { %3220 = vmatprep.subr.bf16.mxu1 %v4083_v36 }
 0x178   : > { %3180 = vmatpush1.bf16.msra.mxu0 %v4078_v37 }
 0x179   : > { %3221 = vmatpush1.bf16.msra.mxu1 %v4081_v38  ;;  %3181 = vmatprep.subr.bf16.mxu0 %v4086_v39 }
 0x17a   : > { %3222 = vmatprep.subr.bf16.mxu1 %v4089_v40 }
 0x17c   : > { %3182 = vmatpush1.bf16.msra.mxu0 %v4084_v41 }
 0x17d   : > { %3223 = vmatpush1.bf16.msra.mxu1 %v4087_v42  ;;  %3183 = vmatprep.subr.bf16.mxu0 %v4092_v43 }
 0x17e   : > { %3224 = vmatprep.subr.bf16.mxu1 %v4095_v44 }
 0x180   : > { %3184 = vmatpush1.bf16.msra.mxu0 %v4090_v45 }
 0x181   : > { %3225 = vmatpush1.bf16.msra.mxu1 %v4093_v46  ;;  %3185 = vmatprep.subr.bf16.mxu0 %v4098_v47 }
 0x182   : > { %3226 = vmatprep.subr.bf16.mxu1 %v4101_v48 }
 0x184   : > { %3186 = vmatpush1.bf16.msra.mxu0 %v4096_v49 }
 0x185   : > { %3227 = vmatpush1.bf16.msra.mxu1 %v4099_v50  ;;  %3187 = vmatprep.subr.bf16.mxu0 %v4104_v51 }
 0x186   : > { %3228 = vmatprep.subr.bf16.mxu1 %v4107_v52 }
 0x188   : > { %3188 = vmatpush1.bf16.msra.mxu0 %v4102_v53 }
 0x189   : > { %3229 = vmatpush1.bf16.msra.mxu1 %v4105_v54  ;;  %3189 = vmatprep.subr.bf16.mxu0 %v4110_v55 }
 0x18a   : > { %3230 = vmatprep.subr.bf16.mxu1 %v4113_v56 }
 0x18c   : > { %3190 = vmatpush2.bf16.msra.mxu0 %v4108_v57 }
 0x18d   : > { %3231 = vmatpush2.bf16.msra.mxu1 %v4111_v58  ;;  %3191 = vmatprep.subr.bf16.mxu0 %v4116_v59 }
 0x18e   : > { %3232 = vmatprep.subr.bf16.mxu1 %v4119_v60 }
 0x190   : > { %3192 = vmatpush2.bf16.msra.mxu0 %v4114_v61 }
 0x191   : > { %3233 = vmatpush2.bf16.msra.mxu1 %v4117_v62  ;;  %3193 = vmatprep.subr.bf16.mxu0 %v4122_v63  ;;  %v1325_v62 = vld [vmem:[#allocation2] sm:$0xff] }
 0x192   : > { %3234 = vmatprep.subr.bf16.mxu1 %v4125_v0 }
 0x194   : > { %3194 = vmatpush2.bf16.msra.mxu0 %v4120_v1 }
 0x195   : > { %3235 = vmatpush2.bf16.msra.mxu1 %v4123_v2  ;;  %3195 = vmatprep.subr.bf16.mxu0 %v4128_v3  ;;  %v1326_v3 = vld [vmem:[#allocation2 + $0x8] sm:$0xff] }
 0x196   : > { %3236 = vmatprep.subr.bf16.mxu1 %v4131_v4 }
 0x198   : > { %3196 = vmatpush2.bf16.msra.mxu0 %v4126_v5 }
 0x199   : > { %3237 = vmatpush2.bf16.msra.mxu1 %v4129_v6  ;;  %3197 = vmatprep.subr.bf16.mxu0 %v4134_v7 }
 0x19a   : > { %3238 = vmatprep.subr.bf16.mxu1 %v4137_v8 }
 0x19c   : > { %3198 = vmatpush2.bf16.msra.mxu0 %v4132_v9 }
 0x19d   : > { %3239 = vmatpush2.bf16.msra.mxu1 %v4135_v10  ;;  %3199 = vmatprep.subr.bf16.mxu0 %v4140_v11 }
 0x19e   : > { %3240 = vmatprep.subr.bf16.mxu1 %v4143_v12 }
 0x1a0   : > { %3200 = vmatpush2.bf16.msra.mxu0 %v4138_v13 }
 0x1a1   : > { %3241 = vmatpush2.bf16.msra.mxu1 %v4141_v14  ;;  %3201 = vmatprep.subr.bf16.mxu0 %v4146_v15 }
 0x1a2   : > { %3242 = vmatprep.subr.bf16.mxu1 %v4149_v16 }
 0x1a4   : > { %3202 = vmatpush2.bf16.msra.mxu0 %v4144_v17 }
 0x1a5   : > { %3243 = vmatpush2.bf16.msra.mxu1 %v4147_v18  ;;  %3203 = vmatprep.subr.bf16.mxu0 %v4152_v21 }
 0x1a6   : > { %3244 = vmatprep.subr.bf16.mxu1 %v4155_v22 }
 0x1a8   : > { %3204 = vmatpush2.bf16.msra.mxu0 %v4150_v25 }
 0x1a9   : > { %3245 = vmatpush2.bf16.msra.mxu1 %v4153_v26 }
 0x1ab   : > { %v2961_v19 = vpop.f32.mrf.mxu0  ;;  %3206 = vmatmul.mubr.bf16.vlgmr.msra.gmra.mxu0 %v3439_v27 }
 0x1ac   : > { %v3002_v20 = vpop.f32.mrf.mxu1  ;;  %3247 = vmatmul.mubr.bf16.vlgmr.msra.gmra.mxu1 %v3441_v28 }
 0x1ad   : > { %v3003_v29 = vadd.f32 %v3002_v20, %v2961_v19  ;;  %v2963_v30 = vpop.f32.mrf.mxu0 }
 0x1ae   : > { %v3004_v31 = vpop.f32.mrf.mxu1 }
 0x1af   : > { %v3005_v32 = vadd.f32 %v3004_v31, %v2963_v30  ;;  %v2965_v33 = vpop.f32.mrf.mxu0 }
 0x1b0   : > { %v3006_v34 = vpop.f32.mrf.mxu1 }
 0x1b1   : > { %v2966_v35 = vpop.f32.mrf.mxu0 }
 0x1b2   : > { %v3007_v36 = vpop.f32.mrf.mxu1 }
 0x1eb   : > { %v3043_v37 = vpop.f32.mrf.mxu0 }
 0x1ec   : > { %v3084_v38 = vpop.f32.mrf.mxu1  ;;  %v3044_v23 = vadd.f32 %v3043_v37, %v3003_v29 }
 0x1ed   : > { %v3045_v39 = vpop.f32.mrf.mxu0 }
 0x1ee   : > { %v3086_v40 = vpop.f32.mrf.mxu1  ;;  %v3085_v24 = vadd.f32 %v3084_v38, %v3044_v23  ;;  %v3046_v41 = vadd.f32 %v3045_v39, %v3005_v32 }
 0x1ef   : > { %v3047_v42 = vpop.f32.mrf.mxu0 }
 0x1f0   : > { %v3088_v43 = vpop.f32.mrf.mxu1  ;;  %v3087_v44 = vadd.f32 %v3086_v40, %v3046_v41 }
 0x1f1   : > { %v3048_v45 = vpop.f32.mrf.mxu0 }
 0x1f2   : > { %v3089_v46 = vpop.f32.mrf.mxu1 }
 0x22b   : > { %v3125_v47 = vpop.f32.mrf.mxu0 }
 0x22c   : > { %v3166_v48 = vpop.f32.mrf.mxu1  ;;  %v3126_v55 = vadd.f32 %v3125_v47, %v3085_v24 }
 0x22d   : > { %v3127_v49 = vpop.f32.mrf.mxu0 }
 0x22e   : > { %v3168_v50 = vpop.f32.mrf.mxu1  ;;  %v3128_v56 = vadd.f32 %v3127_v49, %v3087_v44  ;;  %v3167_v57 = vadd.f32 %v3166_v48, %v3126_v55 }
 0x22f   : > { %v3129_v51 = vpop.f32.mrf.mxu0 }
 0x230   : > { %v3170_v52 = vpop.f32.mrf.mxu1  ;;  %v3169_v60 = vadd.f32 %v3168_v50, %v3128_v56 }
 0x231   : > { %v3130_v53 = vpop.f32.mrf.mxu0 }
 0x232   : > { %v3171_v54 = vpop.f32.mrf.mxu1 }
 0x26b   : > { %v3207_v58 = vpop.f32.mrf.mxu0 }
 0x26c   : > { %v3248_v59 = vpop.f32.mrf.mxu1  ;;  %v3208_v61 = vadd.f32 %v3207_v58, %v3167_v57 }
 0x26d   : > { %v3209_v63 = vpop.f32.mrf.mxu0 }
 0x26e   : > { %v3250_v0 = vpop.f32.mrf.mxu1  ;;  %v3249_v1 = vadd.f32 %v3248_v59, %v3208_v61  ;;  %v3210_v2 = vadd.f32 %v3209_v63, %v3169_v60 }
 0x26f   : > { %v3211_v4 = vpop.f32.mrf.mxu0 }
 0x270   : > { %v3252_v5 = vpop.f32.mrf.mxu1  ;;  %v3255_v6 = vadd.f32 %v3249_v1, %v1325_v62  ;;  %v3251_v7 = vadd.f32 %v3250_v0, %v3210_v2  ;;  %3262 = sbr.rel (%p3699_p13) target bundleno = 643 (0x283), region = 78 }
 0x271   : > { %v3212_v8 = vpop.f32.mrf.mxu0 }
 0x272   : > { %v3253_v9 = vpop.f32.mrf.mxu1  ;;  %3257 = vst [vmem:[#allocation2] sm:$0xff] %v3255_v6  ;;  %v3256_v10 = vadd.f32 %v3251_v7, %v1326_v3 }
 0x274   : > { %3258 = vst [vmem:[#allocation2 + $0x8] sm:$0xff] %v3256_v10 }
 0x275   : > { %v3267_v11 = vlaneseq  ;;  %v3265_v13 = vld [vmem:[%s1307_s12] sm:$0x3] }
 0x277   : > { %v3268_v12 = vshrl.u32 %v3267_v11, 7 }
 0x279   : > { %v3269_v14 = vsub.s32 0, %v3268_v12  ;;  %v3273_v15 = vsub.s32 1, %v3268_v12  ;;  %v3263_v16 = vld [vmem:[#allocation2] sm:$0xff] }
 0x27b   : > { %v3264_v17 = vld [vmem:[#allocation2 + $0x8] sm:$0xff]  ;;  %v3270_v18 = vrot.slane %v3265_v13, %v3269_v14  ;;  %v3274_v21 = vrot.slane %v3265_v13, %v3273_v15 }
 0x27d   : > { %v3277_v22 = vadd.f32 %v3270_v18, %v3263_v16  ;;  %v3278_v25 = vadd.f32 %v3274_v21, %v3264_v17 }
 0x27f   : > { %vm3279_vm0 = vcmp.ge.f32.partialorder %v3277_v22, 0.0  ;;  %v3281_v26 = vmul.f32 0.2, %v3277_v22  ;;  %vm3280_vm1 = vcmp.ge.f32.partialorder %v3278_v25, 0.0  ;;  %v3282_v27 = vmul.f32 0.2, %v3278_v25 }
 0x281   : > { %v3283_v28 = vsel %vm3279_vm0, %v3277_v22, %v3281_v26  ;;  %v3284_v19 = vsel %vm3280_vm1, %v3278_v25, %v3282_v27 }
 0x282   : > { %3285 = vst [vmem:[%s4833_s15] sm:$0xff] %v3283_v28  ;;  %3286 = vst [vmem:[%s4833_s15 + $0x8] sm:$0xff] %v3284_v19 }
 0x283 PF: > { %s13_s18 = sadd.s32 1, %s4214_s18   ;;  %s5171_s12 = smov %s4194_s13 }
 0x284   : > { %p10_p0 = scmp.ge.s32.totalorder %s13_s18, 6   ;;  %s5172_s13 = smov %s4288_s25 }
 0x285   : > { %s5173_s14 = smov %s4206_s16  ;;  %s5174_s15 = smov %s4210_s17 }
 0x286   : > { %s5175_s16 = smov %s5178_s19  ;;  %s5176_s17 = smov %s5182_s20 }
 0x287   :  { %12 = sbr.rel (!%p10_p0) target bundleno = 4 (0x4), region = 119 }

// kernel: critic_forward.9
= control target key start
LH: loop header
LB: loop body
LE: loop exit
PB: predicated region body
PF: predicated region fallthrough
CT: control target
= control target key end

     0   :  { %s2344_s12 = smov 0   ;;  %s2346_s13 = smov 0   ;;  %s2529_s0 = inlined_call_operand.vmem [shape: bf16[8,8192], index: 0, kind: input, shape index: {}]   ;;  %s2530_s1 = inlined_call_operand.vmem [shape: bf16[8192,128], index: 1, kind: input, shape index: {}]   ;;  %s2531_s2 = inlined_call_operand.vmem [shape: f32[1,128], index: 2, kind: input, shape index: {}]   ;;  %s2532_s3 = inlined_call_operand.vmem [shape: f32[8,128], index: 3, kind: output, shape index: {}]  }
   0x1   :  { %s2348_s14 = smov 0  }
   0x2 LB: > { %s25_s15 = sadd.s32 1, %s2317_s13  ;;  %p1799_p0 = scmp.ge.s32.totalorder %s2321_s14, 1  ;;  %s2321_s14 = sphi %s2348_s14, %s13_s14   ;;  %s2317_s13 = sphi %s2346_s13, %s2534_s13   ;;  %s2313_s12 = sphi %s2344_s12, %s2533_s12  }
   0x3   : > { %p26_p1 = scmp.ge.s32.totalorder %s25_s15, 4  ;;  %p189_p2 = scmp.lt.s32.totalorder %s2321_s14, 5 }
   0x5   : > { %s2536_s15 = smov (%p26_p1, %s25_s15), 0  ;;  %p190_p3 = pnand %p1799_p0, %p189_p2 }
   0x6   : > { %s1800_s16 = sshll.u32 (!%p190_p3), %s2313_s12, 4  ;;  %s1802_s17 = sshll.u32 (!%p190_p3), %s2313_s12, 8 }
   0x7   : > { %193 = sbr.rel (%p190_p3) target bundleno = 366 (0x16e), region = 32  ;;  %p233_p4 = scmp.lt.s32.totalorder (!%p190_p3), %s1800_s16, 63 }
   0x8   : > { %p241_p5 = scmp.lt.s32.totalorder (!%p190_p3), %s1802_s17, 1023  ;;  %p1804_p6 = scmp.ne.s32.totalorder (!%p190_p3), %s2313_s12, 0 }
   0xc   : > { %s2538_s16 = smov (!%p233_p4, %s1800_s16), 63  ;;  %s2540_s17 = smov (!%p241_p5, %s1802_s17), 1023 }
   0xd   : > { %s1801_s18 = sshll.u32 %s2538_s16, 2  ;;  %s1803_s22 = sshll.u32 %s2540_s17, 2 }
   0xe   : > { %s2369_s21 = scalar_lea.vmem %s2529_s0, %s1801_s18  ;;  %s2374_s25 = scalar_lea.vmem %s2530_s1, %s1803_s22 }
   0xf   : > { %263 = sbr.rel (%p1804_p6) target bundleno = 22 (0x16), region = 36 }
  0x14   : > { %v2323_v0 = vmov 0.0  }
  0x15   : > { %264 = vst [vmem:[#allocation2] sm:$0xff] %v2323_v0 }
  0x16 PF: > { %v2155_v1 = vld [vmem:[%s2374_s25 + $0x78] sm:$0xff]   ;;  %v2159_v5 = vld [vmem:[%s2374_s25 + $0x70] sm:$0xff]   ;;  %v2163_v9 = vld [vmem:[%s2374_s25 + $0x68] sm:$0xff]   ;;  %p1949_p7 = scmp.ne.s32.totalorder %s2313_s12, 3 }
  0x17   : > { %v2156_v2 = vld [vmem:[%s2374_s25 + $0xf8] sm:$0xff]   ;;  %1954 = vmatprep.subr.bf16.mxu0 %v2155_v1  ;;  %v2160_v6 = vld [vmem:[%s2374_s25 + $0xf0] sm:$0xff]   ;;  %v2164_v10 = vld [vmem:[%s2374_s25 + $0xe8] sm:$0xff]  }
  0x18   : > { %v2157_v3 = vld [vmem:[%s2374_s25 + $0x38] sm:$0xff]   ;;  %1976 = vmatprep.subr.bf16.mxu1 %v2156_v2  ;;  %v2161_v7 = vld [vmem:[%s2374_s25 + $0x30] sm:$0xff]   ;;  %v2165_v11 = vld [vmem:[%s2374_s25 + $0x28] sm:$0xff]  }
  0x19   : > { %v2158_v4 = vld [vmem:[%s2374_s25 + $0xb8] sm:$0xff]   ;;  %1955 = vmatpush3.bf16.msra.mxu0 %v2157_v3  ;;  %v2162_v8 = vld [vmem:[%s2374_s25 + $0xb0] sm:$0xff]   ;;  %v2166_v12 = vld [vmem:[%s2374_s25 + $0xa8] sm:$0xff]  }
  0x1a   : > { %1977 = vmatpush3.bf16.msra.mxu1 %v2158_v4  ;;  %1956 = vmatprep.subr.bf16.mxu0 %v2159_v5  ;;  %v2167_v13 = vld [vmem:[%s2374_s25 + $0x60] sm:$0xff]   ;;  %v2171_v17 = vld [vmem:[%s2374_s25 + $0x58] sm:$0xff]   ;;  %v2175_v21 = vld [vmem:[%s2374_s25 + $0x50] sm:$0xff]  }
  0x1b   : > { %1978 = vmatprep.subr.bf16.mxu1 %v2160_v6  ;;  %v2168_v14 = vld [vmem:[%s2374_s25 + $0xe0] sm:$0xff]   ;;  %v2172_v18 = vld [vmem:[%s2374_s25 + $0xd8] sm:$0xff]   ;;  %v2176_v22 = vld [vmem:[%s2374_s25 + $0xd0] sm:$0xff]  }
  0x1c   : > { %v2169_v15 = vld [vmem:[%s2374_s25 + $0x20] sm:$0xff]   ;;  %v2173_v19 = vld [vmem:[%s2374_s25 + $0x18] sm:$0xff]   ;;  %v2177_v23 = vld [vmem:[%s2374_s25 + $0x10] sm:$0xff]  }
  0x1d   : > { %1957 = vmatpush3.bf16.msra.mxu0 %v2161_v7  ;;  %v2170_v16 = vld [vmem:[%s2374_s25 + $0xa0] sm:$0xff]   ;;  %v2174_v20 = vld [vmem:[%s2374_s25 + $0x98] sm:$0xff]   ;;  %v2178_v24 = vld [vmem:[%s2374_s25 + $0x90] sm:$0xff]  }
  0x1e   : > { %1979 = vmatpush3.bf16.msra.mxu1 %v2162_v8  ;;  %1958 = vmatprep.subr.bf16.mxu0 %v2163_v9  ;;  %v2179_v25 = vld [vmem:[%s2374_s25 + $0x48] sm:$0xff]   ;;  %v2183_v29 = vld [vmem:[%s2374_s25 + $0x40] sm:$0xff]   ;;  %v2191_v39 = vld [vmem:[%s2374_s25 + $0x178] sm:$0xff]  }
  0x1f   : > { %1980 = vmatprep.subr.bf16.mxu1 %v2164_v10  ;;  %v2180_v26 = vld [vmem:[%s2374_s25 + $0xc8] sm:$0xff]   ;;  %v2184_v30 = vld [vmem:[%s2374_s25 + $0xc0] sm:$0xff]   ;;  %v2192_v40 = vld [vmem:[%s2374_s25 + $0x1f8] sm:$0xff]  }
  0x20   : > { %v2181_v27 = vld [vmem:[%s2374_s25 + $0x8] sm:$0xff]   ;;  %v2185_v31 = vld [vmem:[%s2374_s25] sm:$0xff]   ;;  %v2193_v41 = vld [vmem:[%s2374_s25 + $0x138] sm:$0xff]  }
  0x21   : > { %1959 = vmatpush3.bf16.msra.mxu0 %v2165_v11  ;;  %v2182_v28 = vld [vmem:[%s2374_s25 + $0x88] sm:$0xff]   ;;  %v2186_v32 = vld [vmem:[%s2374_s25 + $0x80] sm:$0xff]   ;;  %v2194_v42 = vld [vmem:[%s2374_s25 + $0x1b8] sm:$0xff]  }
  0x22   : > { %1981 = vmatpush3.bf16.msra.mxu1 %v2166_v12  ;;  %1960 = vmatprep.subr.bf16.mxu0 %v2167_v13  ;;  %v266_v33 = vld [vmem:[%s2369_s21] sm:$0xff]  ;;  %v267_v34 = vld [vmem:[%s2369_s21 + $0x8] sm:$0xff]  ;;  %v2195_v43 = vld [vmem:[%s2374_s25 + $0x170] sm:$0xff]  }
  0x23   : > { %1982 = vmatprep.subr.bf16.mxu1 %v2168_v14  ;;  %v1805_v35 = vcombine.low %v266_v33, %v266_v33  ;;  %v1806_v36 = vcombine.high %v266_v33, %v266_v33  ;;  %v1807_v37 = vcombine.low %v267_v34, %v267_v34  ;;  %v1808_v38 = vcombine.high %v267_v34, %v267_v34  ;;  %v2196_v44 = vld [vmem:[%s2374_s25 + $0x1f0] sm:$0xff]   ;;  %v2199_v47 = vld [vmem:[%s2374_s25 + $0x168] sm:$0xff]   ;;  %v2203_v51 = vld [vmem:[%s2374_s25 + $0x160] sm:$0xff]  }
  0x24   : > { %v2197_v45 = vld [vmem:[%s2374_s25 + $0x130] sm:$0xff]   ;;  %v2200_v48 = vld [vmem:[%s2374_s25 + $0x1e8] sm:$0xff]   ;;  %v2204_v52 = vld [vmem:[%s2374_s25 + $0x1e0] sm:$0xff]  }
  0x25   : > { %1961 = vmatpush3.bf16.msra.mxu0 %v2169_v15  ;;  %1386 = vmatprep.mubr.bf16.mxu0 %v1806_v36  ;;  %v2198_v46 = vld [vmem:[%s2374_s25 + $0x1b0] sm:$0xff]   ;;  %v2201_v49 = vld [vmem:[%s2374_s25 + $0x128] sm:$0xff]   ;;  %v2205_v53 = vld [vmem:[%s2374_s25 + $0x120] sm:$0xff]  }
  0x26   : > { %1983 = vmatpush3.bf16.msra.mxu1 %v2170_v16  ;;  %1962 = vmatprep.subr.bf16.mxu0 %v2171_v17  ;;  %v2202_v50 = vld [vmem:[%s2374_s25 + $0x1a8] sm:$0xff]   ;;  %v2206_v54 = vld [vmem:[%s2374_s25 + $0x1a0] sm:$0xff]   ;;  %v2207_v55 = vld [vmem:[%s2374_s25 + $0x158] sm:$0xff]  }
  0x27   : > { %1984 = vmatprep.subr.bf16.mxu1 %v2172_v18  ;;  %1426 = vmatprep.mubr.bf16.mxu1 %v1808_v38  ;;  %v2208_v56 = vld [vmem:[%s2374_s25 + $0x1d8] sm:$0xff]   ;;  %v2211_v59 = vld [vmem:[%s2374_s25 + $0x150] sm:$0xff]   ;;  %v2215_v63 = vld [vmem:[%s2374_s25 + $0x148] sm:$0xff]  }
  0x28   : > { %v2209_v57 = vld [vmem:[%s2374_s25 + $0x118] sm:$0xff]   ;;  %v2212_v60 = vld [vmem:[%s2374_s25 + $0x1d0] sm:$0xff]   ;;  %v2216_v0 = vld [vmem:[%s2374_s25 + $0x1c8] sm:$0xff]  }
  0x29   : > { %1963 = vmatpush3.bf16.msra.mxu0 %v2173_v19  ;;  %v2210_v58 = vld [vmem:[%s2374_s25 + $0x198] sm:$0xff]   ;;  %v2213_v61 = vld [vmem:[%s2374_s25 + $0x110] sm:$0xff]   ;;  %v2217_v1 = vld [vmem:[%s2374_s25 + $0x108] sm:$0xff]  }
  0x2a   : > { %1985 = vmatpush3.bf16.msra.mxu1 %v2174_v20  ;;  %1964 = vmatprep.subr.bf16.mxu0 %v2175_v21  ;;  %v2214_v62 = vld [vmem:[%s2374_s25 + $0x190] sm:$0xff]   ;;  %v2218_v2 = vld [vmem:[%s2374_s25 + $0x188] sm:$0xff]   ;;  %v2219_v3 = vld [vmem:[%s2374_s25 + $0x140] sm:$0xff]  }
  0x2b   : > { %1986 = vmatprep.subr.bf16.mxu1 %v2176_v22  ;;  %v2220_v4 = vld [vmem:[%s2374_s25 + $0x1c0] sm:$0xff]   ;;  %v268_v7 = vld [vmem:[%s2369_s21 + $0x10] sm:$0xff]  ;;  %v269_v10 = vld [vmem:[%s2369_s21 + $0x18] sm:$0xff] }
  0x2c   : > { %v2221_v5 = vld [vmem:[%s2374_s25 + $0x100] sm:$0xff]   ;;  %v1809_v8 = vcombine.low %v268_v7, %v268_v7  ;;  %v1810_v9 = vcombine.high %v268_v7, %v268_v7  ;;  %v1811_v11 = vcombine.low %v269_v10, %v269_v10  ;;  %v1812_v12 = vcombine.high %v269_v10, %v269_v10  ;;  %v2227_v13 = vld [vmem:[%s2374_s25 + $0x278] sm:$0xff]   ;;  %v2231_v17 = vld [vmem:[%s2374_s25 + $0x270] sm:$0xff]  }
  0x2d   : > { %1965 = vmatpush3.bf16.msra.mxu0 %v2177_v23  ;;  %v2222_v6 = vld [vmem:[%s2374_s25 + $0x180] sm:$0xff]   ;;  %v2228_v14 = vld [vmem:[%s2374_s25 + $0x2f8] sm:$0xff]   ;;  %v2232_v18 = vld [vmem:[%s2374_s25 + $0x2f0] sm:$0xff]  }
  0x2e   : > { %1987 = vmatpush3.bf16.msra.mxu1 %v2178_v24  ;;  %1966 = vmatprep.subr.bf16.mxu0 %v2179_v25  ;;  %v2229_v15 = vld [vmem:[%s2374_s25 + $0x238] sm:$0xff]   ;;  %v2233_v19 = vld [vmem:[%s2374_s25 + $0x230] sm:$0xff]   ;;  %v2235_v21 = vld [vmem:[%s2374_s25 + $0x268] sm:$0xff]  }
  0x2f   : > { %1988 = vmatprep.subr.bf16.mxu1 %v2180_v26  ;;  %v2230_v16 = vld [vmem:[%s2374_s25 + $0x2b8] sm:$0xff]   ;;  %v2234_v20 = vld [vmem:[%s2374_s25 + $0x2b0] sm:$0xff]   ;;  %v2236_v22 = vld [vmem:[%s2374_s25 + $0x2e8] sm:$0xff]  }
  0x30   : > { %v2237_v23 = vld [vmem:[%s2374_s25 + $0x228] sm:$0xff]   ;;  %v2239_v25 = vld [vmem:[%s2374_s25 + $0x260] sm:$0xff]   ;;  %v2247_v33 = vld [vmem:[%s2374_s25 + $0x250] sm:$0xff]  }
  0x31   : > { %1967 = vmatpush3.bf16.msra.mxu0 %v2181_v27  ;;  %v2238_v24 = vld [vmem:[%s2374_s25 + $0x2a8] sm:$0xff]   ;;  %v2240_v26 = vld [vmem:[%s2374_s25 + $0x2e0] sm:$0xff]   ;;  %v2248_v34 = vld [vmem:[%s2374_s25 + $0x2d0] sm:$0xff]  }
  0x32   : > { %1989 = vmatpush3.bf16.msra.mxu1 %v2182_v28  ;;  %1968 = vmatprep.subr.bf16.mxu0 %v2183_v29  ;;  %v2241_v27 = vld [vmem:[%s2374_s25 + $0x220] sm:$0xff]   ;;  %v2243_v29 = vld [vmem:[%s2374_s25 + $0x258] sm:$0xff]   ;;  %v2250_v36 = vld [vmem:[%s2374_s25 + $0x290] sm:$0xff]  }
  0x33   : > { %1990 = vmatprep.subr.bf16.mxu1 %v2184_v30  ;;  %v2242_v28 = vld [vmem:[%s2374_s25 + $0x2a0] sm:$0xff]   ;;  %v2244_v30 = vld [vmem:[%s2374_s25 + $0x2d8] sm:$0xff]   ;;  %v2252_v38 = vld [vmem:[%s2374_s25 + $0x2c8] sm:$0xff]  }
  0x34   : > { %v2283_v7 = vld [vmem:[%s2374_s25 + $0x350] sm:$0xff]  }
  0x35   : > { %1969 = vmatpush3.bf16.msra.mxu0 %v2185_v31  ;;  %v2245_v31 = vld [vmem:[%s2374_s25 + $0x218] sm:$0xff]   ;;  %v2286_v10 = vld [vmem:[%s2374_s25 + $0x390] sm:$0xff]  }
  0x36   : > { %1991 = vmatpush3.bf16.msra.mxu1 %v2186_v32  ;;  %1998 = vmatprep.subr.bf16.mxu0 %v2191_v39  ;;  %v2246_v32 = vld [vmem:[%s2374_s25 + $0x298] sm:$0xff]   ;;  %v2253_v39 = vld [vmem:[%s2374_s25 + $0x208] sm:$0xff]  }
  0x37   : > { %2020 = vmatprep.subr.bf16.mxu1 %v2192_v40  ;;  %v2254_v40 = vld [vmem:[%s2374_s25 + $0x288] sm:$0xff]  }
  0x38   : > { %1387 = vmatmul.mubr.bf16.vlgmr.msra.gmra.mxu0 %v1805_v35  ;;  %v2249_v35 = vld [vmem:[%s2374_s25 + $0x210] sm:$0xff]  }
  0x39   : > { %1427 = vmatmul.mubr.bf16.vlgmr.msra.gmra.mxu1 %v1807_v37  ;;  %1999 = vmatpush3.bf16.msra.mxu0 %v2193_v41  ;;  %v2251_v37 = vld [vmem:[%s2374_s25 + $0x248] sm:$0xff]   ;;  %v2255_v41 = vld [vmem:[%s2374_s25 + $0x240] sm:$0xff]  }
  0x3a   : > { %2021 = vmatpush3.bf16.msra.mxu1 %v2194_v42  ;;  %2000 = vmatprep.subr.bf16.mxu0 %v2195_v43  ;;  %v2256_v42 = vld [vmem:[%s2374_s25 + $0x2c0] sm:$0xff]  }
  0x3b   : > { %2022 = vmatprep.subr.bf16.mxu1 %v2196_v44  ;;  %1466 = vmatprep.mubr.bf16.mxu0 %v1810_v9  ;;  %v2257_v43 = vld [vmem:[%s2374_s25 + $0x200] sm:$0xff]   ;;  %v2285_v9 = vld [vmem:[%s2374_s25 + $0x310] sm:$0xff]  }
  0x3c   : > { %1506 = vmatprep.mubr.bf16.mxu1 %v1812_v12  ;;  %v2258_v44 = vld [vmem:[%s2374_s25 + $0x280] sm:$0xff]   ;;  %v2288_v12 = vld [vmem:[%s2374_s25 + $0x3c8] sm:$0xff]  }
  0x3d   : > { %2001 = vmatpush3.bf16.msra.mxu0 %v2197_v45  ;;  %v270_v45 = vld [vmem:[%s2369_s21 + $0x20] sm:$0xff] }
  0x3e   : > { %2023 = vmatpush3.bf16.msra.mxu1 %v2198_v46  ;;  %2002 = vmatprep.subr.bf16.mxu0 %v2199_v47  ;;  %v271_v46 = vld [vmem:[%s2369_s21 + $0x28] sm:$0xff]  ;;  %v1813_v47 = vcombine.low %v270_v45, %v270_v45 }
  0x3f   : > { %2024 = vmatprep.subr.bf16.mxu1 %v2200_v48  ;;  %v1814_v48 = vcombine.high %v270_v45, %v270_v45 }
  0x41   : > { %2003 = vmatpush3.bf16.msra.mxu0 %v2201_v49  ;;  %v1815_v49 = vcombine.low %v271_v46, %v271_v46 }
  0x42   : > { %2025 = vmatpush3.bf16.msra.mxu1 %v2202_v50  ;;  %2004 = vmatprep.subr.bf16.mxu0 %v2203_v51  ;;  %v1816_v50 = vcombine.high %v271_v46, %v271_v46  ;;  %v2263_v51 = vld [vmem:[%s2374_s25 + $0x378] sm:$0xff]  }
  0x43   : > { %2026 = vmatprep.subr.bf16.mxu1 %v2204_v52  ;;  %v2264_v52 = vld [vmem:[%s2374_s25 + $0x3f8] sm:$0xff]  }
  0x45   : > { %2005 = vmatpush3.bf16.msra.mxu0 %v2205_v53  ;;  %v2265_v53 = vld [vmem:[%s2374_s25 + $0x338] sm:$0xff]  }
  0x46   : > { %2027 = vmatpush3.bf16.msra.mxu1 %v2206_v54  ;;  %2006 = vmatprep.subr.bf16.mxu0 %v2207_v55  ;;  %v2266_v54 = vld [vmem:[%s2374_s25 + $0x3b8] sm:$0xff]   ;;  %v2267_v55 = vld [vmem:[%s2374_s25 + $0x370] sm:$0xff]  }
  0x47   : > { %2028 = vmatprep.subr.bf16.mxu1 %v2208_v56  ;;  %v2268_v56 = vld [vmem:[%s2374_s25 + $0x3f0] sm:$0xff]  }
  0x49   : > { %2007 = vmatpush3.bf16.msra.mxu0 %v2209_v57  ;;  %v2269_v57 = vld [vmem:[%s2374_s25 + $0x330] sm:$0xff]  }
  0x4a   : > { %2029 = vmatpush3.bf16.msra.mxu1 %v2210_v58  ;;  %2008 = vmatprep.subr.bf16.mxu0 %v2211_v59  ;;  %v2270_v58 = vld [vmem:[%s2374_s25 + $0x3b0] sm:$0xff]   ;;  %v2271_v59 = vld [vmem:[%s2374_s25 + $0x368] sm:$0xff]  }
  0x4b   : > { %2030 = vmatprep.subr.bf16.mxu1 %v2212_v60  ;;  %v2272_v60 = vld [vmem:[%s2374_s25 + $0x3e8] sm:$0xff]  }
  0x4d   : > { %2009 = vmatpush3.bf16.msra.mxu0 %v2213_v61  ;;  %v2273_v61 = vld [vmem:[%s2374_s25 + $0x328] sm:$0xff]  }
  0x4e   : > { %2031 = vmatpush3.bf16.msra.mxu1 %v2214_v62  ;;  %2010 = vmatprep.subr.bf16.mxu0 %v2215_v63  ;;  %v2274_v62 = vld [vmem:[%s2374_s25 + $0x3a8] sm:$0xff]   ;;  %v2275_v63 = vld [vmem:[%s2374_s25 + $0x360] sm:$0xff]  }
  0x4f   : > { %2032 = vmatprep.subr.bf16.mxu1 %v2216_v0  ;;  %v2276_v0 = vld [vmem:[%s2374_s25 + $0x3e0] sm:$0xff]  }
  0x51   : > { %2011 = vmatpush3.bf16.msra.mxu0 %v2217_v1  ;;  %v2277_v1 = vld [vmem:[%s2374_s25 + $0x320] sm:$0xff]  }
  0x52   : > { %2033 = vmatpush3.bf16.msra.mxu1 %v2218_v2  ;;  %2012 = vmatprep.subr.bf16.mxu0 %v2219_v3  ;;  %v2278_v2 = vld [vmem:[%s2374_s25 + $0x3a0] sm:$0xff]   ;;  %v2279_v3 = vld [vmem:[%s2374_s25 + $0x358] sm:$0xff]  }
  0x53   : > { %2034 = vmatprep.subr.bf16.mxu1 %v2220_v4  ;;  %v2280_v4 = vld [vmem:[%s2374_s25 + $0x3d8] sm:$0xff]  }
  0x55   : > { %2013 = vmatpush3.bf16.msra.mxu0 %v2221_v5  ;;  %v2281_v5 = vld [vmem:[%s2374_s25 + $0x318] sm:$0xff]  }
  0x56   : > { %2035 = vmatpush3.bf16.msra.mxu1 %v2222_v6  ;;  %2042 = vmatprep.subr.bf16.mxu0 %v2227_v13  ;;  %v2282_v6 = vld [vmem:[%s2374_s25 + $0x398] sm:$0xff]   ;;  %v2289_v13 = vld [vmem:[%s2374_s25 + $0x308] sm:$0xff]  }
  0x57   : > { %2064 = vmatprep.subr.bf16.mxu1 %v2228_v14  ;;  %v2290_v14 = vld [vmem:[%s2374_s25 + $0x388] sm:$0xff]  }
  0x58   : > { %1467 = vmatmul.mubr.bf16.vlgmr.msra.gmra.mxu0 %v1809_v8  ;;  %v2284_v8 = vld [vmem:[%s2374_s25 + $0x3d0] sm:$0xff]  }
  0x59   : > { %1507 = vmatmul.mubr.bf16.vlgmr.msra.gmra.mxu1 %v1811_v11  ;;  %2043 = vmatpush3.bf16.msra.mxu0 %v2229_v15  ;;  %v2287_v11 = vld [vmem:[%s2374_s25 + $0x348] sm:$0xff]   ;;  %v2291_v15 = vld [vmem:[%s2374_s25 + $0x340] sm:$0xff]  }
  0x5a   : > { %2065 = vmatpush3.bf16.msra.mxu1 %v2230_v16  ;;  %2044 = vmatprep.subr.bf16.mxu0 %v2231_v17  ;;  %v2292_v16 = vld [vmem:[%s2374_s25 + $0x3c0] sm:$0xff]  }
  0x5b   : > { %2066 = vmatprep.subr.bf16.mxu1 %v2232_v18  ;;  %1546 = vmatprep.mubr.bf16.mxu0 %v1814_v48  ;;  %v2293_v17 = vld [vmem:[%s2374_s25 + $0x300] sm:$0xff]  }
  0x5c   : > { %1586 = vmatprep.mubr.bf16.mxu1 %v1816_v50  ;;  %v2294_v18 = vld [vmem:[%s2374_s25 + $0x380] sm:$0xff]  }
  0x5d   : > { %2045 = vmatpush3.bf16.msra.mxu0 %v2233_v19  ;;  %v272_v19 = vld [vmem:[%s2369_s21 + $0x30] sm:$0xff] }
  0x5e   : > { %2067 = vmatpush3.bf16.msra.mxu1 %v2234_v20  ;;  %2046 = vmatprep.subr.bf16.mxu0 %v2235_v21  ;;  %v273_v20 = vld [vmem:[%s2369_s21 + $0x38] sm:$0xff]  ;;  %v1817_v21 = vcombine.low %v272_v19, %v272_v19 }
  0x5f   : > { %2068 = vmatprep.subr.bf16.mxu1 %v2236_v22  ;;  %v1818_v22 = vcombine.high %v272_v19, %v272_v19 }
  0x61   : > { %2047 = vmatpush3.bf16.msra.mxu0 %v2237_v23  ;;  %v1819_v23 = vcombine.low %v273_v20, %v273_v20 }
  0x62   : > { %2069 = vmatpush3.bf16.msra.mxu1 %v2238_v24  ;;  %2048 = vmatprep.subr.bf16.mxu0 %v2239_v25  ;;  %v1820_v24 = vcombine.high %v273_v20, %v273_v20 }
  0x63   : > { %2070 = vmatprep.subr.bf16.mxu1 %v2240_v26 }
  0x65   : > { %2049 = vmatpush3.bf16.msra.mxu0 %v2241_v27 }
  0x66   : > { %2071 = vmatpush3.bf16.msra.mxu1 %v2242_v28  ;;  %2050 = vmatprep.subr.bf16.mxu0 %v2243_v29 }
  0x67   : > { %2072 = vmatprep.subr.bf16.mxu1 %v2244_v30 }
  0x69   : > { %2051 = vmatpush3.bf16.msra.mxu0 %v2245_v31 }
  0x6a   : > { %2073 = vmatpush3.bf16.msra.mxu1 %v2246_v32  ;;  %2052 = vmatprep.subr.bf16.mxu0 %v2247_v33 }
  0x6b   : > { %2074 = vmatprep.subr.bf16.mxu1 %v2248_v34 }
  0x6d   : > { %2053 = vmatpush3.bf16.msra.mxu0 %v2249_v35 }
  0x6e   : > { %2075 = vmatpush3.bf16.msra.mxu1 %v2250_v36  ;;  %2054 = vmatprep.subr.bf16.mxu0 %v2251_v37 }
  0x6f   : > { %2076 = vmatprep.subr.bf16.mxu1 %v2252_v38 }
  0x71   : > { %2055 = vmatpush3.bf16.msra.mxu0 %v2253_v39 }
  0x72   : > { %2077 = vmatpush3.bf16.msra.mxu1 %v2254_v40  ;;  %2056 = vmatprep.subr.bf16.mxu0 %v2255_v41 }
  0x73   : > { %2078 = vmatprep.subr.bf16.mxu1 %v2256_v42 }
  0x75   : > { %2057 = vmatpush3.bf16.msra.mxu0 %v2257_v43 }
  0x76   : > { %2079 = vmatpush3.bf16.msra.mxu1 %v2258_v44  ;;  %2086 = vmatprep.subr.bf16.mxu0 %v2263_v51 }
  0x77   : > { %2108 = vmatprep.subr.bf16.mxu1 %v2264_v52 }
  0x78   : > { %1547 = vmatmul.mubr.bf16.vlgmr.msra.gmra.mxu0 %v1813_v47 }
  0x79   : > { %1587 = vmatmul.mubr.bf16.vlgmr.msra.gmra.mxu1 %v1815_v49  ;;  %2087 = vmatpush3.bf16.msra.mxu0 %v2265_v53 }
  0x7a   : > { %2109 = vmatpush3.bf16.msra.mxu1 %v2266_v54  ;;  %2088 = vmatprep.subr.bf16.mxu0 %v2267_v55 }
  0x7b   : > { %2110 = vmatprep.subr.bf16.mxu1 %v2268_v56  ;;  %1626 = vmatprep.mubr.bf16.mxu0 %v1818_v22 }
  0x7c   : > { %1666 = vmatprep.mubr.bf16.mxu1 %v1820_v24 }
  0x7d   : > { %2089 = vmatpush3.bf16.msra.mxu0 %v2269_v57 }
  0x7e   : > { %2111 = vmatpush3.bf16.msra.mxu1 %v2270_v58  ;;  %2090 = vmatprep.subr.bf16.mxu0 %v2271_v59 }
  0x7f   : > { %2112 = vmatprep.subr.bf16.mxu1 %v2272_v60 }
  0x81   : > { %2091 = vmatpush3.bf16.msra.mxu0 %v2273_v61 }
  0x82   : > { %2113 = vmatpush3.bf16.msra.mxu1 %v2274_v62  ;;  %2092 = vmatprep.subr.bf16.mxu0 %v2275_v63 }
  0x83   : > { %2114 = vmatprep.subr.bf16.mxu1 %v2276_v0 }
  0x85   : > { %2093 = vmatpush3.bf16.msra.mxu0 %v2277_v1 }
  0x86   : > { %2115 = vmatpush3.bf16.msra.mxu1 %v2278_v2  ;;  %2094 = vmatprep.subr.bf16.mxu0 %v2279_v3 }
  0x87   : > { %2116 = vmatprep.subr.bf16.mxu1 %v2280_v4 }
  0x89   : > { %2095 = vmatpush3.bf16.msra.mxu0 %v2281_v5  ;;  %v265_v5 = vld [vmem:[#allocation2] sm:$0xff] }
  0x8a   : > { %2117 = vmatpush3.bf16.msra.mxu1 %v2282_v6  ;;  %2096 = vmatprep.subr.bf16.mxu0 %v2283_v7 }
  0x8b   : > { %2118 = vmatprep.subr.bf16.mxu1 %v2284_v8 }
  0x8d   : > { %2097 = vmatpush3.bf16.msra.mxu0 %v2285_v9 }
  0x8e   : > { %2119 = vmatpush3.bf16.msra.mxu1 %v2286_v10  ;;  %2098 = vmatprep.subr.bf16.mxu0 %v2287_v11 }
  0x8f   : > { %2120 = vmatprep.subr.bf16.mxu1 %v2288_v12 }
  0x91   : > { %2099 = vmatpush3.bf16.msra.mxu0 %v2289_v13 }
  0x92   : > { %2121 = vmatpush3.bf16.msra.mxu1 %v2290_v14  ;;  %2100 = vmatprep.subr.bf16.mxu0 %v2291_v15 }
  0x93   : > { %2122 = vmatprep.subr.bf16.mxu1 %v2292_v16 }
  0x95   : > { %2101 = vmatpush3.bf16.msra.mxu0 %v2293_v17 }
  0x96   : > { %2123 = vmatpush3.bf16.msra.mxu1 %v2294_v18 }
  0x98   : > { %1627 = vmatmul.mubr.bf16.vlgmr.msra.gmra.mxu0 %v1817_v21 }
  0x99   : > { %1667 = vmatmul.mubr.bf16.vlgmr.msra.gmra.mxu1 %v1819_v23 }
  0xf8   : > { %v1970_v25 = vpop.f32.mrf.mxu0 }
  0xf9   : > { %v1992_v26 = vpop.f32.mrf.mxu1 }
  0xfa   : > { %v1971_v27 = vpop.f32.mrf.mxu0 }
  0xfb   : > { %v1993_v28 = vpop.f32.mrf.mxu1  ;;  %v1972_v29 = vadd.f32 %v1971_v27, %v1970_v25 }
  0xfc   : > { %v1994_v30 = vadd.f32 %v1993_v28, %v1992_v26  ;;  %v1973_v31 = vpop.f32.mrf.mxu0 }
  0xfd   : > { %v1995_v32 = vpop.f32.mrf.mxu1 }
  0xfe   : > { %v1429_v33 = vadd.f32 %v1994_v30, %v1972_v29  ;;  %v1974_v34 = vpop.f32.mrf.mxu0 }
  0xff   : > { %v1996_v35 = vpop.f32.mrf.mxu1 }
 0x118   : > { %v2014_v36 = vpop.f32.mrf.mxu0 }
 0x119   : > { %v2036_v37 = vpop.f32.mrf.mxu1 }
 0x11a   : > { %v2015_v38 = vpop.f32.mrf.mxu0 }
 0x11b   : > { %v2037_v39 = vpop.f32.mrf.mxu1  ;;  %v2016_v52 = vadd.f32 %v2015_v38, %v2014_v36 }
 0x11c   : > { %v2017_v40 = vpop.f32.mrf.mxu0  ;;  %v2038_v54 = vadd.f32 %v2037_v39, %v2036_v37 }
 0x11d   : > { %v2039_v41 = vpop.f32.mrf.mxu1  ;;  %v1469_v53 = vadd.f32 %v2016_v52, %v1429_v33 }
 0x11e   : > { %v2018_v42 = vpop.f32.mrf.mxu0 }
 0x11f   : > { %v2040_v43 = vpop.f32.mrf.mxu1  ;;  %v1509_v56 = vadd.f32 %v2038_v54, %v1469_v53 }
 0x138   : > { %v2058_v44 = vpop.f32.mrf.mxu0 }
 0x139   : > { %v2080_v45 = vpop.f32.mrf.mxu1 }
 0x13a   : > { %v2059_v46 = vpop.f32.mrf.mxu0 }
 0x13b   : > { %v2081_v47 = vpop.f32.mrf.mxu1  ;;  %v2060_v55 = vadd.f32 %v2059_v46, %v2058_v44 }
 0x13c   : > { %v2061_v48 = vpop.f32.mrf.mxu0  ;;  %v2082_v58 = vadd.f32 %v2081_v47, %v2080_v45 }
 0x13d   : > { %v2083_v49 = vpop.f32.mrf.mxu1  ;;  %v1549_v57 = vadd.f32 %v2060_v55, %v1509_v56 }
 0x13e   : > { %v2062_v50 = vpop.f32.mrf.mxu0 }
 0x13f   : > { %v2084_v51 = vpop.f32.mrf.mxu1  ;;  %v1589_v62 = vadd.f32 %v2082_v58, %v1549_v57 }
 0x158   : > { %v2102_v59 = vpop.f32.mrf.mxu0 }
 0x159   : > { %v2124_v60 = vpop.f32.mrf.mxu1 }
 0x15a   : > { %v2103_v61 = vpop.f32.mrf.mxu0 }
 0x15b   : > { %v2104_v63 = vadd.f32 %v2103_v61, %v2102_v59  ;;  %v2125_v0 = vpop.f32.mrf.mxu1 }
 0x15c   : > { %v2105_v1 = vpop.f32.mrf.mxu0  ;;  %v2126_v3 = vadd.f32 %v2125_v0, %v2124_v60 }
 0x15d   : > { %v1629_v2 = vadd.f32 %v2104_v63, %v1589_v62  ;;  %v2127_v4 = vpop.f32.mrf.mxu1 }
 0x15e   : > { %v2106_v6 = vpop.f32.mrf.mxu0 }
 0x15f   : > { %v1669_v7 = vadd.f32 %v2126_v3, %v1629_v2  ;;  %v2128_v8 = vpop.f32.mrf.mxu1  ;;  %1679 = sbr.rel (%p1949_p7) target bundleno = 366 (0x16e), region = 40 }
 0x161   : > { %v1674_v9 = vadd.f32 %v1669_v7, %v265_v5 }
 0x163   : > { %1675 = vst [vmem:[#allocation2] sm:$0xff] %v1674_v9 }
 0x164   : > { %v1950_v11 = vld [vmem:[%s2531_s2] ss:$0 sm:$0xff] }
 0x16a   : > { %v1680_v10 = vld [vmem:[#allocation2] sm:$0xff] }
 0x16b   : > { %v1688_v12 = vadd.f32 %v1950_v11, %v1680_v10 }
 0x16d   : > { %1689 = vst [vmem:[%s2532_s3] sm:$0xff] %v1688_v12 }
 0x16e PF: > { %s13_s14 = sadd.s32 1, %s2321_s14   ;;  %s2533_s12 = smov %s2317_s13 }
 0x16f   : > { %p10_p8 = scmp.ge.s32.totalorder %s13_s14, 6   ;;  %s2534_s13 = smov %s2536_s15 }
 0x171   :  { %12 = sbr.rel (!%p10_p8) target bundleno = 2 (0x2), region = 76 }

</bundles_post_ra>
